<compile_context>
chip_gen: v6e
topology: v6e:2x2x1
jax: 0.10.0
libtpu: 0.0.40
codegen_flags: <defaults>
</compile_context>

<pallas_src>
import functools

import jax
import jax.numpy as jnp
from jax import lax
from jax.experimental import pallas as pl
from jax.experimental.pallas import tpu as pltpu

EPS = 1e-5
LANE = 128


def _round_up(x, m):
    return (x + m - 1) // m * m


def _vmem_budget_bytes():
    """Per-generation VMEM budget: 3/4 of per-core capacity (fallback: v7x 64 MiB)."""
    cap = 64 << 20
    try:
        info = pltpu.get_tpu_info()
        for attr in ("vmem_capacity_bytes", "vmem_bytes", "vmem_size_bytes"):
            v = getattr(info, attr, None)
            if v:
                cap = int(v)
                break
    except Exception:
        pass
    return (cap * 3) // 4          # headroom for Mosaic internal scratch / spills


def _resident_vmem_estimate(n_pad, c_in):
    """Rough bytes for the fully-resident fast path (conservative on temporaries)."""
    return (n_pad * n_pad * 2                          # A bf16
            + n_pad * _round_up(c_in, LANE) * 4        # X f32
            + 8 * n_pad * LANE * 4                     # live f32 temporaries
            + n_pad * LANE * 4                         # output
            + (2 << 20))                               # weights / misc slack


def _pick_block_rows(n_pad, c_in, budget_bytes, a_buffers=2):
    """Largest row tile whose total VMEM (A buffers + scratch + residents) fits."""
    fixed = (n_pad * LANE * 2                          # p1 bf16 (lane-padded)
             + n_pad * LANE * 2                        # H1 bf16
             + n_pad * LANE * 4                        # pre-BN H2 f32
             + n_pad * LANE * 2                        # h2n bf16
             + n_pad * LANE * 2                        # H3 bf16
             + n_pad * _round_up(c_in, LANE) * 4 * 2   # resident X (x2 buffers)
             + n_pad * LANE * 4 * 2                    # resident output (x2 buffers)
             + (2 << 20))                              # weights, BN sums, slack
    for bm in (1024, 512, 256, 128, 64, 32, 16, 8):
        if n_pad % bm:
            continue
        if fixed + a_buffers * bm * n_pad * 2 <= budget_bytes:
            return bm
    return 8


# --------------------------------------------------------------------------- #
# Resident fast path: everything in VMEM, single grid-less step.
# --------------------------------------------------------------------------- #
def dense_layer_resident_kernel(a_ref, x_ref,
                                wi1_ref, bi1_ref, wi2_ref, bi2_ref, g1_ref, be1_ref,
                                wo1_ref, bo1_ref, wo2_ref, bo2_ref, g2_ref, be2_ref,
                                o_ref, *, n_real):
    a = a_ref[...]                                     # bf16 (n_pad, n_pad)
    inv_n = 1.0 / float(n_real)

    def graph_conv_bn(h, w1_ref, b1_ref, w2_ref, b2_ref, g_ref, be_ref):
        p = jnp.dot(h, w1_ref[...], preferred_element_type=jnp.float32)
        h1 = jnp.dot(a, p.astype(jnp.bfloat16),
                     preferred_element_type=jnp.float32) + b1_ref[...]
        t = jnp.dot(a, h1.astype(jnp.bfloat16),
                    preferred_element_type=jnp.float32)
        h2 = jnp.dot(t, w2_ref[...], preferred_element_type=jnp.float32) + b2_ref[...]
        # NodeBN, training batch stats, biased variance, two-pass over valid rows.
        valid = lax.broadcasted_iota(jnp.int32, h2.shape, 0) < n_real
        mean = jnp.sum(jnp.where(valid, h2, 0.0), axis=0, keepdims=True) * inv_n
        diff = jnp.where(valid, h2 - mean, 0.0)
        var = jnp.sum(diff * diff, axis=0, keepdims=True) * inv_n
        scale = g_ref[...] * lax.rsqrt(var + EPS)
        shift = be_ref[...] - mean * scale
        return jnp.maximum(h2 * scale + shift, 0.0)

    h = graph_conv_bn(x_ref[...], wi1_ref, bi1_ref, wi2_ref, bi2_ref, g1_ref, be1_ref)
    o_ref[...] = graph_conv_bn(h, wo1_ref, bo1_ref, wo2_ref, bo2_ref, g2_ref, be2_ref)


# --------------------------------------------------------------------------- #
# Streamed path: phases x row-blocks, A_hat streamed in (block_rows, n_pad) tiles.
# --------------------------------------------------------------------------- #
def dense_layer_streamed_kernel(a_ref, x_ref,
                                wi1_ref, bi1_ref, wi2_ref, bi2_ref, g1_ref, be1_ref,
                                wo1_ref, bo1_ref, wo2_ref, bo2_ref, g2_ref, be2_ref,
                                o_ref,
                                p1_s, h1_s, h2_s, h2n_s, h3_s, sum1_s, sum2_s,
                                *, n_real, block_rows, num_blocks):
    p = pl.program_id(0)            # phase
    i = pl.program_id(1)            # node-row block
    last = num_blocks - 1
    rows = pl.ds(pl.multiple_of(i * block_rows, 8), block_rows)
    inv_n = 1.0 / float(n_real)
    # Blocks with index >= first_pad_block contain padded rows (static value).
    first_pad_block = n_real // block_rows

    def accum_sum(h, sum_s):
        def add(masked):
            hm = h
            if masked:
                valid = (lax.broadcasted_iota(jnp.int32, h.shape, 0)
                         < (n_real - i * block_rows))
                hm = jnp.where(valid, h, 0.0)
            sum_s[...] += jnp.sum(hm, axis=0, keepdims=True)

        if first_pad_block >= num_blocks:       # no padded rows anywhere
            add(False)
        elif first_pad_block == 0:              # every block may contain padding
            add(True)
        else:                                   # mask only boundary/padded blocks
            @pl.when(i < first_pad_block)
            def _():
                add(False)

            @pl.when(i >= first_pad_block)
            def _():
                add(True)

    def bn_scale_shift(mean, h_full, g_ref, b_ref):
        # Two-pass variance over the VMEM-resident pre-BN activations.
        valid = lax.broadcasted_iota(jnp.int32, h_full.shape, 0) < n_real
        diff = jnp.where(valid, h_full - mean, 0.0)
        var = jnp.sum(diff * diff, axis=0, keepdims=True) * inv_n
        scale = g_ref[...] * lax.rsqrt(var + EPS)
        shift = b_ref[...] - mean * scale
        return scale, shift

    # ---- phase 0: H1 = A @ (X Wi1) + bi1 -----------------------------------
    @pl.when(p == 0)
    def _():
        @pl.when(i == 0)
        def _():
            p1_s[...] = jnp.dot(x_ref[...], wi1_ref[...],
                                preferred_element_type=jnp.float32
                                ).astype(p1_s.dtype)
        h1 = jnp.dot(a_ref[...], p1_s[...],
                     preferred_element_type=jnp.float32) + bi1_ref[...]
        h1_s[rows, :] = h1.astype(h1_s.dtype)

    # ---- phase 1: H2 = (A @ H1) Wi2 + bi2 ; BN1 sums ; elementwise epilogue --
    @pl.when(p == 1)
    def _():
        @pl.when(i == 0)
        def _():
            sum1_s[...] = jnp.zeros_like(sum1_s)
        t = jnp.dot(a_ref[...], h1_s[...], preferred_element_type=jnp.float32)
        h2 = jnp.dot(t, wi2_ref[...],
                     preferred_element_type=jnp.float32) + bi2_ref[...]
        h2_s[rows, :] = h2
        accum_sum(h2, sum1_s)

        @pl.when(i == last)
        def _():
            mean = sum1_s[...] * inv_n
            scale, shift = bn_scale_shift(mean, h2_s[...], g1_ref, be1_ref)
            h2n_s[...] = jnp.maximum(h2_s[...] * scale + shift,
                                     0.0).astype(h2n_s.dtype)

    # ---- phase 2: H3 = (A @ h2n) Wo1 + bo1  (Wo1 reassociated per block) -----
    @pl.when(p == 2)
    def _():
        t = jnp.dot(a_ref[...], h2n_s[...], preferred_element_type=jnp.float32)
        h3 = jnp.dot(t, wo1_ref[...],
                     preferred_element_type=jnp.float32) + bo1_ref[...]
        h3_s[rows, :] = h3.astype(h3_s.dtype)

    # ---- phase 3: H4 = (A @ H3) Wo2 + bo2 ; BN2 sums ; final epilogue --------
    @pl.when(p == 3)
    def _():
        @pl.when(i == 0)
        def _():
            sum2_s[...] = jnp.zeros_like(sum2_s)
        t = jnp.dot(a_ref[...], h3_s[...], preferred_element_type=jnp.float32)
        h4 = jnp.dot(t, wo2_ref[...],
                     preferred_element_type=jnp.float32) + bo2_ref[...]
        o_ref[rows, :] = h4                     # pre-BN H4, output stays resident
        accum_sum(h4, sum2_s)

        @pl.when(i == last)
        def _():
            mean = sum2_s[...] * inv_n
            scale, shift = bn_scale_shift(mean, o_ref[...], g2_ref, be2_ref)
            o_ref[...] = jnp.maximum(o_ref[...] * scale + shift, 0.0)


# --------------------------------------------------------------------------- #
# Plain-JAX glue + wrapper
# --------------------------------------------------------------------------- #
def normalized_adjacency(edge_index, num_nodes):
    """Dense A_hat = D^{-1/2} (A + I) D^{-1/2}. Build once for static graphs."""
    src, dst = edge_index
    a = jnp.zeros((num_nodes, num_nodes), jnp.float32)
    a = a.at[dst, src].set(1.0)
    a = a + jnp.eye(num_nodes, dtype=jnp.float32)
    deg = jnp.sum(a, axis=1)
    d_inv_sqrt = jnp.where(deg > 0, 1.0 / jnp.sqrt(deg), 0.0)
    return a * d_inv_sqrt[:, None] * d_inv_sqrt[None, :]


def dense_layer_forward(x_list, edge_index=None, params=None, *,
                        a_hat=None, block_rows=None, force_streamed=False):
    """DenseLayer.forward: concat node features, run the fused Pallas kernel."""
    x = jnp.concatenate(x_list, axis=1).astype(jnp.float32)   # torch.cat(data.x, 1)
    n = x.shape[0]
    if a_hat is None:
        a_hat = normalized_adjacency(edge_index, n)

    c_in = x.shape[1]
    hid1 = params["wi1"].shape[1]      # 16
    mid = params["wi2"].shape[1]       # growth_rate * bn_size (128)
    hid2 = params["wo1"].shape[1]      # 32
    growth = params["wo2"].shape[1]    # growth_rate (32)

    n_pad = _round_up(max(n, 8), LANE)
    budget = _vmem_budget_bytes()

    # bf16 adjacency: half the HBM/VMEM bytes, bf16-native MXU; padded rows/cols zero.
    a_p = jnp.zeros((n_pad, n_pad), jnp.bfloat16).at[:n, :n].set(
        a_hat.astype(jnp.bfloat16))
    x_p = jnp.zeros((n_pad, c_in), jnp.float32).at[:n, :].set(x)

    inputs = (a_p, x_p,
              params["wi1"], params["bi1"], params["wi2"], params["bi2"],
              params["g1"], params["be1"],
              params["wo1"], params["bo1"], params["wo2"], params["bo2"],
              params["g2"], params["be2"])

    use_resident = (not force_streamed
                    and _resident_vmem_estimate(n_pad, c_in) <= budget)

    if use_resident:
        out = pl.pallas_call(
            functools.partial(dense_layer_resident_kernel, n_real=n),
            out_shape=jax.ShapeDtypeStruct((n_pad, growth), jnp.float32),
            compiler_params=pltpu.CompilerParams(vmem_limit_bytes=budget),
        )(*inputs)
        return out[:n]

    # ---- streamed path -------------------------------------------------------
    if block_rows is None:
        block_rows = _pick_block_rows(n_pad, c_in, budget)
    assert n_pad % block_rows == 0 and block_rows % 8 == 0
    nb = n_pad // block_rows

    a_spec = pl.BlockSpec((block_rows, n_pad), lambda p, i: (i, 0))
    resident = [pl.BlockSpec(arr.shape, lambda p, i: (0, 0)) for arr in inputs[1:]]
    out_spec = pl.BlockSpec((n_pad, growth), lambda p, i: (0, 0))

    kernel = functools.partial(dense_layer_streamed_kernel,
                               n_real=n, block_rows=block_rows, num_blocks=nb)

    out = pl.pallas_call(
        kernel,
        out_shape=jax.ShapeDtypeStruct((n_pad, growth), jnp.float32),
        grid=(4, nb),
        in_specs=[a_spec] + resident,
        out_specs=out_spec,
        scratch_shapes=[
            pltpu.VMEM((n_pad, hid1), jnp.bfloat16),   # X @ Wi1
            pltpu.VMEM((n_pad, hid1), jnp.bfloat16),   # H1
            pltpu.VMEM((n_pad, mid), jnp.float32),     # pre-BN H2
            pltpu.VMEM((n_pad, mid), jnp.bfloat16),    # h2n = relu(BN1(H2))
            pltpu.VMEM((n_pad, hid2), jnp.bfloat16),   # H3
            pltpu.VMEM((1, mid), jnp.float32),         # BN1 row sum
            pltpu.VMEM((1, growth), jnp.float32),      # BN2 row sum
        ],
        compiler_params=pltpu.CompilerParams(
            # Both axes carry scratch dependencies (BN stats, full-H reuse), so
            # they must stay "arbitrary"; v7x megacore needs a cross-core BN
            # reduction (see TODO at top).
            dimension_semantics=("arbitrary", "arbitrary"),
            vmem_limit_bytes=budget,
        ),
    )(*inputs)
    return out[:n]


def init_params(key, num_input_features, growth_rate=32, bn_size=4):
    """Deterministic synthetic parameters matching DenseLayer.__init__ shapes."""
    mid = int(growth_rate * bn_size)   # 128
    ks = jax.random.split(key, 4)

    def lin(k, fan_in, fan_out):
        return (jax.random.normal(k, (fan_in, fan_out), jnp.float32)
                / jnp.sqrt(jnp.float32(fan_in)))

    return {
        # convLayerIn : GCNConv(C_in, 16) -> GCNConv(16, mid) -> NodeBN(mid)
        "wi1": lin(ks[0], num_input_features, 16),
        "bi1": jnp.zeros((1, 16), jnp.float32),
        "wi2": lin(ks[1], 16, mid),
        "bi2": jnp.zeros((1, mid), jnp.float32),
        "g1": jnp.ones((1, mid), jnp.float32),
        "be1": jnp.zeros((1, mid), jnp.float32),
        # convLayerOut: GCNConv(mid, 32) -> GCNConv(32, growth) -> NodeBN(growth)
        "wo1": lin(ks[2], mid, 32),
        "bo1": jnp.zeros((1, 32), jnp.float32),
        "wo2": lin(ks[3], 32, growth_rate),
        "bo2": jnp.zeros((1, growth_rate), jnp.float32),
        "g2": jnp.ones((1, growth_rate), jnp.float32),
        "be2": jnp.zeros((1, growth_rate), jnp.float32),
    }


def dense_layer_reference(x_list, a_hat, params):
    """Pure-JAX f32 reference (no bf16, no tiling) for validation."""
    x = jnp.concatenate(x_list, axis=1).astype(jnp.float32)

    def graph_conv_bn(h, w1, b1, w2, b2, g, be):
        h = a_hat @ (h @ w1) + b1
        h = a_hat @ (h @ w2) + b2
        m = jnp.mean(h, axis=0, keepdims=True)
        v = jnp.mean((h - m) ** 2, axis=0, keepdims=True)
        return jnp.maximum((h - m) * lax.rsqrt(v + EPS) * g + be, 0.0)

    h = graph_conv_bn(x, params["wi1"], params["bi1"], params["wi2"],
                      params["bi2"], params["g1"], params["be1"])
    return graph_conv_bn(h, params["wo1"], params["bo1"], params["wo2"],
                         params["bo2"], params["g2"], params["be2"])


if __name__ == "__main__":
    key = jax.random.PRNGKey(0)
    k_x1, k_x2, k_p = jax.random.split(key, 3)

    num_nodes = 200            # pads to 256
    # data.x is a list of feature tensors concatenated along dim 1.
    x_list = [jax.random.normal(k_x1, (num_nodes, 4), jnp.float32),
              jax.random.normal(k_x2, (num_nodes, 4), jnp.float32)]
    num_input_features = sum(xi.shape[1] for xi in x_list)

    # Undirected ring graph as edge_index [2, E].
    src = jnp.arange(num_nodes, dtype=jnp.int32)
    dst = (src + 1) % num_nodes
    edge_index = (jnp.concatenate([src, dst]), jnp.concatenate([dst, src]))

    params = init_params(k_p, num_input_features, growth_rate=32, bn_size=4)

    # Static graph: build A_hat once, hoisted out of the per-call path.
    a_hat = normalized_adjacency(edge_index, num_nodes)
    ref = dense_layer_reference(x_list, a_hat, params)

    # 1) Auto path (VMEM-resident fast path for this small graph).
    out_r = dense_layer_forward(x_list, edge_index, params, a_hat=a_hat)
    jax.block_until_ready(out_r)

    # 2) Forced streamed path (validates the large-graph phase x row-block kernel).
    out_s = dense_layer_forward(x_list, edge_index, params, a_hat=a_hat,
                                force_streamed=True, block_rows=128)
    jax.block_until_ready(out_s)

    assert out_r.shape == (num_nodes, 32) and out_s.shape == (num_nodes, 32)
    assert bool(jnp.all(jnp.isfinite(out_r))) and bool(jnp.all(jnp.isfinite(out_s)))
    denom = float(jnp.linalg.norm(ref)) + 1e-6
    rel_r = float(jnp.linalg.norm(out_r - ref)) / denom
    rel_s = float(jnp.linalg.norm(out_s - ref)) / denom
    assert rel_r < 5e-2, f"resident path relative error too large: {rel_r}"
    assert rel_s < 5e-2, f"streamed path relative error too large: {rel_s}"
    print("KERNEL_OK")
</pallas_src>

<mosaic_0001>
module attributes {stable_mosaic.version = 11 : i64} {
  func.func @dense_layer_resident_kernel(%arg0: memref<256x256xbf16, #tpu.memory_space<vmem>>, %arg1: memref<256x8xf32, #tpu.memory_space<vmem>>, %arg2: memref<8x16xf32, #tpu.memory_space<vmem>>, %arg3: memref<1x16xf32, #tpu.memory_space<vmem>>, %arg4: memref<16x128xf32, #tpu.memory_space<vmem>>, %arg5: memref<1x128xf32, #tpu.memory_space<vmem>>, %arg6: memref<1x128xf32, #tpu.memory_space<vmem>>, %arg7: memref<1x128xf32, #tpu.memory_space<vmem>>, %arg8: memref<128x32xf32, #tpu.memory_space<vmem>>, %arg9: memref<1x32xf32, #tpu.memory_space<vmem>>, %arg10: memref<32x32xf32, #tpu.memory_space<vmem>>, %arg11: memref<1x32xf32, #tpu.memory_space<vmem>>, %arg12: memref<1x32xf32, #tpu.memory_space<vmem>>, %arg13: memref<1x32xf32, #tpu.memory_space<vmem>>, %arg14: memref<256x32xf32, #tpu.memory_space<vmem>>) attributes {dimension_semantics = [], scalar_prefetch = 0 : i64, scratch_operands = 0 : i64, tpu.core_type = #tpu.core_type<tc>} {
    %c0 = arith.constant 0 : index
    %c0_0 = arith.constant 0 : index
    %0 = vector.load %arg0[%c0, %c0_0] : memref<256x256xbf16, #tpu.memory_space<vmem>>, vector<256x256xbf16>
    %c0_1 = arith.constant 0 : index
    %c0_2 = arith.constant 0 : index
    %1 = vector.load %arg1[%c0_1, %c0_2] : memref<256x8xf32, #tpu.memory_space<vmem>>, vector<256x8xf32>
    %c0_3 = arith.constant 0 : index
    %c0_4 = arith.constant 0 : index
    %2 = vector.load %arg2[%c0_3, %c0_4] : memref<8x16xf32, #tpu.memory_space<vmem>>, vector<8x16xf32>
    %cst = arith.constant dense<0.000000e+00> : vector<256x16xf32>
    %3 = tpu.matmul %1, %2, %cst {dimension_numbers = #tpu.dot_dimension_numbers<[1], [0], [0], [1], [0, 0, 1, 1], [], []>} : vector<256x8xf32>, vector<8x16xf32>, vector<256x16xf32> -> vector<256x16xf32>
    %4 = arith.truncf %3 : vector<256x16xf32> to vector<256x16xbf16>
    %cst_5 = arith.constant dense<0.000000e+00> : vector<256x16xf32>
    %5 = tpu.matmul %0, %4, %cst_5 {dimension_numbers = #tpu.dot_dimension_numbers<[1], [0], [0], [1], [0, 0, 1, 1], [], []>} : vector<256x256xbf16>, vector<256x16xbf16>, vector<256x16xf32> -> vector<256x16xf32>
    %c0_6 = arith.constant 0 : index
    %c0_7 = arith.constant 0 : index
    %6 = vector.load %arg3[%c0_6, %c0_7] : memref<1x16xf32, #tpu.memory_space<vmem>>, vector<1x16xf32>
    %7 = vector.broadcast %6 : vector<1x16xf32> to vector<256x16xf32>
    %8 = arith.addf %5, %7 : vector<256x16xf32>
    %9 = arith.truncf %8 : vector<256x16xf32> to vector<256x16xbf16>
    %cst_8 = arith.constant dense<0.000000e+00> : vector<256x16xf32>
    %10 = tpu.matmul %0, %9, %cst_8 {dimension_numbers = #tpu.dot_dimension_numbers<[1], [0], [0], [1], [0, 0, 1, 1], [], []>} : vector<256x256xbf16>, vector<256x16xbf16>, vector<256x16xf32> -> vector<256x16xf32>
    %c0_9 = arith.constant 0 : index
    %c0_10 = arith.constant 0 : index
    %11 = vector.load %arg4[%c0_9, %c0_10] : memref<16x128xf32, #tpu.memory_space<vmem>>, vector<16x128xf32>
    %cst_11 = arith.constant dense<0.000000e+00> : vector<256x128xf32>
    %12 = tpu.matmul %10, %11, %cst_11 {dimension_numbers = #tpu.dot_dimension_numbers<[1], [0], [0], [1], [0, 0, 1, 1], [], []>} : vector<256x16xf32>, vector<16x128xf32>, vector<256x128xf32> -> vector<256x128xf32>
    %c0_12 = arith.constant 0 : index
    %c0_13 = arith.constant 0 : index
    %13 = vector.load %arg5[%c0_12, %c0_13] : memref<1x128xf32, #tpu.memory_space<vmem>>, vector<1x128xf32>
    %14 = vector.broadcast %13 : vector<1x128xf32> to vector<256x128xf32>
    %15 = arith.addf %12, %14 : vector<256x128xf32>
    %16 = tpu.iota {dimensions = array<i32: 0>} : vector<256x128xi32>
    %c200_i32 = arith.constant 200 : i32
    %17 = vector.broadcast %c200_i32 : i32 to vector<256x128xi32>
    %18 = arith.cmpi slt, %16, %17 : vector<256x128xi32>
    %cst_14 = arith.constant 0.000000e+00 : f32
    %19 = vector.broadcast %cst_14 : f32 to vector<256x128xf32>
    %20 = arith.select %18, %15, %19 : vector<256x128xi1>, vector<256x128xf32>
    %cst_15 = arith.constant dense<0.000000e+00> : vector<128xf32>
    %21 = vector.multi_reduction <add>, %20, %cst_15 [0] : vector<256x128xf32> to vector<128xf32>
    %22 = vector.shape_cast %21 : vector<128xf32> to vector<1x128xf32>
    %cst_16 = arith.constant 5.000000e-03 : f32
    %23 = vector.broadcast %cst_16 : f32 to vector<1x128xf32>
    %24 = arith.mulf %22, %23 : vector<1x128xf32>
    %25 = vector.broadcast %24 : vector<1x128xf32> to vector<256x128xf32>
    %26 = arith.subf %15, %25 : vector<256x128xf32>
    %cst_17 = arith.constant 0.000000e+00 : f32
    %27 = vector.broadcast %cst_17 : f32 to vector<256x128xf32>
    %28 = arith.select %18, %26, %27 : vector<256x128xi1>, vector<256x128xf32>
    %29 = arith.mulf %28, %28 : vector<256x128xf32>
    %cst_18 = arith.constant dense<0.000000e+00> : vector<128xf32>
    %30 = vector.multi_reduction <add>, %29, %cst_18 [0] : vector<256x128xf32> to vector<128xf32>
    %31 = vector.shape_cast %30 : vector<128xf32> to vector<1x128xf32>
    %cst_19 = arith.constant 5.000000e-03 : f32
    %32 = vector.broadcast %cst_19 : f32 to vector<1x128xf32>
    %33 = arith.mulf %31, %32 : vector<1x128xf32>
    %c0_20 = arith.constant 0 : index
    %c0_21 = arith.constant 0 : index
    %34 = vector.load %arg6[%c0_20, %c0_21] : memref<1x128xf32, #tpu.memory_space<vmem>>, vector<1x128xf32>
    %cst_22 = arith.constant 9.99999974E-6 : f32
    %35 = vector.broadcast %cst_22 : f32 to vector<1x128xf32>
    %36 = arith.addf %33, %35 : vector<1x128xf32>
    %37 = math.rsqrt %36 : vector<1x128xf32>
    %38 = arith.mulf %34, %37 : vector<1x128xf32>
    %c0_23 = arith.constant 0 : index
    %c0_24 = arith.constant 0 : index
    %39 = vector.load %arg7[%c0_23, %c0_24] : memref<1x128xf32, #tpu.memory_space<vmem>>, vector<1x128xf32>
    %40 = arith.mulf %24, %38 : vector<1x128xf32>
    %41 = arith.subf %39, %40 : vector<1x128xf32>
    %42 = vector.broadcast %38 : vector<1x128xf32> to vector<256x128xf32>
    %43 = arith.mulf %15, %42 : vector<256x128xf32>
    %44 = vector.broadcast %41 : vector<1x128xf32> to vector<256x128xf32>
    %45 = arith.addf %43, %44 : vector<256x128xf32>
    %cst_25 = arith.constant 0.000000e+00 : f32
    %46 = vector.broadcast %cst_25 : f32 to vector<256x128xf32>
    %47 = arith.maximumf %45, %46 : vector<256x128xf32>
    %c0_26 = arith.constant 0 : index
    %c0_27 = arith.constant 0 : index
    %48 = vector.load %arg8[%c0_26, %c0_27] : memref<128x32xf32, #tpu.memory_space<vmem>>, vector<128x32xf32>
    %cst_28 = arith.constant dense<0.000000e+00> : vector<256x32xf32>
    %49 = tpu.matmul %47, %48, %cst_28 {dimension_numbers = #tpu.dot_dimension_numbers<[1], [0], [0], [1], [0, 0, 1, 1], [], []>} : vector<256x128xf32>, vector<128x32xf32>, vector<256x32xf32> -> vector<256x32xf32>
    %50 = arith.truncf %49 : vector<256x32xf32> to vector<256x32xbf16>
    %cst_29 = arith.constant dense<0.000000e+00> : vector<256x32xf32>
    %51 = tpu.matmul %0, %50, %cst_29 {dimension_numbers = #tpu.dot_dimension_numbers<[1], [0], [0], [1], [0, 0, 1, 1], [], []>} : vector<256x256xbf16>, vector<256x32xbf16>, vector<256x32xf32> -> vector<256x32xf32>
    %c0_30 = arith.constant 0 : index
    %c0_31 = arith.constant 0 : index
    %52 = vector.load %arg9[%c0_30, %c0_31] : memref<1x32xf32, #tpu.memory_space<vmem>>, vector<1x32xf32>
    %53 = vector.broadcast %52 : vector<1x32xf32> to vector<256x32xf32>
    %54 = arith.addf %51, %53 : vector<256x32xf32>
    %55 = arith.truncf %54 : vector<256x32xf32> to vector<256x32xbf16>
    %cst_32 = arith.constant dense<0.000000e+00> : vector<256x32xf32>
    %56 = tpu.matmul %0, %55, %cst_32 {dimension_numbers = #tpu.dot_dimension_numbers<[1], [0], [0], [1], [0, 0, 1, 1], [], []>} : vector<256x256xbf16>, vector<256x32xbf16>, vector<256x32xf32> -> vector<256x32xf32>
    %c0_33 = arith.constant 0 : index
    %c0_34 = arith.constant 0 : index
    %57 = vector.load %arg10[%c0_33, %c0_34] : memref<32x32xf32, #tpu.memory_space<vmem>>, vector<32x32xf32>
    %cst_35 = arith.constant dense<0.000000e+00> : vector<256x32xf32>
    %58 = tpu.matmul %56, %57, %cst_35 {dimension_numbers = #tpu.dot_dimension_numbers<[1], [0], [0], [1], [0, 0, 1, 1], [], []>} : vector<256x32xf32>, vector<32x32xf32>, vector<256x32xf32> -> vector<256x32xf32>
    %c0_36 = arith.constant 0 : index
    %c0_37 = arith.constant 0 : index
    %59 = vector.load %arg11[%c0_36, %c0_37] : memref<1x32xf32, #tpu.memory_space<vmem>>, vector<1x32xf32>
    %60 = vector.broadcast %59 : vector<1x32xf32> to vector<256x32xf32>
    %61 = arith.addf %58, %60 : vector<256x32xf32>
    %62 = tpu.iota {dimensions = array<i32: 0>} : vector<256x32xi32>
    %c200_i32_38 = arith.constant 200 : i32
    %63 = vector.broadcast %c200_i32_38 : i32 to vector<256x32xi32>
    %64 = arith.cmpi slt, %62, %63 : vector<256x32xi32>
    %cst_39 = arith.constant 0.000000e+00 : f32
    %65 = vector.broadcast %cst_39 : f32 to vector<256x32xf32>
    %66 = arith.select %64, %61, %65 : vector<256x32xi1>, vector<256x32xf32>
    %cst_40 = arith.constant dense<0.000000e+00> : vector<32xf32>
    %67 = vector.multi_reduction <add>, %66, %cst_40 [0] : vector<256x32xf32> to vector<32xf32>
    %68 = vector.shape_cast %67 : vector<32xf32> to vector<1x32xf32>
    %cst_41 = arith.constant 5.000000e-03 : f32
    %69 = vector.broadcast %cst_41 : f32 to vector<1x32xf32>
    %70 = arith.mulf %68, %69 : vector<1x32xf32>
    %71 = vector.broadcast %70 : vector<1x32xf32> to vector<256x32xf32>
    %72 = arith.subf %61, %71 : vector<256x32xf32>
    %cst_42 = arith.constant 0.000000e+00 : f32
    %73 = vector.broadcast %cst_42 : f32 to vector<256x32xf32>
    %74 = arith.select %64, %72, %73 : vector<256x32xi1>, vector<256x32xf32>
    %75 = arith.mulf %74, %74 : vector<256x32xf32>
    %cst_43 = arith.constant dense<0.000000e+00> : vector<32xf32>
    %76 = vector.multi_reduction <add>, %75, %cst_43 [0] : vector<256x32xf32> to vector<32xf32>
    %77 = vector.shape_cast %76 : vector<32xf32> to vector<1x32xf32>
    %cst_44 = arith.constant 5.000000e-03 : f32
    %78 = vector.broadcast %cst_44 : f32 to vector<1x32xf32>
    %79 = arith.mulf %77, %78 : vector<1x32xf32>
    %c0_45 = arith.constant 0 : index
    %c0_46 = arith.constant 0 : index
    %80 = vector.load %arg12[%c0_45, %c0_46] : memref<1x32xf32, #tpu.memory_space<vmem>>, vector<1x32xf32>
    %cst_47 = arith.constant 9.99999974E-6 : f32
    %81 = vector.broadcast %cst_47 : f32 to vector<1x32xf32>
    %82 = arith.addf %79, %81 : vector<1x32xf32>
    %83 = math.rsqrt %82 : vector<1x32xf32>
    %84 = arith.mulf %80, %83 : vector<1x32xf32>
    %c0_48 = arith.constant 0 : index
    %c0_49 = arith.constant 0 : index
    %85 = vector.load %arg13[%c0_48, %c0_49] : memref<1x32xf32, #tpu.memory_space<vmem>>, vector<1x32xf32>
    %86 = arith.mulf %70, %84 : vector<1x32xf32>
    %87 = arith.subf %85, %86 : vector<1x32xf32>
    %88 = vector.broadcast %84 : vector<1x32xf32> to vector<256x32xf32>
    %89 = arith.mulf %61, %88 : vector<256x32xf32>
    %90 = vector.broadcast %87 : vector<1x32xf32> to vector<256x32xf32>
    %91 = arith.addf %89, %90 : vector<256x32xf32>
    %cst_50 = arith.constant 0.000000e+00 : f32
    %92 = vector.broadcast %cst_50 : f32 to vector<256x32xf32>
    %93 = arith.maximumf %91, %92 : vector<256x32xf32>
    %c0_51 = arith.constant 0 : index
    %c0_52 = arith.constant 0 : index
    %94 = vector.load %arg14[%c0_51, %c0_52] : memref<256x32xf32, #tpu.memory_space<vmem>>, vector<256x32xf32>
    tpu.vector_store %arg14[%c0_51, %c0_52], %93 {strides = array<i32>} : memref<256x32xf32, #tpu.memory_space<vmem>>, vector<256x32xf32>,
    return
  }
}

</mosaic_0001>

<bundles_post_ra>
// kernel: tpu_custom_call.1
= control target key start
LH: loop header
LB: loop body
LE: loop exit
PB: predicated region body
PF: predicated region fallthrough
CT: control target
= control target key end

     0   :  { %vm113_vm0 = vcmask 64512   ;;  %vm965_vm1 = vcmask 130048   ;;  %vm2284_vm2 = vcmask 261120   ;;  %s5851_s2 = inlined_call_operand.vmem [shape: f32[8,16], index: 2, kind: input, shape index: {}]   ;;  %s5852_s1 = inlined_call_operand.vmem [shape: f32[256,8], index: 1, kind: input, shape index: {}]   ;;  %s5853_s0 = inlined_call_operand.vmem [shape: bf16[256,256], index: 0, kind: input, shape index: {}]   ;;  %s5854_s3 = inlined_call_operand.vmem [shape: f32[1,16], index: 3, kind: input, shape index: {}]   ;;  %s5855_s4 = inlined_call_operand.vmem [shape: f32[16,128], index: 4, kind: input, shape index: {}]   ;;  %s5856_s5 = inlined_call_operand.vmem [shape: f32[1,128], index: 5, kind: input, shape index: {}]   ;;  %s5857_s8 = inlined_call_operand.vmem [shape: f32[128,32], index: 8, kind: input, shape index: {}]   ;;  %s5858_s6 = inlined_call_operand.vmem [shape: f32[1,128], index: 6, kind: input, shape index: {}]   ;;  %s5859_s7 = inlined_call_operand.vmem [shape: f32[1,128], index: 7, kind: input, shape index: {}]   ;;  %s5860_s9 = inlined_call_operand.vmem [shape: f32[1,32], index: 9, kind: input, shape index: {}]   ;;  %s5861_s10 = inlined_call_operand.vmem [shape: f32[32,32], index: 10, kind: input, shape index: {}]   ;;  %s5862_s11 = inlined_call_operand.vmem [shape: f32[1,32], index: 11, kind: input, shape index: {}]   ;;  %s5863_s12 = inlined_call_operand.vmem [shape: f32[1,32], index: 12, kind: input, shape index: {}]   ;;  %s5864_s13 = inlined_call_operand.vmem [shape: f32[1,32], index: 13, kind: input, shape index: {}]   ;;  %s5865_s14 = inlined_call_operand.vmem [shape: f32[256,32], index: 14, kind: output, shape index: {}]  }
   0x1   :  { %v112_v0 = vld [vmem:[%s5851_s2] sm:$0xff]  ;;  %v81_v2 = vld [vmem:[%s5852_s1 + $0x8] sm:$0xff]  ;;  %v82_v3 = vld [vmem:[%s5852_s1 + $0x10] sm:$0xff] }
   0x2   :  { %v80_v1 = vld [vmem:[%s5852_s1] sm:$0xff]  ;;  %3756 = vmatprep.subr.mxu0 %v112_v0  ;;  %v83_v4 = vld [vmem:[%s5852_s1 + $0x18] sm:$0xff]  ;;  %v85_v6 = vld [vmem:[%s5852_s1 + $0x28] sm:$0xff] }
   0x3   :  { %3758 = vmatprep.mubr.msk.f32.mxu0 %vm113_vm0, %v80_v1  ;;  %3757 = vmatpush3.msra.mxu0 %v112_v0  ;;  %v84_v5 = vld [vmem:[%s5852_s1 + $0x20] sm:$0xff]  ;;  %v86_v7 = vld [vmem:[%s5852_s1 + $0x30] sm:$0xff]  ;;  %v87_v8 = vld [vmem:[%s5852_s1 + $0x38] sm:$0xff] }
   0x4   :  { %3759 = vmatmul.mubr.msk.f32.vlgmr.msra.gmra.mxu0 %vm113_vm0, %v81_v2  ;;  %v88_v9 = vld [vmem:[%s5852_s1 + $0x40] sm:$0xff]  ;;  %v89_v10 = vld [vmem:[%s5852_s1 + $0x48] sm:$0xff]  ;;  %v90_v11 = vld [vmem:[%s5852_s1 + $0x50] sm:$0xff] }
   0x5   :  { %3761 = vmatprep.mubr.msk.f32.mxu0 %vm113_vm0, %v82_v3  ;;  %v91_v12 = vld [vmem:[%s5852_s1 + $0x58] sm:$0xff]  ;;  %v92_v13 = vld [vmem:[%s5852_s1 + $0x60] sm:$0xff]  ;;  %v93_v14 = vld [vmem:[%s5852_s1 + $0x68] sm:$0xff] }
   0x6   :  { %v94_v15 = vld [vmem:[%s5852_s1 + $0x70] sm:$0xff]  ;;  %v95_v16 = vld [vmem:[%s5852_s1 + $0x78] sm:$0xff]  ;;  %v96_v17 = vld [vmem:[%s5852_s1 + $0x80] sm:$0xff] }
   0x7   :  { %v97_v18 = vld [vmem:[%s5852_s1 + $0x88] sm:$0xff]  ;;  %v98_v19 = vld [vmem:[%s5852_s1 + $0x90] sm:$0xff]  ;;  %v99_v20 = vld [vmem:[%s5852_s1 + $0x98] sm:$0xff] }
   0x8   :  { %3762 = vmatmul.mubr.msk.f32.gmra.mxu0 %vm113_vm0, %v83_v4  ;;  %v100_v21 = vld [vmem:[%s5852_s1 + $0xa0] sm:$0xff]  ;;  %v101_v22 = vld [vmem:[%s5852_s1 + $0xa8] sm:$0xff]  ;;  %v102_v23 = vld [vmem:[%s5852_s1 + $0xb0] sm:$0xff] }
   0x9   :  { %3764 = vmatprep.mubr.msk.f32.mxu0 %vm113_vm0, %v84_v5  ;;  %v103_v24 = vld [vmem:[%s5852_s1 + $0xb8] sm:$0xff]  ;;  %v104_v25 = vld [vmem:[%s5852_s1 + $0xc0] sm:$0xff]  ;;  %v105_v26 = vld [vmem:[%s5852_s1 + $0xc8] sm:$0xff] }
   0xa   :  { %v106_v27 = vld [vmem:[%s5852_s1 + $0xd0] sm:$0xff]  ;;  %v107_v28 = vld [vmem:[%s5852_s1 + $0xd8] sm:$0xff]  ;;  %v108_v29 = vld [vmem:[%s5852_s1 + $0xe0] sm:$0xff] }
   0xb   :  { %v109_v30 = vld [vmem:[%s5852_s1 + $0xe8] sm:$0xff]  ;;  %v110_v31 = vld [vmem:[%s5852_s1 + $0xf0] sm:$0xff]  ;;  %v111_v32 = vld [vmem:[%s5852_s1 + $0xf8] sm:$0xff] }
   0xc   :  { %3765 = vmatmul.mubr.msk.f32.gmra.mxu0 %vm113_vm0, %v85_v6  ;;  %v4295_v33 = vld [vmem:[%s5853_s0 + $0x4] ss:$8 sps:$4 sm:$0xff]  }
   0xd   :  { %3767 = vmatprep.mubr.msk.f32.mxu0 %vm113_vm0, %v86_v7  ;;  %5917 = vst [vmem:[#allocation2_spill] sm:$0xff] %v4295_v33  ;;  %650 = vmatprep.mubr.bf16.mxu1 %v4295_v33 }
  0x10   :  { %3768 = vmatmul.mubr.msk.f32.gmra.mxu0 %vm113_vm0, %v87_v8 }
  0x11   :  { %3770 = vmatprep.mubr.msk.f32.mxu0 %vm113_vm0, %v88_v9 }
  0x14   :  { %3771 = vmatmul.mubr.msk.f32.gmra.mxu0 %vm113_vm0, %v89_v10 }
  0x15   :  { %3773 = vmatprep.mubr.msk.f32.mxu0 %vm113_vm0, %v90_v11 }
  0x18   :  { %3774 = vmatmul.mubr.msk.f32.gmra.mxu0 %vm113_vm0, %v91_v12 }
  0x19   :  { %3776 = vmatprep.mubr.msk.f32.mxu0 %vm113_vm0, %v92_v13 }
  0x1c   :  { %3777 = vmatmul.mubr.msk.f32.gmra.mxu0 %vm113_vm0, %v93_v14 }
  0x1d   :  { %3779 = vmatprep.mubr.msk.f32.mxu0 %vm113_vm0, %v94_v15 }
  0x20   :  { %3780 = vmatmul.mubr.msk.f32.gmra.mxu0 %vm113_vm0, %v95_v16 }
  0x21   :  { %3782 = vmatprep.mubr.msk.f32.mxu0 %vm113_vm0, %v96_v17 }
  0x24   :  { %3783 = vmatmul.mubr.msk.f32.gmra.mxu0 %vm113_vm0, %v97_v18  ;;  %v4308_v18 = vld [vmem:[%s5853_s0] ss:$8 sps:$4 sm:$0xff]  }
  0x25   :  { %3785 = vmatprep.mubr.msk.f32.mxu0 %vm113_vm0, %v98_v19  ;;  %v4313_v19 = vld [vmem:[%s5853_s0 + $0x14] ss:$8 sps:$4 sm:$0xff]  }
  0x28   :  { %3786 = vmatmul.mubr.msk.f32.gmra.mxu0 %vm113_vm0, %v99_v20  ;;  %v4320_v20 = vld [vmem:[%s5853_s0 + $0x10] ss:$8 sps:$4 sm:$0xff]  }
  0x29   :  { %3788 = vmatprep.mubr.msk.f32.mxu0 %vm113_vm0, %v100_v21  ;;  %v4325_v21 = vld [vmem:[%s5853_s0 + $0x24] ss:$8 sps:$4 sm:$0xff]  }
  0x2c   :  { %3789 = vmatmul.mubr.msk.f32.gmra.mxu0 %vm113_vm0, %v101_v22  ;;  %v4332_v22 = vld [vmem:[%s5853_s0 + $0x20] ss:$8 sps:$4 sm:$0xff]  }
  0x2d   :  { %3791 = vmatprep.mubr.msk.f32.mxu0 %vm113_vm0, %v102_v23  ;;  %v4337_v23 = vld [vmem:[%s5853_s0 + $0x34] ss:$8 sps:$4 sm:$0xff]  }
  0x30   :  { %3792 = vmatmul.mubr.msk.f32.gmra.mxu0 %vm113_vm0, %v103_v24  ;;  %v4344_v24 = vld [vmem:[%s5853_s0 + $0x30] ss:$8 sps:$4 sm:$0xff]  }
  0x31   :  { %3794 = vmatprep.mubr.msk.f32.mxu0 %vm113_vm0, %v104_v25  ;;  %v4349_v25 = vld [vmem:[%s5853_s0 + $0x44] ss:$8 sps:$4 sm:$0xff]  }
  0x32   :  { %5918 = vst [vmem:[#allocation3_spill] sm:$0xff] %v4349_v25 }
  0x34   :  { %3795 = vmatmul.mubr.msk.f32.gmra.mxu0 %vm113_vm0, %v105_v26  ;;  %v4356_v26 = vld [vmem:[%s5853_s0 + $0x40] ss:$8 sps:$4 sm:$0xff]  }
  0x35   :  { %3797 = vmatprep.mubr.msk.f32.mxu0 %vm113_vm0, %v106_v27  ;;  %5919 = vst [vmem:[#allocation4_spill] sm:$0xff] %v4356_v26  ;;  %v4361_v27 = vld [vmem:[%s5853_s0 + $0x54] ss:$8 sps:$4 sm:$0xff]  }
  0x36   :  { %5920 = vst [vmem:[#allocation5_spill] sm:$0xff] %v4361_v27 }
  0x38   :  { %3798 = vmatmul.mubr.msk.f32.gmra.mxu0 %vm113_vm0, %v107_v28  ;;  %v4368_v28 = vld [vmem:[%s5853_s0 + $0x50] ss:$8 sps:$4 sm:$0xff]  }
  0x39   :  { %3800 = vmatprep.mubr.msk.f32.mxu0 %vm113_vm0, %v108_v29  ;;  %5921 = vst [vmem:[#allocation6_spill] sm:$0xff] %v4368_v28  ;;  %v4373_v29 = vld [vmem:[%s5853_s0 + $0x64] ss:$8 sps:$4 sm:$0xff]  }
  0x3a   :  { %5922 = vst [vmem:[#allocation7_spill] sm:$0xff] %v4373_v29 }
  0x3c   :  { %3801 = vmatmul.mubr.msk.f32.gmra.mxu0 %vm113_vm0, %v109_v30  ;;  %v4380_v30 = vld [vmem:[%s5853_s0 + $0x60] ss:$8 sps:$4 sm:$0xff]  }
  0x3d   :  { %3803 = vmatprep.mubr.msk.f32.mxu0 %vm113_vm0, %v110_v31  ;;  %5923 = vst [vmem:[#allocation8_spill] sm:$0xff] %v4380_v30  ;;  %v4385_v31 = vld [vmem:[%s5853_s0 + $0x74] ss:$8 sps:$4 sm:$0xff]  }
  0x3e   :  { %5924 = vst [vmem:[#allocation9_spill] sm:$0xff] %v4385_v31 }
  0x40   :  { %3804 = vmatmul.mubr.msk.f32.gmra.mxu0 %vm113_vm0, %v111_v32  ;;  %v4392_v32 = vld [vmem:[%s5853_s0 + $0x70] ss:$8 sps:$4 sm:$0xff]  }
  0x41   :  { %827 = vmatprep.mubr.bf16.mxu0 %v4295_v33  ;;  %5925 = vst [vmem:[#allocation10_spill] sm:$0xff] %v4392_v32 }
  0xc4   :  { %v4299_v34 = vpop.f32.mrf.mxu0 }
  0xc6   :  { %v4301_v35 = vpop.f32.mrf.mxu0 }
  0xc7   :  { %v435_v17 = vpack.c.bf16 %v4299_v34, %v4301_v35  ;;  %v4397_v34 = vld [vmem:[%s5853_s0 + $0x84] ss:$8 sps:$4 sm:$0xff]   ;;  %v4404_v35 = vld [vmem:[%s5853_s0 + $0x80] ss:$8 sps:$4 sm:$0xff]  }
  0xc8   :  { %v3763_v36 = vpop.f32.mrf.mxu0  ;;  %5926 = vst [vmem:[#allocation11_spill] sm:$0xff] %v4397_v34  ;;  %5927 = vst [vmem:[#allocation12_spill] sm:$0xff] %v4404_v35 }
  0xca   :  { %v286_v37 = vpop.f32.mrf.mxu0 }
  0xcb   :  { %v436_v15 = vpack.c.bf16 %v3763_v36, %v286_v37  ;;  %v4409_v36 = vld [vmem:[%s5853_s0 + $0x94] ss:$8 sps:$4 sm:$0xff]   ;;  %v4416_v37 = vld [vmem:[%s5853_s0 + $0x90] ss:$8 sps:$4 sm:$0xff]  }
  0xcc   :  { %v3766_v38 = vpop.f32.mrf.mxu0  ;;  %5928 = vst [vmem:[#allocation13_spill] sm:$0xff] %v4409_v36  ;;  %5929 = vst [vmem:[#allocation14_spill] sm:$0xff] %v4416_v37 }
  0xce   :  { %v296_v39 = vpop.f32.mrf.mxu0 }
  0xcf   :  { %v437_v13 = vpack.c.bf16 %v3766_v38, %v296_v39  ;;  %v4421_v38 = vld [vmem:[%s5853_s0 + $0xa4] ss:$8 sps:$4 sm:$0xff]   ;;  %v4428_v39 = vld [vmem:[%s5853_s0 + $0xa0] ss:$8 sps:$4 sm:$0xff]  }
  0xd0   :  { %v3769_v40 = vpop.f32.mrf.mxu0  ;;  %5930 = vst [vmem:[#allocation15_spill] sm:$0xff] %v4421_v38  ;;  %5931 = vst [vmem:[#allocation16_spill] sm:$0xff] %v4428_v39 }
  0xd2   :  { %v306_v41 = vpop.f32.mrf.mxu0 }
  0xd3   :  { %v438_v11 = vpack.c.bf16 %v3769_v40, %v306_v41  ;;  %v4433_v40 = vld [vmem:[%s5853_s0 + $0xb4] ss:$8 sps:$4 sm:$0xff]   ;;  %v4440_v41 = vld [vmem:[%s5853_s0 + $0xb0] ss:$8 sps:$4 sm:$0xff]  }
  0xd4   :  { %v3772_v42 = vpop.f32.mrf.mxu0  ;;  %5932 = vst [vmem:[#allocation17_spill] sm:$0xff] %v4433_v40  ;;  %5933 = vst [vmem:[#allocation18_spill] sm:$0xff] %v4440_v41 }
  0xd6   :  { %v316_v43 = vpop.f32.mrf.mxu0 }
  0xd7   :  { %v439_v9 = vpack.c.bf16 %v3772_v42, %v316_v43  ;;  %v4445_v42 = vld [vmem:[%s5853_s0 + $0xc4] ss:$8 sps:$4 sm:$0xff]   ;;  %v4452_v43 = vld [vmem:[%s5853_s0 + $0xc0] ss:$8 sps:$4 sm:$0xff]  }
  0xd8   :  { %v3775_v44 = vpop.f32.mrf.mxu0  ;;  %5934 = vst [vmem:[#allocation19_spill] sm:$0xff] %v4445_v42  ;;  %5935 = vst [vmem:[#allocation20_spill] sm:$0xff] %v4452_v43 }
  0xda   :  { %v326_v45 = vpop.f32.mrf.mxu0 }
  0xdb   :  { %v440_v7 = vpack.c.bf16 %v3775_v44, %v326_v45  ;;  %v4457_v44 = vld [vmem:[%s5853_s0 + $0xd4] ss:$8 sps:$4 sm:$0xff]   ;;  %v4464_v45 = vld [vmem:[%s5853_s0 + $0xd0] ss:$8 sps:$4 sm:$0xff]  }
  0xdc   :  { %v3778_v46 = vpop.f32.mrf.mxu0  ;;  %5936 = vst [vmem:[#allocation21_spill] sm:$0xff] %v4457_v44  ;;  %5937 = vst [vmem:[#allocation22_spill] sm:$0xff] %v4464_v45 }
  0xde   :  { %v336_v47 = vpop.f32.mrf.mxu0 }
  0xdf   :  { %v441_v5 = vpack.c.bf16 %v3778_v46, %v336_v47  ;;  %v4469_v46 = vld [vmem:[%s5853_s0 + $0xe4] ss:$8 sps:$4 sm:$0xff]   ;;  %v4476_v47 = vld [vmem:[%s5853_s0 + $0xe0] ss:$8 sps:$4 sm:$0xff]  }
  0xe0   :  { %v3781_v48 = vpop.f32.mrf.mxu0  ;;  %5938 = vst [vmem:[#allocation23_spill] sm:$0xff] %v4469_v46  ;;  %5939 = vst [vmem:[#allocation24_spill] sm:$0xff] %v4476_v47 }
  0xe2   :  { %v346_v49 = vpop.f32.mrf.mxu0 }
  0xe3   :  { %v442_v3 = vpack.c.bf16 %v3781_v48, %v346_v49  ;;  %v4481_v48 = vld [vmem:[%s5853_s0 + $0xf4] ss:$8 sps:$4 sm:$0xff]   ;;  %v4488_v49 = vld [vmem:[%s5853_s0 + $0xf0] ss:$8 sps:$4 sm:$0xff]  }
  0xe4   :  { %v3784_v50 = vpop.f32.mrf.mxu0  ;;  %5940 = vst [vmem:[#allocation25_spill] sm:$0xff] %v4481_v48  ;;  %5941 = vst [vmem:[#allocation26_spill] sm:$0xff] %v4488_v49 }
  0xe6   :  { %v356_v51 = vpop.f32.mrf.mxu0 }
  0xe7   :  { %v443_v16 = vpack.c.bf16 %v3784_v50, %v356_v51 }
  0xe8   :  { %v3787_v52 = vpop.f32.mrf.mxu0 }
  0xea   :  { %v366_v53 = vpop.f32.mrf.mxu0 }
  0xeb   :  { %v444_v14 = vpack.c.bf16 %v3787_v52, %v366_v53 }
  0xec   :  { %v3790_v54 = vpop.f32.mrf.mxu0 }
  0xee   :  { %v376_v55 = vpop.f32.mrf.mxu0 }
  0xef   :  { %v445_v12 = vpack.c.bf16 %v3790_v54, %v376_v55  ;;  %v4494_v54 = vld [vmem:[%s5854_s3] ss:$0 sm:$0xff] }
  0xf0   :  { %v3793_v56 = vpop.f32.mrf.mxu0 }
  0xf2   :  { %v386_v57 = vpop.f32.mrf.mxu0 }
  0xf3   :  { %v446_v10 = vpack.c.bf16 %v3793_v56, %v386_v57 }
  0xf4   :  { %v3796_v58 = vpop.f32.mrf.mxu0 }
  0xf6   :  { %v396_v59 = vpop.f32.mrf.mxu0 }
  0xf7   :  { %v447_v8 = vpack.c.bf16 %v3796_v58, %v396_v59 }
  0xf8   :  { %v3799_v60 = vpop.f32.mrf.mxu0 }
  0xfa   :  { %v406_v61 = vpop.f32.mrf.mxu0 }
  0xfb   :  { %v448_v6 = vpack.c.bf16 %v3799_v60, %v406_v61 }
  0xfc   :  { %v3802_v62 = vpop.f32.mrf.mxu0 }
  0xfe   :  { %v416_v63 = vpop.f32.mrf.mxu0 }
  0xff   :  { %v449_v4 = vpack.c.bf16 %v3802_v62, %v416_v63 }
 0x100   :  { %v3805_v0 = vpop.f32.mrf.mxu0 }
 0x102   :  { %v426_v1 = vpop.f32.mrf.mxu0 }
 0x103   :  { %v450_v2 = vpack.c.bf16 %v3805_v0, %v426_v1 }
 0x105   :  { %3190 = vmatprep.subr.bf16.mxu1 %v450_v2 }
 0x106   :  { %3191 = vmatpush3.bf16.msra.mxu1 %v442_v3 }
 0x107   :  { %3192 = vmatprep.subr.bf16.mxu1 %v449_v4 }
 0x10a   :  { %3193 = vmatpush3.bf16.msra.mxu1 %v441_v5 }
 0x10b   :  { %3194 = vmatprep.subr.bf16.mxu1 %v448_v6 }
 0x10e   :  { %3195 = vmatpush3.bf16.msra.mxu1 %v440_v7 }
 0x10f   :  { %3196 = vmatprep.subr.bf16.mxu1 %v447_v8 }
 0x112   :  { %3197 = vmatpush3.bf16.msra.mxu1 %v439_v9 }
 0x113   :  { %3198 = vmatprep.subr.bf16.mxu1 %v446_v10 }
 0x116   :  { %3199 = vmatpush3.bf16.msra.mxu1 %v438_v11 }
 0x117   :  { %3200 = vmatprep.subr.bf16.mxu1 %v445_v12 }
 0x11a   :  { %3201 = vmatpush3.bf16.msra.mxu1 %v437_v13 }
 0x11b   :  { %3202 = vmatprep.subr.bf16.mxu1 %v444_v14 }
 0x11e   :  { %3203 = vmatpush3.bf16.msra.mxu1 %v436_v15 }
 0x11f   :  { %3204 = vmatprep.subr.bf16.mxu1 %v443_v16 }
 0x122   :  { %3205 = vmatpush3.bf16.msra.mxu1 %v435_v17 }
 0x125   :  { %651 = vmatmul.mubr.bf16.vlgmr.msra.gmra.mxu1 %v4308_v18 }
 0x126   :  { %658 = vmatprep.mubr.bf16.mxu1 %v4313_v19 }
 0x12d   :  { %659 = vmatmul.mubr.bf16.gmra.mxu1 %v4320_v20 }
 0x12e   :  { %666 = vmatprep.mubr.bf16.mxu1 %v4325_v21 }
 0x135   :  { %667 = vmatmul.mubr.bf16.gmra.mxu1 %v4332_v22 }
 0x136   :  { %674 = vmatprep.mubr.bf16.mxu1 %v4337_v23 }
 0x13d   :  { %675 = vmatmul.mubr.bf16.gmra.mxu1 %v4344_v24 }
 0x13e   :  { %682 = vmatprep.mubr.bf16.mxu1 %v4349_v25 }
 0x145   :  { %683 = vmatmul.mubr.bf16.gmra.mxu1 %v4356_v26 }
 0x146   :  { %690 = vmatprep.mubr.bf16.mxu1 %v4361_v27 }
 0x14d   :  { %691 = vmatmul.mubr.bf16.gmra.mxu1 %v4368_v28 }
 0x14e   :  { %698 = vmatprep.mubr.bf16.mxu1 %v4373_v29 }
 0x155   :  { %699 = vmatmul.mubr.bf16.gmra.mxu1 %v4380_v30 }
 0x156   :  { %706 = vmatprep.mubr.bf16.mxu1 %v4385_v31 }
 0x15d   :  { %707 = vmatmul.mubr.bf16.gmra.mxu1 %v4392_v32 }
 0x15e   :  { %714 = vmatprep.mubr.bf16.mxu1 %v4397_v34 }
 0x165   :  { %715 = vmatmul.mubr.bf16.gmra.mxu1 %v4404_v35 }
 0x166   :  { %722 = vmatprep.mubr.bf16.mxu1 %v4409_v36 }
 0x16d   :  { %723 = vmatmul.mubr.bf16.gmra.mxu1 %v4416_v37 }
 0x16e   :  { %730 = vmatprep.mubr.bf16.mxu1 %v4421_v38 }
 0x175   :  { %731 = vmatmul.mubr.bf16.gmra.mxu1 %v4428_v39 }
 0x176   :  { %738 = vmatprep.mubr.bf16.mxu1 %v4433_v40 }
 0x17d   :  { %739 = vmatmul.mubr.bf16.gmra.mxu1 %v4440_v41 }
 0x17e   :  { %746 = vmatprep.mubr.bf16.mxu1 %v4445_v42 }
 0x185   :  { %747 = vmatmul.mubr.bf16.gmra.mxu1 %v4452_v43 }
 0x186   :  { %754 = vmatprep.mubr.bf16.mxu1 %v4457_v44 }
 0x18d   :  { %755 = vmatmul.mubr.bf16.gmra.mxu1 %v4464_v45 }
 0x18e   :  { %762 = vmatprep.mubr.bf16.mxu1 %v4469_v46 }
 0x195   :  { %763 = vmatmul.mubr.bf16.gmra.mxu1 %v4476_v47 }
 0x196   :  { %770 = vmatprep.mubr.bf16.mxu1 %v4481_v48 }
 0x19d   :  { %771 = vmatmul.mubr.bf16.gmra.mxu1 %v4488_v49 }
 0x1e5   :  { %v3206_v50 = vpop.f32.mrf.mxu1 }
 0x1e7   :  { %v3207_v51 = vpop.f32.mrf.mxu1 }
 0x1e8   :  { %v3208_v52 = vadd.f32 %v3207_v51, %v3206_v50 }
 0x1e9   :  { %v3209_v53 = vpop.f32.mrf.mxu1 }
 0x1ea   :  { %v4497_v58 = vadd.f32 %v3208_v52, %v4494_v54 }
 0x1eb   :  { %v3210_v55 = vpop.f32.mrf.mxu1 }
 0x1ec   :  { %v3211_v56 = vadd.f32 %v3210_v55, %v3209_v53 }
 0x1ed   :  { %v3212_v57 = vpop.f32.mrf.mxu1 }
 0x1ee   :  { %v4500_v59 = vadd.f32 %v3211_v56, %v4494_v54 }
 0x1ef   :  { %v3213_v60 = vpop.f32.mrf.mxu1 }
 0x1f0   :  { %v3214_v62 = vadd.f32 %v3213_v60, %v3212_v57 }
 0x1f1   :  { %v3215_v63 = vpop.f32.mrf.mxu1 }
 0x1f2   :  { %v4505_v3 = vadd.f32 %v3214_v62, %v4494_v54 }
 0x1f3   :  { %v3216_v0 = vpop.f32.mrf.mxu1 }
 0x1f4   :  { %v3217_v1 = vadd.f32 %v3216_v0, %v3215_v63 }
 0x1f5   :  { %v3218_v2 = vpop.f32.mrf.mxu1 }
 0x1f6   :  { %v4508_v4 = vadd.f32 %v3217_v1, %v4494_v54 }
 0x1f7   :  { %v3219_v5 = vpop.f32.mrf.mxu1 }
 0x1f8   :  { %v3220_v7 = vadd.f32 %v3219_v5, %v3218_v2 }
 0x1f9   :  { %v3221_v8 = vpop.f32.mrf.mxu1 }
 0x1fa   :  { %v4513_v12 = vadd.f32 %v3220_v7, %v4494_v54 }
 0x1fb   :  { %v3222_v9 = vpop.f32.mrf.mxu1 }
 0x1fc   :  { %v3223_v10 = vadd.f32 %v3222_v9, %v3221_v8 }
 0x1fd   :  { %v3224_v11 = vpop.f32.mrf.mxu1 }
 0x1fe   :  { %v4516_v13 = vadd.f32 %v3223_v10, %v4494_v54 }
 0x1ff   :  { %v3225_v14 = vpop.f32.mrf.mxu1 }
 0x200   :  { %v3226_v16 = vadd.f32 %v3225_v14, %v3224_v11 }
 0x201   :  { %v3227_v17 = vpop.f32.mrf.mxu1 }
 0x202   :  { %v4521_v53 = vadd.f32 %v3226_v16, %v4494_v54 }
 0x203   :  { %v3228_v50 = vpop.f32.mrf.mxu1 }
 0x204   :  { %v3229_v51 = vadd.f32 %v3228_v50, %v3227_v17 }
 0x205   :  { %v3230_v52 = vpop.f32.mrf.mxu1 }
 0x206   :  { %v4524_v55 = vadd.f32 %v3229_v51, %v4494_v54 }
 0x207   :  { %v3231_v56 = vpop.f32.mrf.mxu1 }
 0x208   :  { %v3232_v60 = vadd.f32 %v3231_v56, %v3230_v52 }
 0x209   :  { %v3233_v62 = vpop.f32.mrf.mxu1 }
 0x20a   :  { %v4529_v2 = vadd.f32 %v3232_v60, %v4494_v54 }
 0x20b   :  { %v3234_v63 = vpop.f32.mrf.mxu1 }
 0x20c   :  { %v3235_v0 = vadd.f32 %v3234_v63, %v3233_v62 }
 0x20d   :  { %v3236_v1 = vpop.f32.mrf.mxu1 }
 0x20e   :  { %v4532_v5 = vadd.f32 %v3235_v0, %v4494_v54 }
 0x20f   :  { %v3237_v7 = vpop.f32.mrf.mxu1 }
 0x210   :  { %v3238_v9 = vadd.f32 %v3237_v7, %v3236_v1 }
 0x211   :  { %v3239_v10 = vpop.f32.mrf.mxu1 }
 0x212   :  { %v4537_v17 = vadd.f32 %v3238_v9, %v4494_v54 }
 0x213   :  { %v3240_v11 = vpop.f32.mrf.mxu1 }
 0x214   :  { %v3241_v14 = vadd.f32 %v3240_v11, %v3239_v10 }
 0x215   :  { %v3242_v16 = vpop.f32.mrf.mxu1 }
 0x216   :  { %v4540_v50 = vadd.f32 %v3241_v14, %v4494_v54 }
 0x217   :  { %v3243_v51 = vpop.f32.mrf.mxu1 }
 0x218   :  { %v3244_v56 = vadd.f32 %v3243_v51, %v3242_v16 }
 0x219   :  { %v3245_v60 = vpop.f32.mrf.mxu1 }
 0x21a   :  { %v4545_v1 = vadd.f32 %v3244_v56, %v4494_v54 }
 0x21b   :  { %v3246_v62 = vpop.f32.mrf.mxu1 }
 0x21c   :  { %v3247_v63 = vadd.f32 %v3246_v62, %v3245_v60 }
 0x21d   :  { %v3248_v0 = vpop.f32.mrf.mxu1 }
 0x21e   :  { %v4548_v7 = vadd.f32 %v3247_v63, %v4494_v54 }
 0x21f   :  { %v3249_v9 = vpop.f32.mrf.mxu1 }
 0x220   :  { %v3250_v11 = vadd.f32 %v3249_v9, %v3248_v0 }
 0x221   :  { %v3251_v14 = vpop.f32.mrf.mxu1 }
 0x222   :  { %v709_v16 = vadd.f32 %v3250_v11, %v4494_v54 }
 0x223   :  { %v3252_v61 = vpop.f32.mrf.mxu1 }
 0x224   :  { %v3253_v6 = vadd.f32 %v3252_v61, %v3251_v14 }
 0x225   :  { %v3254_v15 = vpop.f32.mrf.mxu1 }
 0x226   :  { %v712_v51 = vadd.f32 %v3253_v6, %v4494_v54 }
 0x227   :  { %v3255_v60 = vpop.f32.mrf.mxu1 }
 0x228   :  { %v786_v62 = vpack.c.bf16 %v712_v51, %v709_v16  ;;  %v3256_v56 = vadd.f32 %v3255_v60, %v3254_v15 }
 0x229   :  { %v3257_v57 = vpop.f32.mrf.mxu1 }
 0x22a   :  { %v4555_v33 = vadd.f32 %v3256_v56, %v4494_v54 }
 0x22b   :  { %v3258_v8 = vpop.f32.mrf.mxu1 }
 0x22c   :  { %v3259_v63 = vadd.f32 %v3258_v8, %v3257_v57 }
 0x22d   :  { %v3260_v52 = vpop.f32.mrf.mxu1 }
 0x22e   :  { %v4558_v0 = vadd.f32 %v3259_v63, %v4494_v54 }
 0x22f   :  { %v3261_v9 = vpop.f32.mrf.mxu1 }
 0x230   :  { %v3262_v61 = vadd.f32 %v3261_v9, %v3260_v52 }
 0x231   :  { %v3263_v14 = vpop.f32.mrf.mxu1 }
 0x232   :  { %v4563_v15 = vadd.f32 %v3262_v61, %v4494_v54 }
 0x233   :  { %v3264_v6 = vpop.f32.mrf.mxu1 }
 0x234   :  { %v3265_v10 = vadd.f32 %v3264_v6, %v3263_v14 }
 0x235   :  { %v3266_v16 = vpop.f32.mrf.mxu1 }
 0x236   :  { %v4566_v57 = vadd.f32 %v3265_v10, %v4494_v54 }
 0x237   :  { %v3267_v8 = vpop.f32.mrf.mxu1 }
 0x239   :  { %v3269_v60 = vpop.f32.mrf.mxu1 }
 0x23b   :  { %v3270_v56 = vpop.f32.mrf.mxu1 }
 0x23d   :  { %v3272_v52 = vpop.f32.mrf.mxu1 }
 0x23f   :  { %v3273_v63 = vpop.f32.mrf.mxu1 }
 0x241   :  { %v3275_v9 = vpop.f32.mrf.mxu1 }
 0x243   :  { %v3276_v11 = vpop.f32.mrf.mxu1 }
 0x245   :  { %v3278_v49 = vpop.f32.mrf.mxu1 }
 0x247   :  { %v3279_v48 = vpop.f32.mrf.mxu1 }
 0x249   :  { %v3281_v14 = vpop.f32.mrf.mxu1 }
 0x24b   :  { %v3282_v6 = vpop.f32.mrf.mxu1 }
 0x24c   :  { %v3283_v26 = vadd.f32 %v3282_v6, %v3281_v14 }
 0x24d   :  { %v3284_v47 = vpop.f32.mrf.mxu1 }
 0x24f   :  { %v3285_v61 = vpop.f32.mrf.mxu1 }
 0x250   :  { %v3286_v29 = vadd.f32 %v3285_v61, %v3284_v47  ;;  %v5945_v47 = vpack.c.bf16 %v4524_v55, %v4521_v53  ;;  %v5950_v53 = vpack.c.bf16 %v4500_v59, %v4497_v58  ;;  %v5953_v58 = vld [vmem:[#allocation5_spill] sm:$0xff]  ;;  %v5954_v59 = vld [vmem:[#allocation6_spill] sm:$0xff]  ;;  %v5964_v55 = vld [vmem:[#allocation16_spill] sm:$0xff] }
 0x251   :  { %v3287_v46 = vpop.f32.mrf.mxu1 }
 0x253   :  { %v3288_v45 = vpop.f32.mrf.mxu1 }
 0x254   :  { %v3289_v34 = vadd.f32 %v3288_v45, %v3287_v46 }
 0x255   :  { %v3290_v10 = vpop.f32.mrf.mxu1 }
 0x256   :  { %v760_v25 = vadd.f32 %v3289_v34, %v4494_v54 }
 0x257   :  { %v3291_v44 = vpop.f32.mrf.mxu1 }
 0x258   :  { %v3292_v36 = vadd.f32 %v3291_v44, %v3290_v10  ;;  %v5944_v44 = vpack.c.bf16 %v4532_v5, %v4529_v2  ;;  %v5948_v2 = vpack.c.bf16 %v4508_v4, %v4505_v3  ;;  %v5952_v3 = vld [vmem:[#allocation4_spill] sm:$0xff]  ;;  %v956_v4 = vld [vmem:[%s5855_s4] sm:$0xff]  ;;  %v5965_v5 = vld [vmem:[#allocation17_spill] sm:$0xff] }
 0x259   :  { %v3293_v43 = vpop.f32.mrf.mxu1 }
 0x25a   :  { %v765_v28 = vadd.f32 %v3292_v36, %v4494_v54  ;;  %v752_v36 = vadd.f32 %v3283_v26, %v4494_v54 }
 0x25b   :  { %v3294_v42 = vpop.f32.mrf.mxu1 }
 0x25c   :  { %v3295_v39 = vadd.f32 %v3294_v42, %v3293_v43 }
 0x25d   :  { %v3296_v41 = vpop.f32.mrf.mxu1 }
 0x25e   :  { %v768_v32 = vadd.f32 %v3295_v39, %v4494_v54  ;;  %v757_v39 = vadd.f32 %v3286_v29, %v4494_v54  ;;  %v5943_v29 = vpack.c.bf16 %v4540_v50, %v4537_v17  ;;  %v5966_v17 = vld [vmem:[#allocation18_spill] sm:$0xff]  ;;  %v5967_v50 = vld [vmem:[#allocation19_spill] sm:$0xff] }
 0x25f   :  { %v3297_v51 = vpop.f32.mrf.mxu1 }
 0x260   :  { %v3298_v38 = vadd.f32 %v3297_v51, %v3296_v41  ;;  %v793_v42 = vpack.c.bf16 %v768_v32, %v765_v28  ;;  %v3271_v32 = vadd.f32 %v3270_v56, %v3269_v60  ;;  %v3268_v41 = vadd.f32 %v3267_v8, %v3266_v16  ;;  %v5973_v16 = vld [vmem:[#allocation25_spill] sm:$0xff] }
 0x261   :  { %v3299_v40 = vpop.f32.mrf.mxu1 }
 0x262   :  { %v773_v31 = vadd.f32 %v3298_v38, %v4494_v54  ;;  %v733_v45 = vadd.f32 %v3268_v41, %v4494_v54 }
 0x263   :  { %v3300_v37 = vpop.f32.mrf.mxu1 }
 0x264   :  { %v3301_v35 = vadd.f32 %v3300_v37, %v3299_v40  ;;  %v957_v37 = vld [vmem:[%s5855_s4 + $0x8] sm:$0xff]  ;;  %v3280_v40 = vadd.f32 %v3279_v48, %v3278_v49  ;;  %v5946_v48 = vpack.c.bf16 %v4516_v13, %v4513_v12  ;;  %v5947_v49 = vpack.c.bf16 %v4566_v57, %v4563_v15  ;;  %v5962_v12 = vld [vmem:[#allocation14_spill] sm:$0xff] }
 0x265   :  { %3806 = vmatprep.subr.mxu1 %v957_v37  ;;  %v5963_v13 = vld [vmem:[#allocation15_spill] sm:$0xff]  ;;  %v5974_v15 = vld [vmem:[#allocation26_spill] sm:$0xff] }
 0x266   :  { %v776_v30 = vadd.f32 %v3301_v35, %v4494_v54  ;;  %3807 = vmatpush3.msra.mxu1 %v957_v37  ;;  %v3277_v35 = vadd.f32 %v3276_v11, %v3275_v9  ;;  %v749_v28 = vadd.f32 %v3280_v40, %v4494_v54  ;;  %v5972_v11 = vld [vmem:[#allocation24_spill] sm:$0xff] }
 0x267   :  { %3808 = vmatprep.subr.mxu1 %v956_v4 }
 0x268   :  { %v794_v27 = vpack.c.bf16 %v776_v30, %v773_v31  ;;  %v792_v30 = vpack.c.bf16 %v760_v25, %v757_v39  ;;  %v5942_v31 = vpack.c.bf16 %v4548_v7, %v4545_v1  ;;  %v744_v34 = vadd.f32 %v3277_v35, %v4494_v54  ;;  %3809 = vmatpush3.msra.mxu1 %v956_v4  ;;  %v5968_v1 = vld [vmem:[#allocation20_spill] sm:$0xff]  ;;  %v5969_v7 = vld [vmem:[#allocation21_spill] sm:$0xff] }
 0x269   :  { %v791_v38 = vpack.c.bf16 %v752_v36, %v749_v28  ;;  %v736_v25 = vadd.f32 %v3271_v32, %v4494_v54 }
 0x26a   :  { %3302 = vmatprep.subr.bf16.mxu0 %v794_v27  ;;  %v3274_v27 = vadd.f32 %v3273_v63, %v3272_v52 }
 0x26b   :  { %3303 = vmatpush3.bf16.msra.mxu0 %v786_v62  ;;  %v789_v46 = vpack.c.bf16 %v736_v25, %v733_v45  ;;  %v5970_v62 = vld [vmem:[#allocation22_spill] sm:$0xff] }
 0x26c   :  { %3304 = vmatprep.subr.bf16.mxu0 %v793_v42  ;;  %v741_v26 = vadd.f32 %v3274_v27, %v4494_v54  ;;  %v5949_v54 = vpack.c.bf16 %v4558_v0, %v4555_v33  ;;  %v5951_v33 = vld [vmem:[#allocation3_spill] sm:$0xff] }
 0x26d   :  { %v5971_v0 = vld [vmem:[#allocation23_spill] sm:$0xff] }
 0x26e   :  { %v790_v43 = vpack.c.bf16 %v744_v34, %v741_v26 }
 0x26f   :  { %3305 = vmatpush3.bf16.msra.mxu0 %v5942_v31 }
 0x270   :  { %3306 = vmatprep.subr.bf16.mxu0 %v792_v30 }
 0x273   :  { %3307 = vmatpush3.bf16.msra.mxu0 %v5943_v29 }
 0x274   :  { %3308 = vmatprep.subr.bf16.mxu0 %v791_v38 }
 0x277   :  { %3309 = vmatpush3.bf16.msra.mxu0 %v5944_v44 }
 0x278   :  { %3310 = vmatprep.subr.bf16.mxu0 %v790_v43 }
 0x27b   :  { %3311 = vmatpush3.bf16.msra.mxu0 %v5945_v47 }
 0x27c   :  { %3312 = vmatprep.subr.bf16.mxu0 %v789_v46 }
 0x27f   :  { %3313 = vmatpush3.bf16.msra.mxu0 %v5946_v48 }
 0x280   :  { %3314 = vmatprep.subr.bf16.mxu0 %v5947_v49 }
 0x283   :  { %3315 = vmatpush3.bf16.msra.mxu0 %v5948_v2 }
 0x284   :  { %3316 = vmatprep.subr.bf16.mxu0 %v5949_v54 }
 0x287   :  { %3317 = vmatpush3.bf16.msra.mxu0 %v5950_v53 }
 0x28a   :  { %828 = vmatmul.mubr.bf16.vlgmr.msra.gmra.mxu0 %v4308_v18  ;;  %v5955_v18 = vld [vmem:[#allocation7_spill] sm:$0xff] }
 0x28b   :  { %835 = vmatprep.mubr.bf16.mxu0 %v4313_v19  ;;  %v5956_v19 = vld [vmem:[#allocation8_spill] sm:$0xff] }
 0x292   :  { %836 = vmatmul.mubr.bf16.gmra.mxu0 %v4320_v20  ;;  %v5957_v20 = vld [vmem:[#allocation9_spill] sm:$0xff] }
 0x293   :  { %843 = vmatprep.mubr.bf16.mxu0 %v4325_v21  ;;  %v5958_v21 = vld [vmem:[#allocation10_spill] sm:$0xff] }
 0x29a   :  { %844 = vmatmul.mubr.bf16.gmra.mxu0 %v4332_v22  ;;  %v5959_v22 = vld [vmem:[#allocation11_spill] sm:$0xff] }
 0x29b   :  { %851 = vmatprep.mubr.bf16.mxu0 %v4337_v23  ;;  %v5960_v23 = vld [vmem:[#allocation12_spill] sm:$0xff] }
 0x2a2   :  { %852 = vmatmul.mubr.bf16.gmra.mxu0 %v4344_v24  ;;  %v5961_v24 = vld [vmem:[#allocation13_spill] sm:$0xff] }
 0x2a3   :  { %859 = vmatprep.mubr.bf16.mxu0 %v5951_v33 }
 0x2aa   :  { %860 = vmatmul.mubr.bf16.gmra.mxu0 %v5952_v3 }
 0x2ab   :  { %867 = vmatprep.mubr.bf16.mxu0 %v5953_v58 }
 0x2b2   :  { %868 = vmatmul.mubr.bf16.gmra.mxu0 %v5954_v59 }
 0x2b3   :  { %875 = vmatprep.mubr.bf16.mxu0 %v5955_v18 }
 0x2ba   :  { %876 = vmatmul.mubr.bf16.gmra.mxu0 %v5956_v19 }
 0x2bb   :  { %883 = vmatprep.mubr.bf16.mxu0 %v5957_v20 }
 0x2c2   :  { %884 = vmatmul.mubr.bf16.gmra.mxu0 %v5958_v21 }
 0x2c3   :  { %891 = vmatprep.mubr.bf16.mxu0 %v5959_v22 }
 0x2ca   :  { %892 = vmatmul.mubr.bf16.gmra.mxu0 %v5960_v23 }
 0x2cb   :  { %899 = vmatprep.mubr.bf16.mxu0 %v5961_v24 }
 0x2d2   :  { %900 = vmatmul.mubr.bf16.gmra.mxu0 %v5962_v12 }
 0x2d3   :  { %907 = vmatprep.mubr.bf16.mxu0 %v5963_v13 }
 0x2da   :  { %908 = vmatmul.mubr.bf16.gmra.mxu0 %v5964_v55 }
 0x2db   :  { %915 = vmatprep.mubr.bf16.mxu0 %v5965_v5 }
 0x2e2   :  { %916 = vmatmul.mubr.bf16.gmra.mxu0 %v5966_v17 }
 0x2e3   :  { %923 = vmatprep.mubr.bf16.mxu0 %v5967_v50 }
 0x2ea   :  { %924 = vmatmul.mubr.bf16.gmra.mxu0 %v5968_v1 }
 0x2eb   :  { %931 = vmatprep.mubr.bf16.mxu0 %v5969_v7 }
 0x2f2   :  { %932 = vmatmul.mubr.bf16.gmra.mxu0 %v5970_v62 }
 0x2f3   :  { %939 = vmatprep.mubr.bf16.mxu0 %v5971_v0 }
 0x2fa   :  { %940 = vmatmul.mubr.bf16.gmra.mxu0 %v5972_v11 }
 0x2fb   :  { %947 = vmatprep.mubr.bf16.mxu0 %v5973_v16 }
 0x302   :  { %948 = vmatmul.mubr.bf16.gmra.mxu0 %v5974_v15 }
 0x34a   :  { %v3318_v57 = vpop.f32.mrf.mxu0 }
 0x34c   :  { %v3319_v8 = vpop.f32.mrf.mxu0 }
 0x34d   :  { %v3320_v51 = vadd.f32 %v3319_v8, %v3318_v57 }
 0x34e   :  { %v3321_v60 = vpop.f32.mrf.mxu0 }
 0x34f   :  { %3810 = vmatprep.mubr.msk.f32.mxu1 %vm965_vm1, %v3320_v51 }
 0x350   :  { %v3322_v56 = vpop.f32.mrf.mxu0 }
 0x351   :  { %v3323_v52 = vadd.f32 %v3322_v56, %v3321_v60 }
 0x352   :  { %v3324_v63 = vpop.f32.mrf.mxu0 }
 0x353   :  { %3811 = vmatmul.mubr.msk.f32.vlgmr.msra.gmra.mxu1 %vm965_vm1, %v3323_v52 }
 0x354   :  { %v3325_v9 = vpop.f32.mrf.mxu0 }
 0x355   :  { %v3326_v14 = vadd.f32 %v3325_v9, %v3324_v63 }
 0x356   :  { %v3327_v6 = vpop.f32.mrf.mxu0 }
 0x357   :  { %3813 = vmatprep.mubr.msk.f32.mxu1 %vm965_vm1, %v3326_v14 }
 0x358   :  { %v3328_v61 = vpop.f32.mrf.mxu0 }
 0x359   :  { %v3329_v10 = vadd.f32 %v3328_v61, %v3327_v6 }
 0x35a   :  { %v3330_v42 = vpop.f32.mrf.mxu0 }
 0x35b   :  { %3814 = vmatmul.mubr.msk.f32.gmra.mxu1 %vm965_vm1, %v3329_v10 }
 0x35c   :  { %v3331_v37 = vpop.f32.mrf.mxu0 }
 0x35d   :  { %v3332_v40 = vadd.f32 %v3331_v37, %v3330_v42 }
 0x35e   :  { %v3333_v39 = vpop.f32.mrf.mxu0 }
 0x35f   :  { %3816 = vmatprep.mubr.msk.f32.mxu1 %vm965_vm1, %v3332_v40 }
 0x360   :  { %v3334_v35 = vpop.f32.mrf.mxu0 }
 0x361   :  { %v3335_v36 = vadd.f32 %v3334_v35, %v3333_v39 }
 0x362   :  { %v3336_v30 = vpop.f32.mrf.mxu0 }
 0x363   :  { %3817 = vmatmul.mubr.msk.f32.gmra.mxu1 %vm965_vm1, %v3335_v36 }
 0x364   :  { %v3337_v31 = vpop.f32.mrf.mxu0 }
 0x365   :  { %v3338_v27 = vadd.f32 %v3337_v31, %v3336_v30 }
 0x366   :  { %v3339_v28 = vpop.f32.mrf.mxu0 }
 0x367   :  { %3819 = vmatprep.mubr.msk.f32.mxu1 %vm965_vm1, %v3338_v27 }
 0x368   :  { %v3340_v32 = vpop.f32.mrf.mxu0 }
 0x369   :  { %v3341_v34 = vadd.f32 %v3340_v32, %v3339_v28 }
 0x36a   :  { %v3342_v38 = vpop.f32.mrf.mxu0 }
 0x36b   :  { %3820 = vmatmul.mubr.msk.f32.gmra.mxu1 %vm965_vm1, %v3341_v34 }
 0x36c   :  { %v3343_v29 = vpop.f32.mrf.mxu0 }
 0x36d   :  { %v3344_v41 = vadd.f32 %v3343_v29, %v3342_v38 }
 0x36e   :  { %v3345_v26 = vpop.f32.mrf.mxu0 }
 0x36f   :  { %3822 = vmatprep.mubr.msk.f32.mxu1 %vm965_vm1, %v3344_v41 }
 0x370   :  { %v3346_v25 = vpop.f32.mrf.mxu0 }
 0x371   :  { %v3347_v43 = vadd.f32 %v3346_v25, %v3345_v26 }
 0x372   :  { %v3348_v44 = vpop.f32.mrf.mxu0 }
 0x373   :  { %3823 = vmatmul.mubr.msk.f32.gmra.mxu1 %vm965_vm1, %v3347_v43 }
 0x374   :  { %v3349_v45 = vpop.f32.mrf.mxu0 }
 0x375   :  { %v3350_v46 = vadd.f32 %v3349_v45, %v3348_v44 }
 0x376   :  { %v3351_v47 = vpop.f32.mrf.mxu0 }
 0x377   :  { %3825 = vmatprep.mubr.msk.f32.mxu1 %vm965_vm1, %v3350_v46  ;;  %v5975_v46 = vld [vmem:[#allocation2_spill] sm:$0xff] }
 0x378   :  { %v3352_v48 = vpop.f32.mrf.mxu0 }
 0x379   :  { %v3353_v49 = vadd.f32 %v3352_v48, %v3351_v47 }
 0x37a   :  { %v3354_v2 = vpop.f32.mrf.mxu0 }
 0x37b   :  { %3826 = vmatmul.mubr.msk.f32.gmra.mxu1 %vm965_vm1, %v3353_v49 }
 0x37c   :  { %v3355_v54 = vpop.f32.mrf.mxu0 }
 0x37d   :  { %v3356_v53 = vadd.f32 %v3355_v54, %v3354_v2  ;;  %v4682_v2 = vld [vmem:[%s5856_s5] ss:$0 sm:$0xff] }
 0x37e   :  { %v3357_v33 = vpop.f32.mrf.mxu0 }
 0x37f   :  { %3828 = vmatprep.mubr.msk.f32.mxu1 %vm965_vm1, %v3356_v53 }
 0x380   :  { %v3358_v3 = vpop.f32.mrf.mxu0 }
 0x381   :  { %v3359_v58 = vadd.f32 %v3358_v3, %v3357_v33 }
 0x382   :  { %v3360_v59 = vpop.f32.mrf.mxu0 }
 0x383   :  { %3829 = vmatmul.mubr.msk.f32.gmra.mxu1 %vm965_vm1, %v3359_v58 }
 0x384   :  { %v3361_v18 = vpop.f32.mrf.mxu0 }
 0x385   :  { %v3362_v19 = vadd.f32 %v3361_v18, %v3360_v59 }
 0x386   :  { %v3363_v20 = vpop.f32.mrf.mxu0 }
 0x387   :  { %3831 = vmatprep.mubr.msk.f32.mxu1 %vm965_vm1, %v3362_v19 }
 0x388   :  { %v3364_v21 = vpop.f32.mrf.mxu0 }
 0x389   :  { %v3365_v22 = vadd.f32 %v3364_v21, %v3363_v20 }
 0x38a   :  { %v3366_v23 = vpop.f32.mrf.mxu0 }
 0x38b   :  { %3832 = vmatmul.mubr.msk.f32.gmra.mxu1 %vm965_vm1, %v3365_v22 }
 0x38c   :  { %v3367_v24 = vpop.f32.mrf.mxu0 }
 0x38d   :  { %v3368_v4 = vadd.f32 %v3367_v24, %v3366_v23 }
 0x38e   :  { %v3369_v12 = vpop.f32.mrf.mxu0 }
 0x38f   :  { %3834 = vmatprep.mubr.msk.f32.mxu1 %vm965_vm1, %v3368_v4 }
 0x390   :  { %v3370_v13 = vpop.f32.mrf.mxu0 }
 0x391   :  { %v3371_v55 = vadd.f32 %v3370_v13, %v3369_v12 }
 0x392   :  { %v3372_v5 = vpop.f32.mrf.mxu0 }
 0x393   :  { %3835 = vmatmul.mubr.msk.f32.gmra.mxu1 %vm965_vm1, %v3371_v55 }
 0x394   :  { %v3373_v17 = vpop.f32.mrf.mxu0 }
 0x395   :  { %v3374_v50 = vadd.f32 %v3373_v17, %v3372_v5 }
 0x396   :  { %v3375_v1 = vpop.f32.mrf.mxu0 }
 0x397   :  { %3837 = vmatprep.mubr.msk.f32.mxu1 %vm965_vm1, %v3374_v50 }
 0x398   :  { %v3376_v7 = vpop.f32.mrf.mxu0 }
 0x399   :  { %v3377_v62 = vadd.f32 %v3376_v7, %v3375_v1 }
 0x39a   :  { %v3378_v0 = vpop.f32.mrf.mxu0 }
 0x39b   :  { %3838 = vmatmul.mubr.msk.f32.gmra.mxu1 %vm965_vm1, %v3377_v62 }
 0x39c   :  { %v3379_v11 = vpop.f32.mrf.mxu0 }
 0x39d   :  { %v3380_v16 = vadd.f32 %v3379_v11, %v3378_v0 }
 0x39e   :  { %v3381_v15 = vpop.f32.mrf.mxu0 }
 0x39f   :  { %3840 = vmatprep.mubr.msk.f32.mxu1 %vm965_vm1, %v3380_v16 }
 0x3a0   :  { %v3382_v57 = vpop.f32.mrf.mxu0 }
 0x3a1   :  { %v3383_v8 = vadd.f32 %v3382_v57, %v3381_v15 }
 0x3a2   :  { %v3384_v51 = vpop.f32.mrf.mxu0 }
 0x3a3   :  { %3841 = vmatmul.mubr.msk.f32.gmra.mxu1 %vm965_vm1, %v3383_v8 }
 0x3a4   :  { %v3385_v60 = vpop.f32.mrf.mxu0 }
 0x3a5   :  { %v3386_v56 = vadd.f32 %v3385_v60, %v3384_v51 }
 0x3a6   :  { %v3387_v52 = vpop.f32.mrf.mxu0 }
 0x3a7   :  { %3843 = vmatprep.mubr.msk.f32.mxu1 %vm965_vm1, %v3386_v56 }
 0x3a8   :  { %v3388_v63 = vpop.f32.mrf.mxu0 }
 0x3a9   :  { %v3389_v9 = vadd.f32 %v3388_v63, %v3387_v52 }
 0x3aa   :  { %v3390_v14 = vpop.f32.mrf.mxu0 }
 0x3ab   :  { %3844 = vmatmul.mubr.msk.f32.gmra.mxu1 %vm965_vm1, %v3389_v9 }
 0x3ac   :  { %v3391_v6 = vpop.f32.mrf.mxu0 }
 0x3ad   :  { %v3392_v61 = vadd.f32 %v3391_v6, %v3390_v14 }
 0x3ae   :  { %v3393_v10 = vpop.f32.mrf.mxu0 }
 0x3af   :  { %3846 = vmatprep.mubr.msk.f32.mxu1 %vm965_vm1, %v3392_v61 }
 0x3b0   :  { %v3394_v42 = vpop.f32.mrf.mxu0 }
 0x3b1   :  { %v3395_v37 = vadd.f32 %v3394_v42, %v3393_v10  ;;  %v1686_v10 = vld [vmem:[%s5857_s8 + $0x78] sm:$0xff] }
 0x3b2   :  { %v3396_v40 = vpop.f32.mrf.mxu0  ;;  %3858 = vmatprep.subr.mxu0 %v1686_v10 }
 0x3b3   :  { %3847 = vmatmul.mubr.msk.f32.gmra.mxu1 %vm965_vm1, %v3395_v37  ;;  %3859 = vmatpush3.msra.mxu0 %v1686_v10 }
 0x3b4   :  { %v3397_v39 = vpop.f32.mrf.mxu0 }
 0x3b5   :  { %v3398_v35 = vadd.f32 %v3397_v39, %v3396_v40  ;;  %v1685_v39 = vld [vmem:[%s5857_s8 + $0x70] sm:$0xff] }
 0x3b6   :  { %v3399_v36 = vpop.f32.mrf.mxu0  ;;  %3860 = vmatprep.subr.mxu0 %v1685_v39 }
 0x3b7   :  { %3849 = vmatprep.mubr.msk.f32.mxu1 %vm965_vm1, %v3398_v35  ;;  %3861 = vmatpush3.msra.mxu0 %v1685_v39 }
 0x3b8   :  { %v3400_v30 = vpop.f32.mrf.mxu0 }
 0x3b9   :  { %v3401_v31 = vadd.f32 %v3400_v30, %v3399_v36  ;;  %v1684_v36 = vld [vmem:[%s5857_s8 + $0x68] sm:$0xff] }
 0x3ba   :  { %v3402_v27 = vpop.f32.mrf.mxu0  ;;  %3862 = vmatprep.subr.mxu0 %v1684_v36 }
 0x3bb   :  { %3850 = vmatmul.mubr.msk.f32.gmra.mxu1 %vm965_vm1, %v3401_v31  ;;  %3863 = vmatpush3.msra.mxu0 %v1684_v36 }
 0x3bc   :  { %v3403_v28 = vpop.f32.mrf.mxu0 }
 0x3bd   :  { %v3404_v32 = vadd.f32 %v3403_v28, %v3402_v27  ;;  %v1683_v27 = vld [vmem:[%s5857_s8 + $0x60] sm:$0xff] }
 0x3be   :  { %v3405_v34 = vpop.f32.mrf.mxu0  ;;  %3864 = vmatprep.subr.mxu0 %v1683_v27 }
 0x3bf   :  { %3852 = vmatprep.mubr.msk.f32.mxu1 %vm965_vm1, %v3404_v32  ;;  %3865 = vmatpush3.msra.mxu0 %v1683_v27 }
 0x3c0   :  { %v3406_v38 = vpop.f32.mrf.mxu0 }
 0x3c1   :  { %v3407_v29 = vadd.f32 %v3406_v38, %v3405_v34  ;;  %v1682_v38 = vld [vmem:[%s5857_s8 + $0x58] sm:$0xff] }
 0x3c2   :  { %v3408_v41 = vpop.f32.mrf.mxu0  ;;  %3866 = vmatprep.subr.mxu0 %v1682_v38 }
 0x3c3   :  { %3853 = vmatmul.mubr.msk.f32.gmra.mxu1 %vm965_vm1, %v3407_v29  ;;  %3867 = vmatpush3.msra.mxu0 %v1682_v38 }
 0x3c4   :  { %v3409_v26 = vpop.f32.mrf.mxu0 }
 0x3c5   :  { %v3410_v25 = vadd.f32 %v3409_v26, %v3408_v41  ;;  %v1681_v41 = vld [vmem:[%s5857_s8 + $0x50] sm:$0xff] }
 0x3c6   :  { %v3411_v43 = vpop.f32.mrf.mxu0  ;;  %3868 = vmatprep.subr.mxu0 %v1681_v41 }
 0x3c7   :  { %3855 = vmatprep.mubr.msk.f32.mxu1 %vm965_vm1, %v3410_v25  ;;  %3869 = vmatpush3.msra.mxu0 %v1681_v41 }
 0x3c8   :  { %v3412_v44 = vpop.f32.mrf.mxu0 }
 0x3c9   :  { %v3413_v45 = vadd.f32 %v3412_v44, %v3411_v43  ;;  %v1680_v43 = vld [vmem:[%s5857_s8 + $0x48] sm:$0xff] }
 0x3ca   :  { %3870 = vmatprep.subr.mxu0 %v1680_v43 }
 0x3cb   :  { %3856 = vmatmul.mubr.msk.f32.gmra.mxu1 %vm965_vm1, %v3413_v45  ;;  %3871 = vmatpush3.msra.mxu0 %v1680_v43 }
 0x3cc   :  { %1967 = vmatprep.mubr.bf16.mxu1 %v5975_v46  ;;  %v1679_v46 = vld [vmem:[%s5857_s8 + $0x40] sm:$0xff] }
 0x3cd   :  { %3872 = vmatprep.subr.mxu0 %v1679_v46 }
 0x3ce   :  { %3873 = vmatpush3.msra.mxu0 %v1679_v46 }
 0x413   :  { %v3812_v47 = vpop.f32.mrf.mxu1 }
 0x414   :  { %v4688_v3 = vadd.f32 %v3812_v47, %v4682_v2 }
 0x415   :  { %v1128_v48 = vpop.f32.mrf.mxu1 }
 0x416   :  { %v4685_v53 = vadd.f32 %v4682_v2, %v1128_v48 }
 0x418   :  { %v1384_v59 = vadd.f32 %v4688_v3, %v4685_v53 }
 0x41b   :  { %v3815_v49 = vpop.f32.mrf.mxu1 }
 0x41c   :  { %v4697_v21 = vadd.f32 %v3815_v49, %v4682_v2  ;;  %v1678_v49 = vld [vmem:[%s5857_s8 + $0x38] sm:$0xff] }
 0x41d   :  { %v1138_v54 = vpop.f32.mrf.mxu1  ;;  %3874 = vmatprep.subr.mxu0 %v1678_v49 }
 0x41e   :  { %v4691_v58 = vadd.f32 %v4682_v2, %v1138_v54  ;;  %3875 = vmatpush3.msra.mxu0 %v1678_v49 }
 0x420   :  { %v1385_v19 = vadd.f32 %v1384_v59, %v4691_v58  ;;  %v1677_v59 = vld [vmem:[%s5857_s8 + $0x30] sm:$0xff] }
 0x421   :  { %3876 = vmatprep.subr.mxu0 %v1677_v59 }
 0x422   :  { %v1386_v23 = vadd.f32 %v1385_v19, %v4697_v21  ;;  %3877 = vmatpush3.msra.mxu0 %v1677_v59 }
 0x423   :  { %v3818_v33 = vpop.f32.mrf.mxu1 }
 0x424   :  { %v4705_v13 = vadd.f32 %v3818_v33, %v4682_v2 }
 0x425   :  { %v1148_v18 = vpop.f32.mrf.mxu1 }
 0x426   :  { %v4700_v22 = vadd.f32 %v4682_v2, %v1148_v18 }
 0x428   :  { %v1387_v4 = vadd.f32 %v1386_v23, %v4700_v22 }
 0x42a   :  { %v1388_v5 = vadd.f32 %v1387_v4, %v4705_v13 }
 0x42b   :  { %v3821_v20 = vpop.f32.mrf.mxu1 }
 0x42c   :  { %v4713_v7 = vadd.f32 %v3821_v20, %v4682_v2 }
 0x42d   :  { %v1158_v24 = vpop.f32.mrf.mxu1 }
 0x42e   :  { %v4708_v55 = vadd.f32 %v4682_v2, %v1158_v24  ;;  %v1676_v24 = vld [vmem:[%s5857_s8 + $0x28] sm:$0xff] }
 0x42f   :  { %3878 = vmatprep.subr.mxu0 %v1676_v24 }
 0x430   :  { %v1389_v50 = vadd.f32 %v1388_v5, %v4708_v55  ;;  %3879 = vmatpush3.msra.mxu0 %v1676_v24 }
 0x432   :  { %v1390_v0 = vadd.f32 %v1389_v50, %v4713_v7  ;;  %v1675_v50 = vld [vmem:[%s5857_s8 + $0x20] sm:$0xff] }
 0x433   :  { %v3824_v12 = vpop.f32.mrf.mxu1  ;;  %3880 = vmatprep.subr.mxu0 %v1675_v50 }
 0x434   :  { %v4721_v57 = vadd.f32 %v3824_v12, %v4682_v2  ;;  %3881 = vmatpush3.msra.mxu0 %v1675_v50 }
 0x435   :  { %v1168_v17 = vpop.f32.mrf.mxu1 }
 0x436   :  { %v4716_v62 = vadd.f32 %v4682_v2, %v1168_v17 }
 0x438   :  { %v1391_v16 = vadd.f32 %v1390_v0, %v4716_v62  ;;  %v1674_v0 = vld [vmem:[%s5857_s8 + $0x18] sm:$0xff] }
 0x439   :  { %3882 = vmatprep.subr.mxu0 %v1674_v0 }
 0x43a   :  { %v1392_v51 = vadd.f32 %v1391_v16, %v4721_v57  ;;  %3883 = vmatpush3.msra.mxu0 %v1674_v0  ;;  %v1673_v16 = vld [vmem:[%s5857_s8 + $0x10] sm:$0xff] }
 0x43b   :  { %v3827_v1 = vpop.f32.mrf.mxu1  ;;  %3884 = vmatprep.subr.mxu0 %v1673_v16 }
 0x43c   :  { %v4729_v63 = vadd.f32 %v3827_v1, %v4682_v2  ;;  %3885 = vmatpush3.msra.mxu0 %v1673_v16 }
 0x43d   :  { %v1178_v11 = vpop.f32.mrf.mxu1 }
 0x43e   :  { %v4724_v8 = vadd.f32 %v4682_v2, %v1178_v11 }
 0x440   :  { %v1393_v56 = vadd.f32 %v1392_v51, %v4724_v8 }
 0x442   :  { %v1394_v14 = vadd.f32 %v1393_v56, %v4729_v63  ;;  %v1671_v56 = vld [vmem:[%s5857_s8] sm:$0xff] }
 0x443   :  { %v3830_v15 = vpop.f32.mrf.mxu1 }
 0x444   :  { %v4740_v37 = vadd.f32 %v3830_v15, %v4682_v2 }
 0x445   :  { %v1188_v60 = vpop.f32.mrf.mxu1 }
 0x446   :  { %v4732_v9 = vadd.f32 %v4682_v2, %v1188_v60  ;;  %v1672_v60 = vld [vmem:[%s5857_s8 + $0x8] sm:$0xff] }
 0x447   :  { %3886 = vmatprep.subr.mxu0 %v1672_v60 }
 0x448   :  { %v1395_v61 = vadd.f32 %v1394_v14, %v4732_v9  ;;  %3887 = vmatpush3.msra.mxu0 %v1672_v60 }
 0x449   :  { %3888 = vmatprep.subr.mxu0 %v1671_v56 }
 0x44a   :  { %v1396_v35 = vadd.f32 %v1395_v61, %v4740_v37  ;;  %3889 = vmatpush3.msra.mxu0 %v1671_v56 }
 0x44b   :  { %v3833_v52 = vpop.f32.mrf.mxu1 }
 0x44c   :  { %v4757_v32 = vadd.f32 %v3833_v52, %v4682_v2 }
 0x44d   :  { %v1198_v6 = vpop.f32.mrf.mxu1 }
 0x44e   :  { %v4743_v40 = vadd.f32 %v4682_v2, %v1198_v6 }
 0x450   :  { %v1397_v31 = vadd.f32 %v1396_v35, %v4743_v40 }
 0x452   :  { %v1398_v29 = vadd.f32 %v1397_v31, %v4757_v32 }
 0x453   :  { %v3836_v42 = vpop.f32.mrf.mxu1 }
 0x454   :  { %v4774_v44 = vadd.f32 %v3836_v42, %v4682_v2 }
 0x455   :  { %v1208_v30 = vpop.f32.mrf.mxu1 }
 0x456   :  { %v4760_v34 = vadd.f32 %v4682_v2, %v1208_v30 }
 0x458   :  { %v1399_v25 = vadd.f32 %v1398_v29, %v4760_v34 }
 0x45a   :  { %v1400_v48 = vadd.f32 %v1399_v25, %v4774_v44 }
 0x45b   :  { %v3839_v28 = vpop.f32.mrf.mxu1 }
 0x45c   :  { %v4791_v18 = vadd.f32 %v3839_v28, %v4682_v2 }
 0x45d   :  { %v1218_v26 = vpop.f32.mrf.mxu1 }
 0x45e   :  { %v4777_v45 = vadd.f32 %v4682_v2, %v1218_v26 }
 0x460   :  { %v1401_v33 = vadd.f32 %v1400_v48, %v4777_v45 }
 0x462   :  { %v1402_v20 = vadd.f32 %v1401_v33, %v4791_v18 }
 0x463   :  { %v3842_v47 = vpop.f32.mrf.mxu1 }
 0x464   :  { %v4802_v5 = vadd.f32 %v3842_v47, %v4682_v2 }
 0x465   :  { %v1228_v54 = vpop.f32.mrf.mxu1 }
 0x466   :  { %v4794_v19 = vadd.f32 %v4682_v2, %v1228_v54 }
 0x468   :  { %v1403_v4 = vadd.f32 %v1402_v20, %v4794_v19 }
 0x46a   :  { %v1404_v1 = vadd.f32 %v1403_v4, %v4802_v5 }
 0x46b   :  { %v3845_v23 = vpop.f32.mrf.mxu1 }
 0x46c   :  { %v4821_v51 = vadd.f32 %v3845_v23, %v4682_v2 }
 0x46d   :  { %v1238_v12 = vpop.f32.mrf.mxu1 }
 0x46e   :  { %v4805_v17 = vadd.f32 %v4682_v2, %v1238_v12 }
 0x470   :  { %v1405_v11 = vadd.f32 %v1404_v1, %v4805_v17 }
 0x472   :  { %v1406_v6 = vadd.f32 %v1405_v11, %v4821_v51 }
 0x473   :  { %v4818_v15 = vpop.f32.mrf.mxu1 }
 0x475   :  { %v1248_v52 = vpop.f32.mrf.mxu1 }
 0x476   :  { %v4830_v14 = vadd.f32 %v4682_v2, %v1248_v52 }
 0x478   :  { %v1407_v61 = vadd.f32 %v1406_v6, %v4830_v14 }
 0x47a   :  { %v1415_v10 = vrot.slane %v1407_v61, 4 }
 0x47c   :  { %v1416_v42 = vadd.f32 %v1415_v10, %v1407_v61 }
 0x47e   :  { %v1417_v39 = vrot.slane %v1416_v42, 2 }
 0x480   :  { %v1418_v35 = vadd.f32 %v1417_v39, %v1416_v42 }
 0x482   :  { %v1419_v36 = vrot.slane %v1418_v35, 1 }
 0x484   :  { %v1420_v30 = vadd.f32 %v1419_v36, %v1418_v35 }
 0x486   :  { %v4834_v31 = vmul.f32 0.005, %v1420_v30 }
 0x488   :  { %v1422_v27 = vsub.f32 %v4685_v53, %v4834_v31  ;;  %v1423_v28 = vsub.f32 %v4688_v3, %v4834_v31  ;;  %v1424_v38 = vsub.f32 %v4691_v58, %v4834_v31  ;;  %v1425_v26 = vsub.f32 %v4697_v21, %v4834_v31 }
 0x489   :  { %v1426_v25 = vsub.f32 %v4700_v22, %v4834_v31  ;;  %v1427_v47 = vsub.f32 %v4705_v13, %v4834_v31  ;;  %v1428_v54 = vsub.f32 %v4708_v55, %v4834_v31  ;;  %v1429_v20 = vsub.f32 %v4713_v7, %v4834_v31 }
 0x48a   :  { %v1486_v29 = vmul.f32 %v1422_v27, %v1422_v27  ;;  %v1487_v41 = vmul.f32 %v1423_v28, %v1423_v28  ;;  %v1488_v43 = vmul.f32 %v1424_v38, %v1424_v38  ;;  %v1489_v48 = vmul.f32 %v1425_v26, %v1425_v26 }
 0x48b   :  { %v1490_v33 = vmul.f32 %v1426_v25, %v1426_v25  ;;  %v1491_v23 = vmul.f32 %v1427_v47, %v1427_v47  ;;  %v1430_v4 = vsub.f32 %v4716_v62, %v4834_v31  ;;  %v1492_v12 = vmul.f32 %v1428_v54, %v1428_v54 }
 0x48c   :  { %v1518_v46 = vadd.f32 %v1487_v41, %v1486_v29  ;;  %v1431_v1 = vsub.f32 %v4721_v57, %v4834_v31  ;;  %v1493_v0 = vmul.f32 %v1429_v20, %v1429_v20  ;;  %v1432_v16 = vsub.f32 %v4724_v8, %v4834_v31 }
 0x48d   :  { %v1494_v60 = vmul.f32 %v1430_v4, %v1430_v4  ;;  %v1433_v52 = vsub.f32 %v4729_v63, %v4834_v31  ;;  %v1434_v10 = vsub.f32 %v4732_v9, %v4834_v31  ;;  %v1435_v35 = vsub.f32 %v4740_v37, %v4834_v31 }
 0x48e   :  { %v1519_v49 = vadd.f32 %v1518_v46, %v1488_v43  ;;  %v1495_v6 = vmul.f32 %v1431_v1, %v1431_v1  ;;  %v1496_v42 = vmul.f32 %v1432_v16, %v1432_v16  ;;  %v1436_v27 = vsub.f32 %v4743_v40, %v4834_v31 }
 0x48f   :  { %v1497_v36 = vmul.f32 %v1433_v52, %v1433_v52  ;;  %v1498_v28 = vmul.f32 %v1434_v10, %v1434_v10  ;;  %v1437_v29 = vsub.f32 %v4757_v32, %v4834_v31  ;;  %v1499_v41 = vmul.f32 %v1435_v35, %v1435_v35 }
 0x490   :  { %v1520_v59 = vadd.f32 %v1519_v49, %v1489_v48  ;;  %v1438_v25 = vsub.f32 %v4760_v34, %v4834_v31  ;;  %v1500_v43 = vmul.f32 %v1436_v27, %v1436_v27  ;;  %v1439_v47 = vsub.f32 %v4774_v44, %v4834_v31 }
 0x491   :  { %v1501_v48 = vmul.f32 %v1437_v29, %v1437_v29  ;;  %v1440_v54 = vsub.f32 %v4777_v45, %v4834_v31  ;;  %v1441_v20 = vsub.f32 %v4791_v18, %v4834_v31  ;;  %v1442_v4 = vsub.f32 %v4794_v19, %v4834_v31 }
 0x492   :  { %v1521_v24 = vadd.f32 %v1520_v59, %v1490_v33  ;;  %v1502_v33 = vmul.f32 %v1438_v25, %v1438_v25  ;;  %v1443_v1 = vsub.f32 %v4802_v5, %v4834_v31  ;;  %v1444_v16 = vsub.f32 %v4805_v17, %v4834_v31 }
 0x493   :  { %v1445_v52 = vsub.f32 %v4821_v51, %v4834_v31  ;;  %v1446_v10 = vsub.f32 %v4830_v14, %v4834_v31 }
 0x494   :  { %v1522_v50 = vadd.f32 %v1521_v24, %v1491_v23  ;;  %v1503_v23 = vmul.f32 %v1439_v47, %v1439_v47 }
 0x495   :  { %v1509_v35 = vmul.f32 %v1445_v52, %v1445_v52 }
 0x496   :  { %v1523_v11 = vadd.f32 %v1522_v50, %v1492_v12  ;;  %v1504_v12 = vmul.f32 %v1440_v54, %v1440_v54 }
 0x498   :  { %v1524_v56 = vadd.f32 %v1523_v11, %v1493_v0  ;;  %v1505_v0 = vmul.f32 %v1441_v20, %v1441_v20  ;;  %v1560_v20 = vld [vmem:[%s5859_s7] sm:$0x1] }
 0x49a   :  { %v1525_v61 = vadd.f32 %v1524_v56, %v1494_v60  ;;  %v1506_v60 = vmul.f32 %v1442_v4, %v1442_v4 }
 0x49c   :  { %v1526_v39 = vadd.f32 %v1525_v61, %v1495_v6  ;;  %v1507_v6 = vmul.f32 %v1443_v1, %v1443_v1 }
 0x49e   :  { %v1527_v30 = vadd.f32 %v1526_v39, %v1496_v42  ;;  %v1508_v42 = vmul.f32 %v1444_v16, %v1444_v16 }
 0x4a0   :  { %v1528_v38 = vadd.f32 %v1527_v30, %v1497_v36  ;;  %v1510_v30 = vmul.f32 %v1446_v10, %v1446_v10 }
 0x4a2   :  { %v1529_v26 = vadd.f32 %v1528_v38, %v1498_v28 }
 0x4a4   :  { %v1530_v46 = vadd.f32 %v1529_v26, %v1499_v41 }
 0x4a6   :  { %v1531_v49 = vadd.f32 %v1530_v46, %v1500_v43 }
 0x4a8   :  { %v1532_v59 = vadd.f32 %v1531_v49, %v1501_v48  ;;  %v1564_v48 = vlaneseq  ;;  %v1556_v49 = vld [vmem:[%s5858_s6] sm:$0x1] }
 0x4aa   :  { %v1533_v24 = vadd.f32 %v1532_v59, %v1502_v33  ;;  %v1565_v54 = vshrl.u32 %v1564_v48, 7 }
 0x4ac   :  { %v1534_v50 = vadd.f32 %v1533_v24, %v1503_v23  ;;  %v4892_v23 = vsub.s32 0, %v1565_v54 }
 0x4ae   :  { %v1535_v11 = vadd.f32 %v1534_v50, %v1504_v12  ;;  %5976 = vst [vmem:[#allocation3_spill] sm:$0xff] %v4892_v23 }
 0x4b0   :  { %v1536_v56 = vadd.f32 %v1535_v11, %v1505_v0 }
 0x4b2   :  { %v1537_v61 = vadd.f32 %v1536_v56, %v1506_v60 }
 0x4b4   :  { %v1538_v39 = vadd.f32 %v1537_v61, %v1507_v6 }
 0x4b6   :  { %v1539_v36 = vadd.f32 %v1538_v39, %v1508_v42 }
 0x4b8   :  { %v1540_v27 = vadd.f32 %v1539_v36, %v1509_v35 }
 0x4ba   :  { %v1541_v28 = vadd.f32 %v1540_v27, %v1510_v30 }
 0x4bc   :  { %v1549_v38 = vrot.slane %v1541_v28, 4 }
 0x4be   :  { %v1550_v29 = vadd.f32 %v1549_v38, %v1541_v28 }
 0x4c0   :  { %v1551_v41 = vrot.slane %v1550_v29, 2 }
 0x4c2   :  { %v1552_v26 = vadd.f32 %v1551_v41, %v1550_v29 }
 0x4c4   :  { %v1553_v25 = vrot.slane %v1552_v26, 1 }
 0x4c6   :  { %v1554_v43 = vadd.f32 %v1553_v25, %v1552_v26 }
 0x4c8   :  { %v1555_v46 = vmul.f32 0.005, %v1554_v43 }
 0x4ca   :  { %v1557_v47 = vadd.f32 1e-05, %v1555_v46 }
 0x4cc   :  { %4050 = vrsqrt.f32 %v1557_v47 }
 0x4d9   :  { %v4051_v33 = vpop.eup %4050 }
 0x4da   :  { %v1559_v59 = vmul.f32 %v4051_v33, %v1556_v49 }
 0x4dc   :  { %v1561_v24 = vmul.f32 %v1559_v59, %v4834_v31  ;;  %v4896_v12 = vrot.slane %v1559_v59, %v4892_v23 }
 0x4de   :  { %v1562_v4 = vsub.f32 %v1560_v20, %v1561_v24  ;;  %v1570_v1 = vmul.f32 %v4896_v12, %v4688_v3  ;;  %v1569_v11 = vmul.f32 %v4896_v12, %v4685_v53  ;;  %v1571_v16 = vmul.f32 %v4896_v12, %v4691_v58 }
 0x4df   :  { %v1572_v60 = vmul.f32 %v4896_v12, %v4697_v21  ;;  %v1573_v6 = vmul.f32 %v4896_v12, %v4700_v22  ;;  %v1574_v58 = vmul.f32 %v4896_v12, %v4705_v13  ;;  %v1575_v21 = vmul.f32 %v4896_v12, %v4708_v55 }
 0x4e0   :  { %v4899_v50 = vrot.slane %v1562_v4, %v4892_v23  ;;  %v1576_v36 = vmul.f32 %v4896_v12, %v4713_v7  ;;  %v1577_v30 = vmul.f32 %v4896_v12, %v4716_v62  ;;  %v1578_v38 = vmul.f32 %v4896_v12, %v4721_v57 }
 0x4e1   :  { %v1579_v29 = vmul.f32 %v4896_v12, %v4724_v8  ;;  %v1580_v25 = vmul.f32 %v4896_v12, %v4729_v63  ;;  %v1581_v43 = vmul.f32 %v4896_v12, %v4732_v9  ;;  %v1582_v48 = vmul.f32 %v4896_v12, %v4740_v37  ;;  %v3851_v37 = vpop.f32.mrf.mxu1 }
 0x4e2   :  { %v1608_v0 = vadd.f32 %v4899_v50, %v1570_v1  ;;  %v1607_v31 = vadd.f32 %v4899_v50, %v1569_v11  ;;  %v1609_v52 = vadd.f32 %v4899_v50, %v1571_v16  ;;  %v1610_v61 = vadd.f32 %v4899_v50, %v1572_v60 }
 0x4e3   :  { %v1611_v53 = vadd.f32 %v4899_v50, %v1573_v6  ;;  %v1612_v39 = vadd.f32 %v4899_v50, %v1574_v58  ;;  %v1613_v22 = vadd.f32 %v4899_v50, %v1575_v21  ;;  %v1614_v27 = vadd.f32 %v4899_v50, %v1576_v36  ;;  %v1258_v16 = vpop.f32.mrf.mxu1 }
 0x4e4   :  { %v1640_v56 = vmax.f32 %v1608_v0, 0.0  ;;  %v1639_v3 = vmax.f32 %v1607_v31, 0.0  ;;  %v1641_v10 = vmax.f32 %v1609_v52, 0.0  ;;  %v1642_v42 = vmax.f32 %v1610_v61, 0.0 }
 0x4e5   :  { %v1643_v35 = vmax.f32 %v1611_v53, 0.0  ;;  %v1644_v13 = vmax.f32 %v1612_v39, 0.0  ;;  %v1645_v28 = vmax.f32 %v1613_v22, 0.0  ;;  %v1615_v55 = vadd.f32 %v4899_v50, %v1577_v30  ;;  %v3854_v6 = vpop.f32.mrf.mxu1 }
 0x4e6   :  { %3890 = vmatprep.mubr.f32.mxu0 %v1639_v3  ;;  %v1646_v7 = vmax.f32 %v1614_v27, 0.0  ;;  %v1616_v41 = vadd.f32 %v4899_v50, %v1578_v38  ;;  %v1617_v62 = vadd.f32 %v4899_v50, %v1579_v29  ;;  %v1618_v46 = vadd.f32 %v4899_v50, %v1580_v25 }
 0x4e7   :  { %3891 = vmatmul.mubr.f32.vlgmr.msra.gmra.mxu0 %v1640_v56  ;;  %v1647_v26 = vmax.f32 %v1615_v55, 0.0  ;;  %v1619_v8 = vadd.f32 %v4899_v50, %v1581_v43  ;;  %v1583_v49 = vmul.f32 %v4896_v12, %v4743_v40  ;;  %v1620_v54 = vadd.f32 %v4899_v50, %v1582_v48  ;;  %v1268_v58 = vpop.f32.mrf.mxu1 }
 0x4e8   :  { %3893 = vmatprep.mubr.f32.mxu0 %v1641_v10  ;;  %v1648_v57 = vmax.f32 %v1616_v41, 0.0  ;;  %v1649_v47 = vmax.f32 %v1617_v62, 0.0  ;;  %v1650_v63 = vmax.f32 %v1618_v46, 0.0  ;;  %v1584_v59 = vmul.f32 %v4896_v12, %v4757_v32 }
 0x4e9   :  { %v1651_v33 = vmax.f32 %v1619_v8, 0.0  ;;  %v1621_v9 = vadd.f32 %v4899_v50, %v1583_v49  ;;  %v1585_v20 = vmul.f32 %v4896_v12, %v4760_v34  ;;  %v1652_v24 = vmax.f32 %v1620_v54, 0.0  ;;  %v3857_v36 = vpop.f32.mrf.mxu1 }
 0x4ea   :  { %v1622_v4 = vadd.f32 %v4899_v50, %v1584_v59  ;;  %v1586_v0 = vmul.f32 %v4896_v12, %v4774_v44  ;;  %v1587_v11 = vmul.f32 %v4896_v12, %v4777_v45  ;;  %v1588_v56 = vmul.f32 %v4896_v12, %v4791_v18 }
 0x4eb   :  { %3894 = vmatmul.mubr.f32.gmra.mxu0 %v1642_v42  ;;  %v1653_v40 = vmax.f32 %v1621_v9, 0.0  ;;  %v1623_v1 = vadd.f32 %v4899_v50, %v1585_v20  ;;  %v1589_v52 = vmul.f32 %v4896_v12, %v4794_v19  ;;  %v1590_v10 = vmul.f32 %v4896_v12, %v4802_v5 }
 0x4ec   :  { %3896 = vmatprep.mubr.f32.mxu0 %v1643_v35  ;;  %v1624_v32 = vadd.f32 %v4899_v50, %v1586_v0  ;;  %v1654_v34 = vmax.f32 %v1622_v4, 0.0  ;;  %v1625_v60 = vadd.f32 %v4899_v50, %v1587_v11  ;;  %v1626_v44 = vadd.f32 %v4899_v50, %v1588_v56 }
 0x4ed   :  { %v1655_v31 = vmax.f32 %v1623_v1, 0.0  ;;  %v1627_v61 = vadd.f32 %v4899_v50, %v1589_v52  ;;  %v1591_v53 = vmul.f32 %v4896_v12, %v4805_v17  ;;  %v1628_v18 = vadd.f32 %v4899_v50, %v1590_v10 }
 0x4ee   :  { %v1656_v45 = vmax.f32 %v1624_v32, 0.0  ;;  %v1657_v3 = vmax.f32 %v1625_v60, 0.0  ;;  %v1658_v19 = vmax.f32 %v1626_v44, 0.0  ;;  %v1592_v39 = vmul.f32 %v4896_v12, %v4821_v51 }
 0x4ef   :  { %3897 = vmatmul.mubr.f32.gmra.mxu0 %v1644_v13  ;;  %v1659_v21 = vmax.f32 %v1627_v61, 0.0  ;;  %v1629_v42 = vadd.f32 %v4899_v50, %v1591_v53  ;;  %v1593_v35 = vmul.f32 %v4896_v12, %v4830_v14  ;;  %v1259_v5 = vadd.f32 %v4682_v2, %v1258_v16 }
 0x4f0   :  { %3899 = vmatprep.mubr.f32.mxu0 %v1645_v28  ;;  %v1254_v17 = vadd.f32 %v4818_v15, %v4682_v2  ;;  %v1630_v22 = vadd.f32 %v4899_v50, %v1592_v39  ;;  %v1660_v30 = vmax.f32 %v1628_v18, 0.0  ;;  %v1264_v51 = vadd.f32 %v3851_v37, %v4682_v2  ;;  %v1278_v15 = vpop.f32.mrf.mxu1 }
 0x4f1   :  { %v1661_v13 = vmax.f32 %v1629_v42, 0.0  ;;  %v1631_v27 = vadd.f32 %v4899_v50, %v1593_v35  ;;  %v1595_v14 = vmul.f32 %v4896_v12, %v1259_v5  ;;  %v1269_v55 = vadd.f32 %v4682_v2, %v1268_v58 }
 0x4f2   :  { %v1594_v28 = vmul.f32 %v4896_v12, %v1254_v17  ;;  %v1662_v29 = vmax.f32 %v1630_v22, 0.0  ;;  %v1274_v62 = vadd.f32 %v3854_v6, %v4682_v2  ;;  %v1279_v43 = vadd.f32 %v4682_v2, %v1278_v15 }
 0x4f3   :  { %3900 = vmatmul.mubr.f32.gmra.mxu0 %v1646_v7  ;;  %v1663_v7 = vmax.f32 %v1631_v27, 0.0  ;;  %v1633_v41 = vadd.f32 %v4899_v50, %v1595_v14  ;;  %v1597_v25 = vmul.f32 %v4896_v12, %v1269_v55  ;;  %v1284_v49 = vadd.f32 %v3857_v36, %v4682_v2 }
 0x4f4   :  { %3902 = vmatprep.mubr.f32.mxu0 %v1647_v26  ;;  %v1632_v38 = vadd.f32 %v4899_v50, %v1594_v28  ;;  %v1596_v26 = vmul.f32 %v4896_v12, %v1264_v51  ;;  %v1598_v48 = vmul.f32 %v4896_v12, %v1274_v62 }
 0x4f5   :  { %v1635_v8 = vadd.f32 %v4899_v50, %v1597_v25  ;;  %v1600_v20 = vmul.f32 %v4896_v12, %v1284_v49  ;;  %v5025_v49 = vld [vmem:[%s5853_s0 + $0x24] ss:$8 sps:$4 sm:$0xff]  }
 0x4f6   :  { %v1634_v46 = vadd.f32 %v4899_v50, %v1596_v26 }
 0x4f7   :  { %3903 = vmatmul.mubr.f32.gmra.mxu0 %v1648_v57  ;;  %v1664_v57 = vmax.f32 %v1632_v38, 0.0  ;;  %v1667_v9 = vmax.f32 %v1635_v8, 0.0  ;;  %v5013_v8 = vld [vmem:[%s5853_s0 + $0x14] ss:$8 sps:$4 sm:$0xff]  }
 0x4f8   :  { %3905 = vmatprep.mubr.f32.mxu0 %v1649_v47  ;;  %v1665_v47 = vmax.f32 %v1633_v41, 0.0  ;;  %v1666_v54 = vmax.f32 %v1634_v46, 0.0 }
 0x4fb   :  { %3906 = vmatmul.mubr.f32.gmra.mxu0 %v1650_v63  ;;  %v1599_v63 = vmul.f32 %v4896_v12, %v1279_v43 }
 0x4fc   :  { %3908 = vmatprep.mubr.f32.mxu0 %v1651_v33  ;;  %v1636_v33 = vadd.f32 %v4899_v50, %v1598_v48  ;;  %v5019_v48 = vld [vmem:[%s5853_s0 + $0x10] ss:$8 sps:$4 sm:$0xff]  }
 0x4fd   :  { %v1637_v59 = vadd.f32 %v4899_v50, %v1599_v63  ;;  %v5031_v63 = vld [vmem:[%s5853_s0 + $0x20] ss:$8 sps:$4 sm:$0xff]  }
 0x4fe   :  { %v1668_v37 = vmax.f32 %v1636_v33, 0.0  ;;  %v5043_v33 = vld [vmem:[%s5853_s0 + $0x30] ss:$8 sps:$4 sm:$0xff]  }
 0x4ff   :  { %3909 = vmatmul.mubr.f32.gmra.mxu0 %v1652_v24  ;;  %v1638_v24 = vadd.f32 %v4899_v50, %v1600_v20  ;;  %v1669_v4 = vmax.f32 %v1637_v59, 0.0  ;;  %v5055_v59 = vld [vmem:[%s5853_s0 + $0x40] ss:$8 sps:$4 sm:$0xff]   ;;  %v5061_v20 = vld [vmem:[%s5853_s0 + $0x54] ss:$8 sps:$4 sm:$0xff]  }
 0x500   :  { %3911 = vmatprep.mubr.f32.mxu0 %v1653_v40  ;;  %v4054_v40 = vld [vmem:[%s5853_s0 + $0x4] ss:$8 sps:$4 sm:$0xff]   ;;  %5978 = vst [vmem:[#allocation5_spill] sm:$0xff] %v5055_v59  ;;  %5979 = vst [vmem:[#allocation6_spill] sm:$0xff] %v5061_v20 }
 0x501   :  { %v1670_v2 = vmax.f32 %v1638_v24, 0.0  ;;  %v5073_v24 = vld [vmem:[%s5853_s0 + $0x64] ss:$8 sps:$4 sm:$0xff]  }
 0x502   :  { %5981 = vst [vmem:[#allocation8_spill] sm:$0xff] %v5073_v24 }
 0x503   :  { %3912 = vmatmul.mubr.f32.gmra.mxu0 %v1654_v34 }
 0x504   :  { %3914 = vmatprep.mubr.f32.mxu0 %v1655_v31 }
 0x507   :  { %3915 = vmatmul.mubr.f32.gmra.mxu0 %v1656_v45 }
 0x508   :  { %3917 = vmatprep.mubr.f32.mxu0 %v1657_v3 }
 0x50b   :  { %3918 = vmatmul.mubr.f32.gmra.mxu0 %v1658_v19 }
 0x50c   :  { %3920 = vmatprep.mubr.f32.mxu0 %v1659_v21 }
 0x50f   :  { %3921 = vmatmul.mubr.f32.gmra.mxu0 %v1660_v30 }
 0x510   :  { %3923 = vmatprep.mubr.f32.mxu0 %v1661_v13 }
 0x513   :  { %3924 = vmatmul.mubr.f32.gmra.mxu0 %v1662_v29 }
 0x514   :  { %3926 = vmatprep.mubr.f32.mxu0 %v1663_v7 }
 0x517   :  { %3927 = vmatmul.mubr.f32.gmra.mxu0 %v1664_v57 }
 0x518   :  { %3929 = vmatprep.mubr.f32.mxu0 %v1665_v47  ;;  %v5007_v47 = vld [vmem:[%s5853_s0] ss:$8 sps:$4 sm:$0xff]  }
 0x51b   :  { %3930 = vmatmul.mubr.f32.gmra.mxu0 %v1666_v54  ;;  %v5037_v54 = vld [vmem:[%s5853_s0 + $0x34] ss:$8 sps:$4 sm:$0xff]  }
 0x51c   :  { %3932 = vmatprep.mubr.f32.mxu0 %v1667_v9  ;;  %v5049_v9 = vld [vmem:[%s5853_s0 + $0x44] ss:$8 sps:$4 sm:$0xff]  }
 0x51d   :  { %5977 = vst [vmem:[#allocation4_spill] sm:$0xff] %v5049_v9 }
 0x51f   :  { %3933 = vmatmul.mubr.f32.gmra.mxu0 %v1668_v37  ;;  %v5067_v37 = vld [vmem:[%s5853_s0 + $0x50] ss:$8 sps:$4 sm:$0xff]  }
 0x520   :  { %3935 = vmatprep.mubr.f32.mxu0 %v1669_v4  ;;  %5980 = vst [vmem:[#allocation7_spill] sm:$0xff] %v5067_v37  ;;  %v5079_v4 = vld [vmem:[%s5853_s0 + $0x60] ss:$8 sps:$4 sm:$0xff]  }
 0x521   :  { %5982 = vst [vmem:[#allocation9_spill] sm:$0xff] %v5079_v4 }
 0x523   :  { %3936 = vmatmul.mubr.f32.gmra.mxu0 %v1670_v2  ;;  %v5085_v2 = vld [vmem:[%s5853_s0 + $0x74] ss:$8 sps:$4 sm:$0xff]  }
 0x524   :  { %2144 = vmatprep.mubr.bf16.mxu0 %v4054_v40  ;;  %5983 = vst [vmem:[#allocation10_spill] sm:$0xff] %v5085_v2  ;;  %v5091_v40 = vld [vmem:[%s5853_s0 + $0x70] ss:$8 sps:$4 sm:$0xff]  }
 0x525   :  { %5984 = vst [vmem:[#allocation11_spill] sm:$0xff] %v5091_v40 }
 0x5a7   :  { %v5001_v1 = vpop.f32.mrf.mxu0 }
 0x5a9   :  { %v1753_v0 = vpop.f32.mrf.mxu0 }
 0x5aa   :  { %v1912_v12 = vpack.c.bf16 %v5001_v1, %v1753_v0  ;;  %v5097_v1 = vld [vmem:[%s5853_s0 + $0x84] ss:$8 sps:$4 sm:$0xff]   ;;  %v5103_v0 = vld [vmem:[%s5853_s0 + $0x80] ss:$8 sps:$4 sm:$0xff]  }
 0x5ab   :  { %v3895_v11 = vpop.f32.mrf.mxu0  ;;  %5985 = vst [vmem:[#allocation12_spill] sm:$0xff] %v5097_v1  ;;  %5986 = vst [vmem:[#allocation13_spill] sm:$0xff] %v5103_v0 }
 0x5ad   :  { %v1763_v32 = vpop.f32.mrf.mxu0 }
 0x5ae   :  { %v1913_v16 = vpack.c.bf16 %v3895_v11, %v1763_v32  ;;  %v5115_v11 = vld [vmem:[%s5853_s0 + $0x90] ss:$8 sps:$4 sm:$0xff]   ;;  %v5121_v32 = vld [vmem:[%s5853_s0 + $0xa4] ss:$8 sps:$4 sm:$0xff]  }
 0x5af   :  { %v3898_v34 = vpop.f32.mrf.mxu0  ;;  %5988 = vst [vmem:[#allocation15_spill] sm:$0xff] %v5115_v11  ;;  %5989 = vst [vmem:[#allocation16_spill] sm:$0xff] %v5121_v32 }
 0x5b1   :  { %v1773_v50 = vpop.f32.mrf.mxu0 }
 0x5b2   :  { %v1914_v31 = vpack.c.bf16 %v3898_v34, %v1773_v50  ;;  %v5133_v34 = vld [vmem:[%s5853_s0 + $0xb4] ss:$8 sps:$4 sm:$0xff]   ;;  %v5139_v50 = vld [vmem:[%s5853_s0 + $0xb0] ss:$8 sps:$4 sm:$0xff]  }
 0x5b3   :  { %v3901_v60 = vpop.f32.mrf.mxu0  ;;  %5991 = vst [vmem:[#allocation18_spill] sm:$0xff] %v5133_v34  ;;  %5992 = vst [vmem:[#allocation19_spill] sm:$0xff] %v5139_v50 }
 0x5b5   :  { %v1783_v56 = vpop.f32.mrf.mxu0 }
 0x5b6   :  { %v1915_v52 = vpack.c.bf16 %v3901_v60, %v1783_v56  ;;  %v5151_v60 = vld [vmem:[%s5853_s0 + $0xc0] ss:$8 sps:$4 sm:$0xff]   ;;  %v5157_v56 = vld [vmem:[%s5853_s0 + $0xd4] ss:$8 sps:$4 sm:$0xff]  }
 0x5b7   :  { %v3904_v44 = vpop.f32.mrf.mxu0  ;;  %5994 = vst [vmem:[#allocation21_spill] sm:$0xff] %v5151_v60  ;;  %5995 = vst [vmem:[#allocation22_spill] sm:$0xff] %v5157_v56 }
 0x5b9   :  { %v1793_v6 = vpop.f32.mrf.mxu0 }
 0x5ba   :  { %v1916_v62 = vpack.c.bf16 %v3904_v44, %v1793_v6  ;;  %v5169_v44 = vld [vmem:[%s5853_s0 + $0xe4] ss:$8 sps:$4 sm:$0xff]   ;;  %v5175_v6 = vld [vmem:[%s5853_s0 + $0xe0] ss:$8 sps:$4 sm:$0xff]  }
 0x5bb   :  { %v3907_v45 = vpop.f32.mrf.mxu0  ;;  %5997 = vst [vmem:[#allocation24_spill] sm:$0xff] %v5169_v44  ;;  %5998 = vst [vmem:[#allocation25_spill] sm:$0xff] %v5175_v6 }
 0x5bd   :  { %v1803_v3 = vpop.f32.mrf.mxu0 }
 0x5be   :  { %v1917_v41 = vpack.c.bf16 %v3907_v45, %v1803_v3  ;;  %v5181_v45 = vld [vmem:[%s5853_s0 + $0xf4] ss:$8 sps:$4 sm:$0xff]   ;;  %v5187_v3 = vld [vmem:[%s5853_s0 + $0xf0] ss:$8 sps:$4 sm:$0xff]  }
 0x5bf   :  { %v3910_v61 = vpop.f32.mrf.mxu0  ;;  %5999 = vst [vmem:[#allocation26_spill] sm:$0xff] %v5181_v45  ;;  %6000 = vst [vmem:[#allocation2_spill] sm:$0xff] %v5187_v3 }
 0x5c1   :  { %v1813_v10 = vpop.f32.mrf.mxu0 }
 0x5c2   :  { %v1918_v29 = vpack.c.bf16 %v3910_v61, %v1813_v10 }
 0x5c3   :  { %v3913_v53 = vpop.f32.mrf.mxu0 }
 0x5c5   :  { %v1823_v18 = vpop.f32.mrf.mxu0 }
 0x5c6   :  { %v1919_v38 = vpack.c.bf16 %v3913_v53, %v1823_v18 }
 0x5c7   :  { %v3916_v58 = vpop.f32.mrf.mxu0 }
 0x5c9   :  { %v1833_v19 = vpop.f32.mrf.mxu0 }
 0x5ca   :  { %v1920_v46 = vpack.c.bf16 %v3916_v58, %v1833_v19  ;;  %v5193_v58 = vld [vmem:[%s5860_s9] ss:$0 sm:$0xff] }
 0x5cb   :  { %v3919_v21 = vpop.f32.mrf.mxu0 }
 0x5cd   :  { %v1843_v42 = vpop.f32.mrf.mxu0 }
 0x5ce   :  { %v1921_v57 = vpack.c.bf16 %v3919_v21, %v1843_v42 }
 0x5cf   :  { %v3922_v39 = vpop.f32.mrf.mxu0 }
 0x5d1   :  { %v1853_v35 = vpop.f32.mrf.mxu0 }
 0x5d2   :  { %v1922_v43 = vpack.c.bf16 %v3922_v39, %v1853_v35 }
 0x5d3   :  { %v3925_v5 = vpop.f32.mrf.mxu0 }
 0x5d5   :  { %v1863_v17 = vpop.f32.mrf.mxu0 }
 0x5d6   :  { %v1923_v25 = vpack.c.bf16 %v3925_v5, %v1863_v17 }
 0x5d7   :  { %v3928_v22 = vpop.f32.mrf.mxu0 }
 0x5d9   :  { %v1873_v36 = vpop.f32.mrf.mxu0 }
 0x5da   :  { %v1924_v26 = vpack.c.bf16 %v3928_v22, %v1873_v36 }
 0x5db   :  { %v3931_v30 = vpop.f32.mrf.mxu0 }
 0x5dd   :  { %v1883_v13 = vpop.f32.mrf.mxu0 }
 0x5de   :  { %v1925_v7 = vpack.c.bf16 %v3931_v30, %v1883_v13 }
 0x5df   :  { %v3934_v27 = vpop.f32.mrf.mxu0 }
 0x5e1   :  { %v1893_v28 = vpop.f32.mrf.mxu0 }
 0x5e2   :  { %v1926_v15 = vpack.c.bf16 %v3934_v27, %v1893_v28 }
 0x5e3   :  { %v3937_v51 = vpop.f32.mrf.mxu0 }
 0x5e5   :  { %v1903_v14 = vpop.f32.mrf.mxu0 }
 0x5e6   :  { %v1927_v55 = vpack.c.bf16 %v3937_v51, %v1903_v14 }
 0x5e8   :  { %3496 = vmatprep.subr.bf16.mxu1 %v1927_v55 }
 0x5e9   :  { %3497 = vmatpush3.bf16.msra.mxu1 %v1919_v38 }
 0x5ea   :  { %3498 = vmatprep.subr.bf16.mxu1 %v1926_v15 }
 0x5ed   :  { %3499 = vmatpush3.bf16.msra.mxu1 %v1918_v29 }
 0x5ee   :  { %3500 = vmatprep.subr.bf16.mxu1 %v1925_v7 }
 0x5f1   :  { %3501 = vmatpush3.bf16.msra.mxu1 %v1917_v41 }
 0x5f2   :  { %3502 = vmatprep.subr.bf16.mxu1 %v1924_v26 }
 0x5f5   :  { %3503 = vmatpush3.bf16.msra.mxu1 %v1916_v62 }
 0x5f6   :  { %3504 = vmatprep.subr.bf16.mxu1 %v1923_v25 }
 0x5f9   :  { %3505 = vmatpush3.bf16.msra.mxu1 %v1915_v52  ;;  %v5163_v52 = vld [vmem:[%s5853_s0 + $0xd0] ss:$8 sps:$4 sm:$0xff]  }
 0x5fa   :  { %3506 = vmatprep.subr.bf16.mxu1 %v1922_v43  ;;  %5996 = vst [vmem:[#allocation23_spill] sm:$0xff] %v5163_v52 }
 0x5fd   :  { %3507 = vmatpush3.bf16.msra.mxu1 %v1914_v31  ;;  %v5145_v31 = vld [vmem:[%s5853_s0 + $0xc4] ss:$8 sps:$4 sm:$0xff]  }
 0x5fe   :  { %3508 = vmatprep.subr.bf16.mxu1 %v1921_v57  ;;  %5993 = vst [vmem:[#allocation20_spill] sm:$0xff] %v5145_v31 }
 0x601   :  { %3509 = vmatpush3.bf16.msra.mxu1 %v1913_v16  ;;  %v5127_v16 = vld [vmem:[%s5853_s0 + $0xa0] ss:$8 sps:$4 sm:$0xff]  }
 0x602   :  { %3510 = vmatprep.subr.bf16.mxu1 %v1920_v46  ;;  %5990 = vst [vmem:[#allocation17_spill] sm:$0xff] %v5127_v16 }
 0x605   :  { %3511 = vmatpush3.bf16.msra.mxu1 %v1912_v12  ;;  %v5109_v12 = vld [vmem:[%s5853_s0 + $0x94] ss:$8 sps:$4 sm:$0xff]  }
 0x606   :  { %5987 = vst [vmem:[#allocation14_spill] sm:$0xff] %v5109_v12 }
 0x608   :  { %1968 = vmatmul.mubr.bf16.vlgmr.msra.gmra.mxu1 %v5007_v47 }
 0x609   :  { %1975 = vmatprep.mubr.bf16.mxu1 %v5013_v8 }
 0x610   :  { %1976 = vmatmul.mubr.bf16.gmra.mxu1 %v5019_v48 }
 0x611   :  { %1983 = vmatprep.mubr.bf16.mxu1 %v5025_v49 }
 0x618   :  { %1984 = vmatmul.mubr.bf16.gmra.mxu1 %v5031_v63 }
 0x619   :  { %1991 = vmatprep.mubr.bf16.mxu1 %v5037_v54 }
 0x620   :  { %1992 = vmatmul.mubr.bf16.gmra.mxu1 %v5043_v33 }
 0x621   :  { %1999 = vmatprep.mubr.bf16.mxu1 %v5049_v9 }
 0x628   :  { %2000 = vmatmul.mubr.bf16.gmra.mxu1 %v5055_v59 }
 0x629   :  { %2007 = vmatprep.mubr.bf16.mxu1 %v5061_v20 }
 0x630   :  { %2008 = vmatmul.mubr.bf16.gmra.mxu1 %v5067_v37 }
 0x631   :  { %2015 = vmatprep.mubr.bf16.mxu1 %v5073_v24 }
 0x638   :  { %2016 = vmatmul.mubr.bf16.gmra.mxu1 %v5079_v4 }
 0x639   :  { %2023 = vmatprep.mubr.bf16.mxu1 %v5085_v2 }
 0x640   :  { %2024 = vmatmul.mubr.bf16.gmra.mxu1 %v5091_v40 }
 0x641   :  { %2031 = vmatprep.mubr.bf16.mxu1 %v5097_v1 }
 0x648   :  { %2032 = vmatmul.mubr.bf16.gmra.mxu1 %v5103_v0 }
 0x649   :  { %2039 = vmatprep.mubr.bf16.mxu1 %v5109_v12 }
 0x650   :  { %2040 = vmatmul.mubr.bf16.gmra.mxu1 %v5115_v11 }
 0x651   :  { %2047 = vmatprep.mubr.bf16.mxu1 %v5121_v32 }
 0x658   :  { %2048 = vmatmul.mubr.bf16.gmra.mxu1 %v5127_v16 }
 0x659   :  { %2055 = vmatprep.mubr.bf16.mxu1 %v5133_v34 }
 0x660   :  { %2056 = vmatmul.mubr.bf16.gmra.mxu1 %v5139_v50 }
 0x661   :  { %2063 = vmatprep.mubr.bf16.mxu1 %v5145_v31 }
 0x668   :  { %2064 = vmatmul.mubr.bf16.gmra.mxu1 %v5151_v60 }
 0x669   :  { %2071 = vmatprep.mubr.bf16.mxu1 %v5157_v56 }
 0x670   :  { %2072 = vmatmul.mubr.bf16.gmra.mxu1 %v5163_v52 }
 0x671   :  { %2079 = vmatprep.mubr.bf16.mxu1 %v5169_v44 }
 0x678   :  { %2080 = vmatmul.mubr.bf16.gmra.mxu1 %v5175_v6 }
 0x679   :  { %2087 = vmatprep.mubr.bf16.mxu1 %v5181_v45 }
 0x680   :  { %2088 = vmatmul.mubr.bf16.gmra.mxu1 %v5187_v3 }
 0x6c8   :  { %v3512_v61 = vpop.f32.mrf.mxu1 }
 0x6ca   :  { %v3513_v10 = vpop.f32.mrf.mxu1 }
 0x6cb   :  { %v3514_v53 = vadd.f32 %v3513_v10, %v3512_v61 }
 0x6cc   :  { %v3515_v18 = vpop.f32.mrf.mxu1 }
 0x6cd   :  { %v5196_v39 = vadd.f32 %v3514_v53, %v5193_v58 }
 0x6ce   :  { %v3516_v19 = vpop.f32.mrf.mxu1 }
 0x6cf   :  { %v3517_v21 = vadd.f32 %v3516_v19, %v3515_v18 }
 0x6d0   :  { %v3518_v42 = vpop.f32.mrf.mxu1 }
 0x6d1   :  { %v5199_v35 = vadd.f32 %v3517_v21, %v5193_v58 }
 0x6d2   :  { %v3519_v5 = vpop.f32.mrf.mxu1 }
 0x6d3   :  { %v3520_v22 = vadd.f32 %v3519_v5, %v3518_v42 }
 0x6d4   :  { %v3521_v36 = vpop.f32.mrf.mxu1 }
 0x6d5   :  { %v5204_v28 = vadd.f32 %v3520_v22, %v5193_v58 }
 0x6d6   :  { %v3522_v30 = vpop.f32.mrf.mxu1 }
 0x6d7   :  { %v3523_v13 = vadd.f32 %v3522_v30, %v3521_v36 }
 0x6d8   :  { %v3524_v27 = vpop.f32.mrf.mxu1 }
 0x6d9   :  { %v5207_v51 = vadd.f32 %v3523_v13, %v5193_v58 }
 0x6da   :  { %v3525_v14 = vpop.f32.mrf.mxu1 }
 0x6db   :  { %v3526_v38 = vadd.f32 %v3525_v14, %v3524_v27 }
 0x6dc   :  { %v3527_v15 = vpop.f32.mrf.mxu1 }
 0x6dd   :  { %v5212_v26 = vadd.f32 %v3526_v38, %v5193_v58 }
 0x6de   :  { %v3528_v29 = vpop.f32.mrf.mxu1 }
 0x6df   :  { %v3529_v7 = vadd.f32 %v3528_v29, %v3527_v15 }
 0x6e0   :  { %v3530_v41 = vpop.f32.mrf.mxu1 }
 0x6e1   :  { %v5215_v62 = vadd.f32 %v3529_v7, %v5193_v58 }
 0x6e2   :  { %v3531_v25 = vpop.f32.mrf.mxu1 }
 0x6e3   :  { %v3532_v57 = vadd.f32 %v3531_v25, %v3530_v41 }
 0x6e4   :  { %v3533_v46 = vpop.f32.mrf.mxu1 }
 0x6e5   :  { %v5220_v18 = vadd.f32 %v3532_v57, %v5193_v58 }
 0x6e6   :  { %v3534_v61 = vpop.f32.mrf.mxu1 }
 0x6e7   :  { %v3535_v10 = vadd.f32 %v3534_v61, %v3533_v46 }
 0x6e8   :  { %v3536_v53 = vpop.f32.mrf.mxu1 }
 0x6e9   :  { %v5223_v19 = vadd.f32 %v3535_v10, %v5193_v58 }
 0x6ea   :  { %v3537_v21 = vpop.f32.mrf.mxu1 }
 0x6eb   :  { %v3538_v5 = vadd.f32 %v3537_v21, %v3536_v53 }
 0x6ec   :  { %v3539_v22 = vpop.f32.mrf.mxu1 }
 0x6ed   :  { %v5228_v27 = vadd.f32 %v3538_v5, %v5193_v58 }
 0x6ee   :  { %v3540_v36 = vpop.f32.mrf.mxu1 }
 0x6ef   :  { %v3541_v30 = vadd.f32 %v3540_v36, %v3539_v22 }
 0x6f0   :  { %v3542_v13 = vpop.f32.mrf.mxu1 }
 0x6f1   :  { %v5231_v14 = vadd.f32 %v3541_v30, %v5193_v58 }
 0x6f2   :  { %v3543_v38 = vpop.f32.mrf.mxu1 }
 0x6f3   :  { %v3544_v29 = vadd.f32 %v3543_v38, %v3542_v13 }
 0x6f4   :  { %v3545_v7 = vpop.f32.mrf.mxu1 }
 0x6f5   :  { %v5236_v46 = vadd.f32 %v3544_v29, %v5193_v58 }
 0x6f6   :  { %v3546_v41 = vpop.f32.mrf.mxu1 }
 0x6f7   :  { %v3547_v25 = vadd.f32 %v3546_v41, %v3545_v7 }
 0x6f8   :  { %v3548_v57 = vpop.f32.mrf.mxu1 }
 0x6f9   :  { %v5239_v61 = vadd.f32 %v3547_v25, %v5193_v58 }
 0x6fa   :  { %v3549_v10 = vpop.f32.mrf.mxu1 }
 0x6fb   :  { %v3550_v21 = vadd.f32 %v3549_v10, %v3548_v57 }
 0x6fc   :  { %v3551_v5 = vpop.f32.mrf.mxu1 }
 0x6fd   :  { %v5244_v13 = vadd.f32 %v3550_v21, %v5193_v58 }
 0x6fe   :  { %v3552_v22 = vpop.f32.mrf.mxu1 }
 0x6ff   :  { %v3553_v36 = vadd.f32 %v3552_v22, %v3551_v5 }
 0x700   :  { %v3554_v30 = vpop.f32.mrf.mxu1 }
 0x701   :  { %v5247_v38 = vadd.f32 %v3553_v36, %v5193_v58 }
 0x702   :  { %v3555_v29 = vpop.f32.mrf.mxu1 }
 0x703   :  { %v3556_v41 = vadd.f32 %v3555_v29, %v3554_v30 }
 0x704   :  { %v3557_v25 = vpop.f32.mrf.mxu1 }
 0x705   :  { %v2026_v57 = vadd.f32 %v3556_v41, %v5193_v58 }
 0x706   :  { %v3558_v17 = vpop.f32.mrf.mxu1 }
 0x707   :  { %v3559_v55 = vadd.f32 %v3558_v17, %v3557_v25 }
 0x708   :  { %v3560_v43 = vpop.f32.mrf.mxu1 }
 0x709   :  { %v2029_v10 = vadd.f32 %v3559_v55, %v5193_v58 }
 0x70a   :  { %v3561_v5 = vpop.f32.mrf.mxu1 }
 0x70b   :  { %v2103_v22 = vpack.c.bf16 %v2029_v10, %v2026_v57  ;;  %v3562_v21 = vadd.f32 %v3561_v5, %v3560_v43 }
 0x70c   :  { %v3563_v42 = vpop.f32.mrf.mxu1 }
 0x70d   :  { %v5254_v23 = vadd.f32 %v3562_v21, %v5193_v58 }
 0x70e   :  { %v3564_v15 = vpop.f32.mrf.mxu1 }
 0x70f   :  { %v3565_v36 = vadd.f32 %v3564_v15, %v3563_v42 }
 0x710   :  { %v3566_v53 = vpop.f32.mrf.mxu1 }
 0x711   :  { %v5257_v30 = vadd.f32 %v3565_v36, %v5193_v58 }
 0x712   :  { %v3567_v29 = vpop.f32.mrf.mxu1 }
 0x713   :  { %v3568_v17 = vadd.f32 %v3567_v29, %v3566_v53 }
 0x714   :  { %v3569_v25 = vpop.f32.mrf.mxu1 }
 0x715   :  { %v5264_v43 = vadd.f32 %v3568_v17, %v5193_v58 }
 0x716   :  { %v3570_v55 = vpop.f32.mrf.mxu1 }
 0x717   :  { %v3571_v7 = vadd.f32 %v3570_v55, %v3569_v25 }
 0x718   :  { %v5261_v57 = vpop.f32.mrf.mxu1 }
 0x719   :  { %v5267_v42 = vadd.f32 %v3571_v7, %v5193_v58 }
 0x71a   :  { %v3573_v15 = vpop.f32.mrf.mxu1 }
 0x71c   :  { %v3575_v5 = vpop.f32.mrf.mxu1 }
 0x71e   :  { %v3576_v53 = vpop.f32.mrf.mxu1 }
 0x720   :  { %v3578_v21 = vpop.f32.mrf.mxu1 }
 0x722   :  { %v3579_v36 = vpop.f32.mrf.mxu1 }
 0x724   :  { %v3581_v29 = vpop.f32.mrf.mxu1 }
 0x726   :  { %v3582_v41 = vpop.f32.mrf.mxu1 }
 0x728   :  { %v3584_v3 = vpop.f32.mrf.mxu1 }
 0x72a   :  { %v3585_v25 = vpop.f32.mrf.mxu1 }
 0x72c   :  { %v3587_v55 = vpop.f32.mrf.mxu1 }
 0x72e   :  { %v3588_v45 = vpop.f32.mrf.mxu1 }
 0x72f   :  { %v3589_v59 = vadd.f32 %v3588_v45, %v3587_v55  ;;  %v6004_v45 = vpack.c.bf16 %v5223_v19, %v5220_v18  ;;  %v6009_v18 = vpack.c.bf16 %v5199_v35, %v5196_v39  ;;  %v6011_v39 = vld [vmem:[#allocation5_spill] sm:$0xff]  ;;  %v6014_v35 = vld [vmem:[#allocation8_spill] sm:$0xff]  ;;  %v6024_v19 = vld [vmem:[#allocation18_spill] sm:$0xff] }
 0x730   :  { %v3590_v6 = vpop.f32.mrf.mxu1 }
 0x732   :  { %v3591_v17 = vpop.f32.mrf.mxu1 }
 0x733   :  { %v3592_v24 = vadd.f32 %v3591_v17, %v3590_v6 }
 0x734   :  { %v3593_v44 = vpop.f32.mrf.mxu1 }
 0x736   :  { %v3594_v52 = vpop.f32.mrf.mxu1 }
 0x737   :  { %v3595_v1 = vadd.f32 %v3594_v52, %v3593_v44  ;;  %v6003_v52 = vpack.c.bf16 %v5231_v14, %v5228_v27  ;;  %v6007_v27 = vpack.c.bf16 %v5207_v51, %v5204_v28  ;;  %v6015_v28 = vld [vmem:[#allocation9_spill] sm:$0xff]  ;;  %v6021_v51 = vld [vmem:[#allocation15_spill] sm:$0xff] }
 0x738   :  { %v3596_v7 = vpop.f32.mrf.mxu1  ;;  %v2274_v14 = vld [vmem:[%s5861_s10 + $0x8] sm:$0xff] }
 0x739   :  { %v2077_v9 = vadd.f32 %v3595_v1, %v5193_v58 }
 0x73a   :  { %v3597_v56 = vpop.f32.mrf.mxu1 }
 0x73b   :  { %v3598_v12 = vadd.f32 %v3597_v56, %v3596_v7 }
 0x73c   :  { %v3599_v60 = vpop.f32.mrf.mxu1 }
 0x73d   :  { %v2082_v37 = vadd.f32 %v3598_v12, %v5193_v58  ;;  %v2069_v12 = vadd.f32 %v3589_v59, %v5193_v58  ;;  %v6002_v59 = vpack.c.bf16 %v5239_v61, %v5236_v46  ;;  %v6006_v46 = vpack.c.bf16 %v5267_v42, %v5264_v43  ;;  %v2273_v61 = vld [vmem:[%s5861_s10] sm:$0xff]  ;;  %v6031_v43 = vld [vmem:[#allocation25_spill] sm:$0xff] }
 0x73e   :  { %v3600_v31 = vpop.f32.mrf.mxu1  ;;  %v6032_v42 = vld [vmem:[#allocation26_spill] sm:$0xff] }
 0x73f   :  { %v3601_v16 = vadd.f32 %v3600_v31, %v3599_v60 }
 0x740   :  { %v3602_v50 = vpop.f32.mrf.mxu1 }
 0x741   :  { %v2085_v40 = vadd.f32 %v3601_v16, %v5193_v58  ;;  %v2074_v16 = vadd.f32 %v3592_v24, %v5193_v58  ;;  %v2275_v24 = vld [vmem:[%s5861_s10 + $0x10] sm:$0xff] }
 0x742   :  { %v3603_v10 = vpop.f32.mrf.mxu1 }
 0x743   :  { %v3604_v32 = vadd.f32 %v3603_v10, %v3602_v50  ;;  %v2110_v31 = vpack.c.bf16 %v2085_v40, %v2082_v37  ;;  %v3577_v40 = vadd.f32 %v3576_v53, %v3575_v5 }
 0x744   :  { %v3605_v34 = vpop.f32.mrf.mxu1 }
 0x745   :  { %v2090_v2 = vadd.f32 %v3604_v32, %v5193_v58  ;;  %v2053_v60 = vadd.f32 %v3577_v40, %v5193_v58 }
 0x746   :  { %v3606_v11 = vpop.f32.mrf.mxu1 }
 0x747   :  { %v3607_v0 = vadd.f32 %v3606_v11, %v3605_v34  ;;  %v2276_v11 = vld [vmem:[%s5861_s10 + $0x18] sm:$0xff]  ;;  %v3586_v34 = vadd.f32 %v3585_v25, %v3584_v3  ;;  %v6005_v3 = vpack.c.bf16 %v5215_v62, %v5212_v26  ;;  %v6022_v26 = vld [vmem:[#allocation16_spill] sm:$0xff] }
 0x748   :  { %3994 = vmatprep.subr.mxu1 %v2276_v11  ;;  %v6023_v62 = vld [vmem:[#allocation17_spill] sm:$0xff] }
 0x749   :  { %v2093_v4 = vadd.f32 %v3607_v0, %v5193_v58  ;;  %3998 = vmatpush3.msra.mxu1 %v2276_v11  ;;  %v3583_v0 = vadd.f32 %v3582_v41, %v3581_v29  ;;  %v2066_v37 = vadd.f32 %v3586_v34, %v5193_v58  ;;  %v6029_v41 = vld [vmem:[#allocation23_spill] sm:$0xff] }
 0x74a   :  { %3995 = vmatprep.subr.mxu1 %v2275_v24 }
 0x74b   :  { %v2111_v20 = vpack.c.bf16 %v2093_v4, %v2090_v2  ;;  %v2109_v4 = vpack.c.bf16 %v2077_v9, %v2074_v16  ;;  %v6001_v2 = vpack.c.bf16 %v5247_v38, %v5244_v13  ;;  %v2061_v1 = vadd.f32 %v3583_v0, %v5193_v58  ;;  %3999 = vmatpush3.msra.mxu1 %v2275_v24  ;;  %v6025_v13 = vld [vmem:[#allocation19_spill] sm:$0xff]  ;;  %v6026_v38 = vld [vmem:[#allocation20_spill] sm:$0xff] }
 0x74c   :  { %v2108_v32 = vpack.c.bf16 %v2069_v12, %v2066_v37  ;;  %v3574_v9 = vadd.f32 %v3573_v15, %v5261_v57  ;;  %3996 = vmatprep.subr.mxu1 %v2274_v14  ;;  %v6030_v57 = vld [vmem:[#allocation24_spill] sm:$0xff]  ;;  %v6033_v15 = vld [vmem:[#allocation2_spill] sm:$0xff] }
 0x74d   :  { %3608 = vmatprep.subr.bf16.mxu0 %v2111_v20  ;;  %v3580_v20 = vadd.f32 %v3579_v36, %v3578_v21  ;;  %4000 = vmatpush3.msra.mxu1 %v2274_v14 }
 0x74e   :  { %3609 = vmatpush3.bf16.msra.mxu0 %v2103_v22  ;;  %v2050_v44 = vadd.f32 %v3574_v9, %v5193_v58  ;;  %3997 = vmatprep.subr.mxu1 %v2273_v61  ;;  %v6027_v22 = vld [vmem:[#allocation21_spill] sm:$0xff] }
 0x74f   :  { %3610 = vmatprep.subr.bf16.mxu0 %v2110_v31  ;;  %v2058_v50 = vadd.f32 %v3580_v20, %v5193_v58  ;;  %v6008_v58 = vpack.c.bf16 %v5257_v30, %v5254_v23  ;;  %v6010_v23 = vld [vmem:[#allocation4_spill] sm:$0xff]  ;;  %4001 = vmatpush3.msra.mxu1 %v2273_v61  ;;  %v6028_v30 = vld [vmem:[#allocation22_spill] sm:$0xff] }
 0x750   :  { %v2106_v6 = vpack.c.bf16 %v2053_v60, %v2050_v44 }
 0x751   :  { %v2107_v56 = vpack.c.bf16 %v2061_v1, %v2058_v50 }
 0x752   :  { %3611 = vmatpush3.bf16.msra.mxu0 %v6001_v2 }
 0x753   :  { %3612 = vmatprep.subr.bf16.mxu0 %v2109_v4 }
 0x756   :  { %3613 = vmatpush3.bf16.msra.mxu0 %v6002_v59 }
 0x757   :  { %3614 = vmatprep.subr.bf16.mxu0 %v2108_v32 }
 0x75a   :  { %3615 = vmatpush3.bf16.msra.mxu0 %v6003_v52 }
 0x75b   :  { %3616 = vmatprep.subr.bf16.mxu0 %v2107_v56 }
 0x75e   :  { %3617 = vmatpush3.bf16.msra.mxu0 %v6004_v45 }
 0x75f   :  { %3618 = vmatprep.subr.bf16.mxu0 %v2106_v6 }
 0x762   :  { %3619 = vmatpush3.bf16.msra.mxu0 %v6005_v3 }
 0x763   :  { %3620 = vmatprep.subr.bf16.mxu0 %v6006_v46 }
 0x766   :  { %3621 = vmatpush3.bf16.msra.mxu0 %v6007_v27 }
 0x767   :  { %3622 = vmatprep.subr.bf16.mxu0 %v6008_v58 }
 0x76a   :  { %3623 = vmatpush3.bf16.msra.mxu0 %v6009_v18 }
 0x76b   :  { %3938 = vmatprep.subr.mxu0 %v2276_v11 }
 0x76d   :  { %2145 = vmatmul.mubr.bf16.vlgmr.msra.gmra.mxu0 %v5007_v47  ;;  %v6012_v47 = vld [vmem:[#allocation6_spill] sm:$0xff] }
 0x76e   :  { %2152 = vmatprep.mubr.bf16.mxu0 %v5013_v8  ;;  %3939 = vmatpush3.msra.mxu0 %v2276_v11  ;;  %v6013_v8 = vld [vmem:[#allocation7_spill] sm:$0xff] }
 0x76f   :  { %3940 = vmatprep.subr.mxu0 %v2275_v24 }
 0x770   :  { %3941 = vmatpush3.msra.mxu0 %v2275_v24 }
 0x771   :  { %3942 = vmatprep.subr.mxu0 %v2274_v14 }
 0x772   :  { %3943 = vmatpush3.msra.mxu0 %v2274_v14 }
 0x773   :  { %3944 = vmatprep.subr.mxu0 %v2273_v61 }
 0x774   :  { %3945 = vmatpush3.msra.mxu0 %v2273_v61 }
 0x775   :  { %2153 = vmatmul.mubr.bf16.gmra.mxu0 %v5019_v48  ;;  %v6016_v48 = vld [vmem:[#allocation10_spill] sm:$0xff] }
 0x776   :  { %2160 = vmatprep.mubr.bf16.mxu0 %v5025_v49  ;;  %v6017_v49 = vld [vmem:[#allocation11_spill] sm:$0xff] }
 0x77d   :  { %2161 = vmatmul.mubr.bf16.gmra.mxu0 %v5031_v63  ;;  %v6018_v63 = vld [vmem:[#allocation12_spill] sm:$0xff] }
 0x77e   :  { %2168 = vmatprep.mubr.bf16.mxu0 %v5037_v54  ;;  %v6019_v54 = vld [vmem:[#allocation13_spill] sm:$0xff] }
 0x785   :  { %2169 = vmatmul.mubr.bf16.gmra.mxu0 %v5043_v33  ;;  %v6020_v33 = vld [vmem:[#allocation14_spill] sm:$0xff] }
 0x786   :  { %2176 = vmatprep.mubr.bf16.mxu0 %v6010_v23 }
 0x78d   :  { %2177 = vmatmul.mubr.bf16.gmra.mxu0 %v6011_v39 }
 0x78e   :  { %2184 = vmatprep.mubr.bf16.mxu0 %v6012_v47 }
 0x795   :  { %2185 = vmatmul.mubr.bf16.gmra.mxu0 %v6013_v8 }
 0x796   :  { %2192 = vmatprep.mubr.bf16.mxu0 %v6014_v35 }
 0x79d   :  { %2193 = vmatmul.mubr.bf16.gmra.mxu0 %v6015_v28 }
 0x79e   :  { %2200 = vmatprep.mubr.bf16.mxu0 %v6016_v48 }
 0x7a5   :  { %2201 = vmatmul.mubr.bf16.gmra.mxu0 %v6017_v49 }
 0x7a6   :  { %2208 = vmatprep.mubr.bf16.mxu0 %v6018_v63 }
 0x7ad   :  { %2209 = vmatmul.mubr.bf16.gmra.mxu0 %v6019_v54 }
 0x7ae   :  { %2216 = vmatprep.mubr.bf16.mxu0 %v6020_v33 }
 0x7b5   :  { %2217 = vmatmul.mubr.bf16.gmra.mxu0 %v6021_v51 }
 0x7b6   :  { %2224 = vmatprep.mubr.bf16.mxu0 %v6022_v26 }
 0x7bd   :  { %2225 = vmatmul.mubr.bf16.gmra.mxu0 %v6023_v62 }
 0x7be   :  { %2232 = vmatprep.mubr.bf16.mxu0 %v6024_v19 }
 0x7c5   :  { %2233 = vmatmul.mubr.bf16.gmra.mxu0 %v6025_v13 }
 0x7c6   :  { %2240 = vmatprep.mubr.bf16.mxu0 %v6026_v38 }
 0x7cd   :  { %2241 = vmatmul.mubr.bf16.gmra.mxu0 %v6027_v22 }
 0x7ce   :  { %2248 = vmatprep.mubr.bf16.mxu0 %v6028_v30 }
 0x7d5   :  { %2249 = vmatmul.mubr.bf16.gmra.mxu0 %v6029_v41 }
 0x7d6   :  { %2256 = vmatprep.mubr.bf16.mxu0 %v6030_v57 }
 0x7dd   :  { %2257 = vmatmul.mubr.bf16.gmra.mxu0 %v6031_v43 }
 0x7de   :  { %2264 = vmatprep.mubr.bf16.mxu0 %v6032_v42 }
 0x7e5   :  { %2265 = vmatmul.mubr.bf16.gmra.mxu0 %v6033_v15 }
 0x82d   :  { %v3624_v10 = vpop.f32.mrf.mxu0 }
 0x82f   :  { %v3625_v5 = vpop.f32.mrf.mxu0 }
 0x830   :  { %v3626_v53 = vadd.f32 %v3625_v5, %v3624_v10 }
 0x831   :  { %v3627_v21 = vpop.f32.mrf.mxu0 }
 0x832   :  { %3946 = vmatprep.mubr.msk.f32.mxu0 %vm2284_vm2, %v3626_v53 }
 0x833   :  { %v3628_v36 = vpop.f32.mrf.mxu0 }
 0x834   :  { %v3629_v29 = vadd.f32 %v3628_v36, %v3627_v21 }
 0x835   :  { %v3630_v25 = vpop.f32.mrf.mxu0 }
 0x836   :  { %3947 = vmatmul.mubr.msk.f32.vlgmr.msra.gmra.mxu0 %vm2284_vm2, %v3629_v29 }
 0x837   :  { %v3631_v55 = vpop.f32.mrf.mxu0 }
 0x838   :  { %v3632_v17 = vadd.f32 %v3631_v55, %v3630_v25 }
 0x839   :  { %v3633_v7 = vpop.f32.mrf.mxu0 }
 0x83a   :  { %3949 = vmatprep.mubr.msk.f32.mxu0 %vm2284_vm2, %v3632_v17 }
 0x83b   :  { %v3634_v31 = vpop.f32.mrf.mxu0 }
 0x83c   :  { %v3635_v11 = vadd.f32 %v3634_v31, %v3633_v7 }
 0x83d   :  { %v3636_v34 = vpop.f32.mrf.mxu0 }
 0x83e   :  { %3950 = vmatmul.mubr.msk.f32.gmra.mxu0 %vm2284_vm2, %v3635_v11 }
 0x83f   :  { %v3637_v16 = vpop.f32.mrf.mxu0 }
 0x840   :  { %v3638_v0 = vadd.f32 %v3637_v16, %v3636_v34 }
 0x841   :  { %v3639_v12 = vpop.f32.mrf.mxu0 }
 0x842   :  { %3952 = vmatprep.mubr.msk.f32.mxu0 %vm2284_vm2, %v3638_v0 }
 0x843   :  { %v3640_v4 = vpop.f32.mrf.mxu0 }
 0x844   :  { %v3641_v2 = vadd.f32 %v3640_v4, %v3639_v12 }
 0x845   :  { %v3642_v20 = vpop.f32.mrf.mxu0 }
 0x846   :  { %3953 = vmatmul.mubr.msk.f32.gmra.mxu0 %vm2284_vm2, %v3641_v2 }
 0x847   :  { %v3643_v37 = vpop.f32.mrf.mxu0 }
 0x848   :  { %v3644_v40 = vadd.f32 %v3643_v37, %v3642_v20 }
 0x849   :  { %v3645_v1 = vpop.f32.mrf.mxu0 }
 0x84a   :  { %3955 = vmatprep.mubr.msk.f32.mxu1 %vm2284_vm2, %v3644_v40 }
 0x84b   :  { %v3646_v32 = vpop.f32.mrf.mxu0 }
 0x84c   :  { %v3647_v24 = vadd.f32 %v3646_v32, %v3645_v1 }
 0x84d   :  { %v3648_v59 = vpop.f32.mrf.mxu0 }
 0x84e   :  { %3956 = vmatmul.mubr.msk.f32.vlgmr.msra.gmra.mxu1 %vm2284_vm2, %v3647_v24 }
 0x84f   :  { %v3649_v9 = vpop.f32.mrf.mxu0 }
 0x850   :  { %v3650_v50 = vadd.f32 %v3649_v9, %v3648_v59 }
 0x851   :  { %v3651_v60 = vpop.f32.mrf.mxu0 }
 0x852   :  { %3958 = vmatprep.mubr.msk.f32.mxu1 %vm2284_vm2, %v3650_v50 }
 0x853   :  { %v3652_v56 = vpop.f32.mrf.mxu0 }
 0x854   :  { %v3653_v52 = vadd.f32 %v3652_v56, %v3651_v60 }
 0x855   :  { %v3654_v44 = vpop.f32.mrf.mxu0 }
 0x856   :  { %3959 = vmatmul.mubr.msk.f32.gmra.mxu1 %vm2284_vm2, %v3653_v52 }
 0x857   :  { %v3655_v6 = vpop.f32.mrf.mxu0 }
 0x858   :  { %v3656_v45 = vadd.f32 %v3655_v6, %v3654_v44 }
 0x859   :  { %v3657_v3 = vpop.f32.mrf.mxu0 }
 0x85a   :  { %3961 = vmatprep.mubr.msk.f32.mxu1 %vm2284_vm2, %v3656_v45 }
 0x85b   :  { %v3658_v46 = vpop.f32.mrf.mxu0 }
 0x85c   :  { %v3659_v27 = vadd.f32 %v3658_v46, %v3657_v3 }
 0x85d   :  { %v3660_v58 = vpop.f32.mrf.mxu0 }
 0x85e   :  { %3962 = vmatmul.mubr.msk.f32.gmra.mxu1 %vm2284_vm2, %v3659_v27  ;;  %v5389_v27 = vld [vmem:[%s5862_s11] ss:$0 sm:$0xff] }
 0x85f   :  { %v3661_v18 = vpop.f32.mrf.mxu0 }
 0x860   :  { %v3662_v23 = vadd.f32 %v3661_v18, %v3660_v58 }
 0x861   :  { %v3663_v39 = vpop.f32.mrf.mxu0 }
 0x862   :  { %3964 = vmatprep.mubr.msk.f32.mxu1 %vm2284_vm2, %v3662_v23 }
 0x863   :  { %v3664_v47 = vpop.f32.mrf.mxu0 }
 0x864   :  { %v3665_v8 = vadd.f32 %v3664_v47, %v3663_v39 }
 0x865   :  { %v3666_v35 = vpop.f32.mrf.mxu0 }
 0x866   :  { %3965 = vmatmul.mubr.msk.f32.gmra.mxu1 %vm2284_vm2, %v3665_v8 }
 0x867   :  { %v3667_v28 = vpop.f32.mrf.mxu0 }
 0x868   :  { %v3668_v48 = vadd.f32 %v3667_v28, %v3666_v35 }
 0x869   :  { %v3669_v49 = vpop.f32.mrf.mxu0 }
 0x86a   :  { %3967 = vmatprep.mubr.msk.f32.mxu1 %vm2284_vm2, %v3668_v48 }
 0x86b   :  { %v3670_v63 = vpop.f32.mrf.mxu0 }
 0x86c   :  { %v3671_v54 = vadd.f32 %v3670_v63, %v3669_v49 }
 0x86d   :  { %v3672_v33 = vpop.f32.mrf.mxu0 }
 0x86e   :  { %3968 = vmatmul.mubr.msk.f32.gmra.mxu1 %vm2284_vm2, %v3671_v54 }
 0x86f   :  { %v3673_v51 = vpop.f32.mrf.mxu0 }
 0x870   :  { %v3674_v26 = vadd.f32 %v3673_v51, %v3672_v33 }
 0x871   :  { %v3675_v62 = vpop.f32.mrf.mxu0 }
 0x872   :  { %3970 = vmatprep.mubr.msk.f32.mxu1 %vm2284_vm2, %v3674_v26 }
 0x873   :  { %v3676_v19 = vpop.f32.mrf.mxu0 }
 0x874   :  { %v3677_v14 = vadd.f32 %v3676_v19, %v3675_v62 }
 0x875   :  { %v3678_v61 = vpop.f32.mrf.mxu0 }
 0x876   :  { %3971 = vmatmul.mubr.msk.f32.gmra.mxu1 %vm2284_vm2, %v3677_v14 }
 0x877   :  { %v3679_v13 = vpop.f32.mrf.mxu0 }
 0x878   :  { %v3680_v38 = vadd.f32 %v3679_v13, %v3678_v61 }
 0x879   :  { %v3681_v22 = vpop.f32.mrf.mxu0 }
 0x87a   :  { %3973 = vmatprep.mubr.msk.f32.mxu1 %vm2284_vm2, %v3680_v38 }
 0x87b   :  { %v3682_v30 = vpop.f32.mrf.mxu0 }
 0x87c   :  { %v3683_v41 = vadd.f32 %v3682_v30, %v3681_v22 }
 0x87d   :  { %v3684_v57 = vpop.f32.mrf.mxu0 }
 0x87e   :  { %3974 = vmatmul.mubr.msk.f32.gmra.mxu1 %vm2284_vm2, %v3683_v41 }
 0x87f   :  { %v3685_v43 = vpop.f32.mrf.mxu0 }
 0x880   :  { %v3686_v42 = vadd.f32 %v3685_v43, %v3684_v57 }
 0x881   :  { %v3687_v15 = vpop.f32.mrf.mxu0 }
 0x882   :  { %3976 = vmatprep.mubr.msk.f32.mxu1 %vm2284_vm2, %v3686_v42 }
 0x883   :  { %v3688_v10 = vpop.f32.mrf.mxu0 }
 0x884   :  { %v3689_v5 = vadd.f32 %v3688_v10, %v3687_v15 }
 0x885   :  { %v3690_v53 = vpop.f32.mrf.mxu0 }
 0x886   :  { %3977 = vmatmul.mubr.msk.f32.gmra.mxu1 %vm2284_vm2, %v3689_v5 }
 0x887   :  { %v3691_v21 = vpop.f32.mrf.mxu0 }
 0x888   :  { %v3692_v36 = vadd.f32 %v3691_v21, %v3690_v53 }
 0x889   :  { %v3693_v29 = vpop.f32.mrf.mxu0 }
 0x88a   :  { %3979 = vmatprep.mubr.msk.f32.mxu1 %vm2284_vm2, %v3692_v36 }
 0x88b   :  { %v3694_v25 = vpop.f32.mrf.mxu0 }
 0x88c   :  { %v3695_v55 = vadd.f32 %v3694_v25, %v3693_v29 }
 0x88d   :  { %v3696_v17 = vpop.f32.mrf.mxu0 }
 0x88e   :  { %3980 = vmatmul.mubr.msk.f32.gmra.mxu1 %vm2284_vm2, %v3695_v55 }
 0x88f   :  { %v3697_v7 = vpop.f32.mrf.mxu0 }
 0x890   :  { %v3698_v31 = vadd.f32 %v3697_v7, %v3696_v17 }
 0x891   :  { %v3699_v11 = vpop.f32.mrf.mxu0 }
 0x892   :  { %3982 = vmatprep.mubr.msk.f32.mxu1 %vm2284_vm2, %v3698_v31 }
 0x893   :  { %v3700_v34 = vpop.f32.mrf.mxu0 }
 0x894   :  { %v3701_v16 = vadd.f32 %v3700_v34, %v3699_v11 }
 0x895   :  { %v3702_v0 = vpop.f32.mrf.mxu0 }
 0x896   :  { %3983 = vmatmul.mubr.msk.f32.gmra.mxu1 %vm2284_vm2, %v3701_v16 }
 0x897   :  { %v3703_v12 = vpop.f32.mrf.mxu0 }
 0x898   :  { %v3704_v4 = vadd.f32 %v3703_v12, %v3702_v0 }
 0x899   :  { %v3705_v2 = vpop.f32.mrf.mxu0 }
 0x89a   :  { %3985 = vmatprep.mubr.msk.f32.mxu1 %vm2284_vm2, %v3704_v4 }
 0x89b   :  { %v3706_v20 = vpop.f32.mrf.mxu0 }
 0x89c   :  { %v3707_v37 = vadd.f32 %v3706_v20, %v3705_v2 }
 0x89d   :  { %v3708_v40 = vpop.f32.mrf.mxu0 }
 0x89e   :  { %3986 = vmatmul.mubr.msk.f32.gmra.mxu1 %vm2284_vm2, %v3707_v37 }
 0x89f   :  { %v3709_v1 = vpop.f32.mrf.mxu0 }
 0x8a0   :  { %v3710_v32 = vadd.f32 %v3709_v1, %v3708_v40 }
 0x8a1   :  { %v3711_v24 = vpop.f32.mrf.mxu0 }
 0x8a2   :  { %3988 = vmatprep.mubr.msk.f32.mxu1 %vm2284_vm2, %v3710_v32 }
 0x8a3   :  { %v3712_v59 = vpop.f32.mrf.mxu0 }
 0x8a4   :  { %v3713_v9 = vadd.f32 %v3712_v59, %v3711_v24 }
 0x8a5   :  { %v3714_v50 = vpop.f32.mrf.mxu0 }
 0x8a6   :  { %3989 = vmatmul.mubr.msk.f32.gmra.mxu1 %vm2284_vm2, %v3713_v9 }
 0x8a7   :  { %v3715_v60 = vpop.f32.mrf.mxu0 }
 0x8a8   :  { %v3716_v56 = vadd.f32 %v3715_v60, %v3714_v50 }
 0x8a9   :  { %v3717_v52 = vpop.f32.mrf.mxu0 }
 0x8aa   :  { %3991 = vmatprep.mubr.msk.f32.mxu1 %vm2284_vm2, %v3716_v56 }
 0x8ab   :  { %v3718_v44 = vpop.f32.mrf.mxu0 }
 0x8ac   :  { %v3719_v6 = vadd.f32 %v3718_v44, %v3717_v52 }
 0x8ae   :  { %3992 = vmatmul.mubr.msk.f32.gmra.mxu1 %vm2284_vm2, %v3719_v6 }
 0x8f6   :  { %v3948_v45 = vpop.f32.mrf.mxu0 }
 0x8f7   :  { %v5395_v39 = vadd.f32 %v3948_v45, %v5389_v27 }
 0x8f8   :  { %v2447_v3 = vpop.f32.mrf.mxu0 }
 0x8f9   :  { %v5392_v18 = vadd.f32 %v5389_v27, %v2447_v3  ;;  %v2639_v28 = vsel %vm2284_vm2, %v5395_v39, 0.0 }
 0x8fb   :  { %v2638_v8 = vsel %vm2284_vm2, %v5392_v18, 0.0 }
 0x8fc   :  { %v2640_v49 = vadd.f32 %v2639_v28, %v2638_v8 }
 0x8fe   :  { %v3951_v46 = vpop.f32.mrf.mxu0 }
 0x8ff   :  { %v5407_v54 = vadd.f32 %v3951_v46, %v5389_v27 }
 0x900   :  { %v2457_v58 = vpop.f32.mrf.mxu0 }
 0x901   :  { %v5398_v47 = vadd.f32 %v5389_v27, %v2457_v58  ;;  %v2643_v62 = vsel %vm2284_vm2, %v5407_v54, 0.0 }
 0x903   :  { %v2641_v48 = vsel %vm2284_vm2, %v5398_v47, 0.0 }
 0x904   :  { %v2642_v51 = vadd.f32 %v2641_v48, %v2640_v49 }
 0x906   :  { %v3954_v23 = vpop.f32.mrf.mxu0  ;;  %v2644_v14 = vadd.f32 %v2643_v62, %v2642_v51 }
 0x907   :  { %v5417_v13 = vadd.f32 %v3954_v23, %v5389_v27 }
 0x908   :  { %v2467_v35 = vpop.f32.mrf.mxu0 }
 0x909   :  { %v5410_v33 = vadd.f32 %v5389_v27, %v2467_v35  ;;  %v2647_v41 = vsel %vm2284_vm2, %v5417_v13, 0.0 }
 0x90b   :  { %v2645_v19 = vsel %vm2284_vm2, %v5410_v33, 0.0 }
 0x90c   :  { %v2646_v22 = vadd.f32 %v2645_v19, %v2644_v14 }
 0x90e   :  { %v3957_v63 = vpop.f32.mrf.mxu1  ;;  %v2648_v43 = vadd.f32 %v2647_v41, %v2646_v22 }
 0x90f   :  { %v5427_v15 = vadd.f32 %v3957_v63, %v5389_v27 }
 0x910   :  { %v2477_v26 = vpop.f32.mrf.mxu1 }
 0x911   :  { %v5420_v38 = vadd.f32 %v5389_v27, %v2477_v26  ;;  %v2651_v21 = vsel %vm2284_vm2, %v5427_v15, 0.0 }
 0x913   :  { %v2649_v57 = vsel %vm2284_vm2, %v5420_v38, 0.0 }
 0x914   :  { %v2650_v5 = vadd.f32 %v2649_v57, %v2648_v43 }
 0x916   :  { %v3960_v61 = vpop.f32.mrf.mxu1  ;;  %v2652_v29 = vadd.f32 %v2651_v21, %v2650_v5 }
 0x917   :  { %v5437_v55 = vadd.f32 %v3960_v61, %v5389_v27 }
 0x918   :  { %v2487_v30 = vpop.f32.mrf.mxu1 }
 0x919   :  { %v5430_v10 = vadd.f32 %v5389_v27, %v2487_v30  ;;  %v2655_v11 = vsel %vm2284_vm2, %v5437_v55, 0.0 }
 0x91b   :  { %v2653_v36 = vsel %vm2284_vm2, %v5430_v10, 0.0 }
 0x91c   :  { %v2654_v7 = vadd.f32 %v2653_v36, %v2652_v29 }
 0x91e   :  { %v3963_v42 = vpop.f32.mrf.mxu1  ;;  %v2656_v16 = vadd.f32 %v2655_v11, %v2654_v7 }
 0x91f   :  { %v5447_v12 = vadd.f32 %v3963_v42, %v5389_v27 }
 0x920   :  { %v2497_v53 = vpop.f32.mrf.mxu1 }
 0x921   :  { %v5440_v17 = vadd.f32 %v5389_v27, %v2497_v53  ;;  %v2659_v37 = vsel %vm2284_vm2, %v5447_v12, 0.0 }
 0x923   :  { %v2657_v34 = vsel %vm2284_vm2, %v5440_v17, 0.0 }
 0x924   :  { %v2658_v2 = vadd.f32 %v2657_v34, %v2656_v16 }
 0x926   :  { %v3966_v25 = vpop.f32.mrf.mxu1  ;;  %v2660_v1 = vadd.f32 %v2659_v37, %v2658_v2 }
 0x927   :  { %v5457_v24 = vadd.f32 %v3966_v25, %v5389_v27 }
 0x928   :  { %v2507_v31 = vpop.f32.mrf.mxu1 }
 0x929   :  { %v5450_v4 = vadd.f32 %v5389_v27, %v2507_v31  ;;  %v2663_v60 = vsel %vm2284_vm2, %v5457_v24, 0.0 }
 0x92b   :  { %v2661_v40 = vsel %vm2284_vm2, %v5450_v4, 0.0 }
 0x92c   :  { %v2662_v9 = vadd.f32 %v2661_v40, %v2660_v1 }
 0x92e   :  { %v3969_v0 = vpop.f32.mrf.mxu1  ;;  %v2664_v52 = vadd.f32 %v2663_v60, %v2662_v9 }
 0x92f   :  { %v5467_v44 = vadd.f32 %v3969_v0, %v5389_v27 }
 0x930   :  { %v2517_v20 = vpop.f32.mrf.mxu1 }
 0x931   :  { %v5460_v59 = vadd.f32 %v5389_v27, %v2517_v20  ;;  %v2667_v58 = vsel %vm2284_vm2, %v5467_v44, 0.0 }
 0x933   :  { %v2665_v56 = vsel %vm2284_vm2, %v5460_v59, 0.0 }
 0x934   :  { %v2666_v45 = vadd.f32 %v2665_v56, %v2664_v52 }
 0x936   :  { %v3972_v32 = vpop.f32.mrf.mxu1  ;;  %v2668_v8 = vadd.f32 %v2667_v58, %v2666_v45 }
 0x937   :  { %v5477_v35 = vadd.f32 %v3972_v32, %v5389_v27 }
 0x938   :  { %v2527_v50 = vpop.f32.mrf.mxu1 }
 0x939   :  { %v5470_v6 = vadd.f32 %v5389_v27, %v2527_v50  ;;  %v2671_v63 = vsel %vm2284_vm2, %v5477_v35, 0.0 }
 0x93b   :  { %v2669_v23 = vsel %vm2284_vm2, %v5470_v6, 0.0 }
 0x93c   :  { %v2670_v48 = vadd.f32 %v2669_v23, %v2668_v8 }
 0x93e   :  { %v3975_v3 = vpop.f32.mrf.mxu1  ;;  %v2672_v26 = vadd.f32 %v2671_v63, %v2670_v48 }
 0x93f   :  { %v5487_v19 = vadd.f32 %v3975_v3, %v5389_v27 }
 0x940   :  { %v2537_v46 = vpop.f32.mrf.mxu1 }
 0x941   :  { %v5480_v28 = vadd.f32 %v5389_v27, %v2537_v46  ;;  %v2675_v22 = vsel %vm2284_vm2, %v5487_v19, 0.0 }
 0x943   :  { %v2673_v51 = vsel %vm2284_vm2, %v5480_v28, 0.0 }
 0x944   :  { %v2674_v61 = vadd.f32 %v2673_v51, %v2672_v26 }
 0x946   :  { %v3978_v49 = vpop.f32.mrf.mxu1  ;;  %v2676_v41 = vadd.f32 %v2675_v22, %v2674_v61 }
 0x947   :  { %v5497_v43 = vadd.f32 %v3978_v49, %v5389_v27 }
 0x948   :  { %v2547_v62 = vpop.f32.mrf.mxu1 }
 0x949   :  { %v5490_v14 = vadd.f32 %v5389_v27, %v2547_v62  ;;  %v2679_v21 = vsel %vm2284_vm2, %v5497_v43, 0.0 }
 0x94b   :  { %v2677_v30 = vsel %vm2284_vm2, %v5490_v14, 0.0 }
 0x94c   :  { %v2678_v42 = vadd.f32 %v2677_v30, %v2676_v41 }
 0x94e   :  { %v3981_v57 = vpop.f32.mrf.mxu1  ;;  %v2680_v29 = vadd.f32 %v2679_v21, %v2678_v42 }
 0x94f   :  { %v5507_v25 = vadd.f32 %v3981_v57, %v5389_v27 }
 0x950   :  { %v2557_v5 = vpop.f32.mrf.mxu1 }
 0x951   :  { %v5500_v53 = vadd.f32 %v5389_v27, %v2557_v5  ;;  %v2683_v34 = vsel %vm2284_vm2, %v5507_v25, 0.0 }
 0x953   :  { %v2681_v36 = vsel %vm2284_vm2, %v5500_v53, 0.0 }
 0x954   :  { %v2682_v7 = vadd.f32 %v2681_v36, %v2680_v29 }
 0x956   :  { %v5509_v31 = vpop.f32.mrf.mxu1  ;;  %v2684_v0 = vadd.f32 %v2683_v34, %v2682_v7 }
 0x958   :  { %v2567_v11 = vpop.f32.mrf.mxu1 }
 0x959   :  { %v5514_v16 = vadd.f32 %v5389_v27, %v2567_v11 }
 0x95b   :  { %v2685_v2 = vsel %vm2284_vm2, %v5514_v16, 0.0 }
 0x95c   :  { %v2686_v20 = vadd.f32 %v2685_v2, %v2684_v0 }
 0x95e   :  { %v2701_v37 = vrot.slane %v2686_v20, 4 }
 0x960   :  { %v2702_v40 = vadd.f32 %v2701_v37, %v2686_v20 }
 0x962   :  { %v2703_v1 = vrot.slane %v2702_v40, 2 }
 0x964   :  { %v2704_v32 = vadd.f32 %v2703_v1, %v2702_v40 }
 0x966   :  { %v2705_v9 = vrot.slane %v2704_v32, 1 }
 0x968   :  { %v2706_v50 = vadd.f32 %v2705_v9, %v2704_v32 }
 0x96a   :  { %v5518_v60 = vmul.f32 0.005, %v2706_v50 }
 0x96c   :  { %v2708_v56 = vsub.f32 %v5392_v18, %v5518_v60  ;;  %v2709_v52 = vsub.f32 %v5395_v39, %v5518_v60  ;;  %v2710_v45 = vsub.f32 %v5398_v47, %v5518_v60  ;;  %v2711_v3 = vsub.f32 %v5407_v54, %v5518_v60 }
 0x96d   :  { %v2712_v23 = vsub.f32 %v5410_v33, %v5518_v60  ;;  %v2713_v48 = vsub.f32 %v5417_v13, %v5518_v60  ;;  %v2714_v62 = vsub.f32 %v5420_v38, %v5518_v60  ;;  %v2715_v41 = vsub.f32 %v5427_v15, %v5518_v60 }
 0x96e   :  { %v2772_v46 = vmul.f32 %v2708_v56, %v2708_v56  ;;  %v2773_v58 = vmul.f32 %v2709_v52, %v2709_v52  ;;  %v2774_v8 = vmul.f32 %v2710_v45, %v2710_v45  ;;  %v2775_v49 = vmul.f32 %v2711_v3, %v2711_v3 }
 0x96f   :  { %v2776_v61 = vmul.f32 %v2712_v23, %v2712_v23  ;;  %v2777_v57 = vmul.f32 %v2713_v48, %v2713_v48  ;;  %v2716_v21 = vsub.f32 %v5430_v10, %v5518_v60  ;;  %v2778_v36 = vmul.f32 %v2714_v62, %v2714_v62 }
 0x970   :  { %v2804_v63 = vsel %vm2284_vm2, %v2772_v46, 0.0  ;;  %v2805_v51 = vsel %vm2284_vm2, %v2773_v58, 0.0  ;;  %v2807_v22 = vsel %vm2284_vm2, %v2774_v8, 0.0  ;;  %v2809_v42 = vsel %vm2284_vm2, %v2775_v49, 0.0 }
 0x971   :  { %v2806_v26 = vadd.f32 %v2805_v51, %v2804_v63  ;;  %v2811_v29 = vsel %vm2284_vm2, %v2776_v61, 0.0  ;;  %v2717_v11 = vsub.f32 %v5437_v55, %v5518_v60  ;;  %v2779_v34 = vmul.f32 %v2715_v41, %v2715_v41 }
 0x972   :  { %v2813_v0 = vsel %vm2284_vm2, %v2777_v57, 0.0  ;;  %v2718_v20 = vsub.f32 %v5440_v17, %v5518_v60  ;;  %v2780_v37 = vmul.f32 %v2716_v21, %v2716_v21  ;;  %v2815_v40 = vsel %vm2284_vm2, %v2778_v36, 0.0 }
 0x973   :  { %v2808_v30 = vadd.f32 %v2807_v22, %v2806_v26  ;;  %v2719_v32 = vsub.f32 %v5447_v12, %v5518_v60  ;;  %v2781_v9 = vmul.f32 %v2717_v11, %v2717_v11  ;;  %v2817_v50 = vsel %vm2284_vm2, %v2779_v34, 0.0 }
 0x974   :  { %v2720_v52 = vsub.f32 %v5450_v4, %v5518_v60  ;;  %v2782_v45 = vmul.f32 %v2718_v20, %v2718_v20  ;;  %v2819_v3 = vsel %vm2284_vm2, %v2780_v37, 0.0  ;;  %v2721_v58 = vsub.f32 %v5457_v24, %v5518_v60 }
 0x975   :  { %v2810_v5 = vadd.f32 %v2809_v42, %v2808_v30  ;;  %v2783_v23 = vmul.f32 %v2719_v32, %v2719_v32  ;;  %v2821_v8 = vsel %vm2284_vm2, %v2781_v9, 0.0  ;;  %v2722_v49 = vsub.f32 %v5460_v59, %v5518_v60 }
 0x976   :  { %v2784_v63 = vmul.f32 %v2720_v52, %v2720_v52  ;;  %v2823_v51 = vsel %vm2284_vm2, %v2782_v45, 0.0  ;;  %v2723_v62 = vsub.f32 %v5467_v44, %v5518_v60  ;;  %v2785_v61 = vmul.f32 %v2721_v58, %v2721_v58 }
 0x977   :  { %v2812_v7 = vadd.f32 %v2811_v29, %v2810_v5  ;;  %v2825_v22 = vsel %vm2284_vm2, %v2783_v23, 0.0  ;;  %v2724_v41 = vsub.f32 %v5470_v6, %v5518_v60  ;;  %v2786_v57 = vmul.f32 %v2722_v49, %v2722_v49 }
 0x978   :  { %v2827_v42 = vsel %vm2284_vm2, %v2784_v63, 0.0  ;;  %v2725_v21 = vsub.f32 %v5477_v35, %v5518_v60  ;;  %v2787_v36 = vmul.f32 %v2723_v62, %v2723_v62  ;;  %v2829_v29 = vsel %vm2284_vm2, %v2785_v61, 0.0 }
 0x979   :  { %v2814_v2 = vadd.f32 %v2813_v0, %v2812_v7  ;;  %v2726_v11 = vsub.f32 %v5480_v28, %v5518_v60  ;;  %v2788_v34 = vmul.f32 %v2724_v41, %v2724_v41  ;;  %v2831_v0 = vsel %vm2284_vm2, %v2786_v57, 0.0 }
 0x97a   :  { %v2727_v20 = vsub.f32 %v5487_v19, %v5518_v60  ;;  %v2789_v37 = vmul.f32 %v2725_v21, %v2725_v21  ;;  %v2728_v32 = vsub.f32 %v5490_v14, %v5518_v60  ;;  %v2729_v52 = vsub.f32 %v5497_v43, %v5518_v60 }
 0x97b   :  { %v2816_v1 = vadd.f32 %v2815_v40, %v2814_v2  ;;  %v2833_v40 = vsel %vm2284_vm2, %v2787_v36, 0.0  ;;  %v2790_v9 = vmul.f32 %v2726_v11, %v2726_v11  ;;  %v2730_v58 = vsub.f32 %v5500_v53, %v5518_v60 }
 0x97c   :  { %v2791_v45 = vmul.f32 %v2727_v20, %v2727_v20  ;;  %v2792_v23 = vmul.f32 %v2728_v32, %v2728_v32  ;;  %v2731_v49 = vsub.f32 %v5507_v25, %v5518_v60  ;;  %v2793_v63 = vmul.f32 %v2729_v52, %v2729_v52 }
 0x97d   :  { %v2818_v56 = vadd.f32 %v2817_v50, %v2816_v1  ;;  %v2835_v50 = vsel %vm2284_vm2, %v2788_v34, 0.0  ;;  %v2732_v62 = vsub.f32 %v5514_v16, %v5518_v60  ;;  %v2794_v61 = vmul.f32 %v2730_v58, %v2730_v58 }
 0x97e   :  { %v2795_v41 = vmul.f32 %v2731_v49, %v2731_v49  ;;  %v2845_v57 = vsel %vm2284_vm2, %v2793_v63, 0.0  ;;  %v2878_v49 = vld [vmem:[%s5864_s13] sm:$0x1] }
 0x97f   :  { %v2820_v46 = vadd.f32 %v2819_v3, %v2818_v56  ;;  %v2837_v3 = vsel %vm2284_vm2, %v2789_v37, 0.0  ;;  %v2847_v21 = vsel %vm2284_vm2, %v2794_v61, 0.0 }
 0x981   :  { %v2822_v48 = vadd.f32 %v2821_v8, %v2820_v46  ;;  %v2839_v8 = vsel %vm2284_vm2, %v2790_v9, 0.0 }
 0x983   :  { %v2824_v26 = vadd.f32 %v2823_v51, %v2822_v48  ;;  %v2841_v51 = vsel %vm2284_vm2, %v2791_v45, 0.0 }
 0x985   :  { %v2826_v30 = vadd.f32 %v2825_v22, %v2824_v26  ;;  %v2843_v22 = vsel %vm2284_vm2, %v2792_v23, 0.0 }
 0x987   :  { %v2828_v5 = vadd.f32 %v2827_v42, %v2826_v30 }
 0x989   :  { %v2830_v7 = vadd.f32 %v2829_v29, %v2828_v5  ;;  %v2796_v5 = vmul.f32 %v2732_v62, %v2732_v62  ;;  %v2849_v29 = vsel %vm2284_vm2, %v2795_v41, 0.0 }
 0x98b   :  { %v2832_v2 = vadd.f32 %v2831_v0, %v2830_v7  ;;  %v2851_v11 = vsel %vm2284_vm2, %v2796_v5, 0.0 }
 0x98d   :  { %v2834_v1 = vadd.f32 %v2833_v40, %v2832_v2 }
 0x98f   :  { %v2836_v56 = vadd.f32 %v2835_v50, %v2834_v1  ;;  %v3987_v50 = vpop.f32.mrf.mxu1 }
 0x990   :  { %v2583_v62 = vadd.f32 %v3987_v50, %v5389_v27 }
 0x991   :  { %v2838_v46 = vadd.f32 %v2837_v3, %v2836_v56  ;;  %v2577_v56 = vpop.f32.mrf.mxu1 }
 0x992   :  { %v2578_v61 = vadd.f32 %v5389_v27, %v2577_v56 }
 0x993   :  { %v2840_v48 = vadd.f32 %v2839_v8, %v2838_v46  ;;  %v3990_v52 = vpop.f32.mrf.mxu1  ;;  %v2874_v46 = vld [vmem:[%s5863_s12] sm:$0x1] }
 0x995   :  { %v2842_v26 = vadd.f32 %v2841_v51, %v2840_v48  ;;  %v2587_v45 = vpop.f32.mrf.mxu1  ;;  %v2573_v48 = vadd.f32 %v5509_v31, %v5389_v27  ;;  %v6034_v51 = vld [vmem:[#allocation3_spill] sm:$0xff] }
 0x997   :  { %v2844_v30 = vadd.f32 %v2843_v22, %v2842_v26  ;;  %v3993_v3 = vpop.f32.mrf.mxu1  ;;  %v2593_v22 = vadd.f32 %v3990_v52, %v5389_v27 }
 0x998   :  { %v5612_v41 = vadd.f32 %v3993_v3, %v5389_v27 }
 0x999   :  { %v2846_v42 = vadd.f32 %v2845_v57, %v2844_v30  ;;  %v2597_v8 = vpop.f32.mrf.mxu1  ;;  %v2588_v30 = vadd.f32 %v5389_v27, %v2587_v45 }
 0x99a   :  { %v5615_v31 = vadd.f32 %v5389_v27, %v2597_v8 }
 0x99b   :  { %v2848_v36 = vadd.f32 %v2847_v21, %v2846_v42 }
 0x99d   :  { %v2850_v7 = vadd.f32 %v2849_v29, %v2848_v36 }
 0x99f   :  { %v2852_v34 = vadd.f32 %v2851_v11, %v2850_v7 }
 0x9a1   :  { %v2867_v0 = vrot.slane %v2852_v34, 4 }
 0x9a3   :  { %v2868_v2 = vadd.f32 %v2867_v0, %v2852_v34 }
 0x9a5   :  { %v2869_v20 = vrot.slane %v2868_v2, 2 }
 0x9a7   :  { %v2870_v37 = vadd.f32 %v2869_v20, %v2868_v2 }
 0x9a9   :  { %v2871_v40 = vrot.slane %v2870_v37, 1 }
 0x9ab   :  { %v2872_v1 = vadd.f32 %v2871_v40, %v2870_v37 }
 0x9ad   :  { %v2873_v32 = vmul.f32 0.005, %v2872_v1 }
 0x9af   :  { %v2875_v9 = vadd.f32 1e-05, %v2873_v32 }
 0x9b1   :  { %4052 = vrsqrt.f32 %v2875_v9 }
 0x9be   :  { %v4053_v58 = vpop.eup %4052 }
 0x9bf   :  { %v2877_v23 = vmul.f32 %v4053_v58, %v2874_v46 }
 0x9c1   :  { %v2879_v63 = vmul.f32 %v2877_v23, %v5518_v60  ;;  %v5605_v26 = vrot.slane %v2877_v23, %v6034_v51 }
 0x9c3   :  { %v2880_v57 = vsub.f32 %v2878_v49, %v2879_v63  ;;  %v2887_v60 = vmul.f32 %v5605_v26, %v5392_v18  ;;  %v2888_v42 = vmul.f32 %v5605_v26, %v5395_v39  ;;  %v2889_v5 = vmul.f32 %v5605_v26, %v5398_v47 }
 0x9c4   :  { %v2890_v21 = vmul.f32 %v5605_v26, %v5407_v54  ;;  %v2891_v36 = vmul.f32 %v5605_v26, %v5410_v33  ;;  %v2892_v27 = vmul.f32 %v5605_v26, %v5417_v13  ;;  %v2893_v29 = vmul.f32 %v5605_v26, %v5420_v38 }
 0x9c5   :  { %v2894_v18 = vmul.f32 %v5605_v26, %v5427_v15  ;;  %v2895_v39 = vmul.f32 %v5605_v26, %v5430_v10  ;;  %v2896_v47 = vmul.f32 %v5605_v26, %v5437_v55  ;;  %v2897_v54 = vmul.f32 %v5605_v26, %v5440_v17 }
 0x9c6   :  { %v2898_v33 = vmul.f32 %v5605_v26, %v5447_v12  ;;  %v2899_v13 = vmul.f32 %v5605_v26, %v5450_v4  ;;  %v2900_v38 = vmul.f32 %v5605_v26, %v5457_v24  ;;  %v2901_v15 = vmul.f32 %v5605_v26, %v5460_v59 }
 0x9c7   :  { %v2902_v10 = vmul.f32 %v5605_v26, %v5467_v44  ;;  %v2903_v55 = vmul.f32 %v5605_v26, %v5470_v6  ;;  %v2904_v17 = vmul.f32 %v5605_v26, %v5477_v35  ;;  %v2905_v12 = vmul.f32 %v5605_v26, %v5480_v28 }
 0x9c8   :  { %v2906_v4 = vmul.f32 %v5605_v26, %v5487_v19  ;;  %v2907_v24 = vmul.f32 %v5605_v26, %v5490_v14  ;;  %v2908_v59 = vmul.f32 %v5605_v26, %v5497_v43  ;;  %v2909_v44 = vmul.f32 %v5605_v26, %v5500_v53 }
 0x9c9   :  { %v2910_v6 = vmul.f32 %v5605_v26, %v5507_v25  ;;  %v2911_v35 = vmul.f32 %v5605_v26, %v5514_v16  ;;  %v2912_v28 = vmul.f32 %v5605_v26, %v2573_v48  ;;  %v5669_v7 = vrot.slane %v2880_v57, %v6034_v51 }
 0x9ca   :  { %v5672_v19 = vmul.f32 %v5605_v26, %v2583_v62  ;;  %v5675_v14 = vmul.f32 %v5605_v26, %v2578_v61  ;;  %v5678_v43 = vmul.f32 %v5605_v26, %v2593_v22  ;;  %v5681_v53 = vmul.f32 %v5605_v26, %v2588_v30 }
 0x9cb   :  { %v2925_v25 = vadd.f32 %v5669_v7, %v2887_v60  ;;  %v2926_v16 = vadd.f32 %v5669_v7, %v2888_v42  ;;  %v2927_v11 = vadd.f32 %v5669_v7, %v2889_v5  ;;  %v2928_v34 = vadd.f32 %v5669_v7, %v2890_v21 }
 0x9cc   :  { %v2929_v0 = vadd.f32 %v5669_v7, %v2891_v36  ;;  %v2930_v2 = vadd.f32 %v5669_v7, %v2892_v27  ;;  %v2931_v20 = vadd.f32 %v5669_v7, %v2893_v29  ;;  %v2932_v37 = vadd.f32 %v5669_v7, %v2894_v18 }
 0x9cd   :  { %v2933_v40 = vadd.f32 %v5669_v7, %v2895_v39  ;;  %v2934_v1 = vadd.f32 %v5669_v7, %v2896_v47  ;;  %v2935_v32 = vadd.f32 %v5669_v7, %v2897_v54  ;;  %v2936_v9 = vadd.f32 %v5669_v7, %v2898_v33 }
 0x9ce   :  { %v2937_v50 = vadd.f32 %v5669_v7, %v2899_v13  ;;  %v2938_v56 = vadd.f32 %v5669_v7, %v2900_v38  ;;  %v2939_v52 = vadd.f32 %v5669_v7, %v2901_v15  ;;  %v2940_v45 = vadd.f32 %v5669_v7, %v2902_v10 }
 0x9cf   :  { %v2941_v3 = vadd.f32 %v5669_v7, %v2903_v55  ;;  %v2942_v46 = vadd.f32 %v5669_v7, %v2904_v17  ;;  %v2943_v58 = vadd.f32 %v5669_v7, %v2905_v12  ;;  %v2944_v23 = vadd.f32 %v5669_v7, %v2906_v4 }
 0x9d0   :  { %v2945_v8 = vadd.f32 %v5669_v7, %v2907_v24  ;;  %v2946_v48 = vadd.f32 %v5669_v7, %v2908_v59  ;;  %v2947_v49 = vadd.f32 %v5669_v7, %v2909_v44  ;;  %v2948_v63 = vadd.f32 %v5669_v7, %v2910_v6 }
 0x9d1   :  { %v2949_v51 = vadd.f32 %v5669_v7, %v2911_v35  ;;  %v2950_v62 = vadd.f32 %v5669_v7, %v2912_v28  ;;  %v2957_v61 = vmax.f32 %v2925_v25, 0.0  ;;  %v2958_v22 = vmax.f32 %v2926_v16, 0.0 }
 0x9d2   :  { %v2959_v30 = vmax.f32 %v2927_v11, 0.0  ;;  %v2960_v57 = vmax.f32 %v2928_v34, 0.0  ;;  %v2961_v60 = vmax.f32 %v2929_v0, 0.0  ;;  %v2962_v42 = vmax.f32 %v2930_v2, 0.0 }
 0x9d3   :  { %v2963_v5 = vmax.f32 %v2931_v20, 0.0  ;;  %v2964_v21 = vmax.f32 %v2932_v37, 0.0  ;;  %v2965_v36 = vmax.f32 %v2933_v40, 0.0  ;;  %v2966_v27 = vmax.f32 %v2934_v1, 0.0  ;;  %2989 = vst.msk [vmem:[%s5865_s14] sm:$0xff] %vm2284_vm2, %v2957_v61  ;;  %2990 = vst.msk [vmem:[%s5865_s14 + $0x8] sm:$0xff] %vm2284_vm2, %v2958_v22 }
 0x9d4   :  { %v2967_v29 = vmax.f32 %v2935_v32, 0.0  ;;  %v2968_v18 = vmax.f32 %v2936_v9, 0.0  ;;  %v2969_v39 = vmax.f32 %v2937_v50, 0.0  ;;  %v2970_v47 = vmax.f32 %v2938_v56, 0.0  ;;  %2991 = vst.msk [vmem:[%s5865_s14 + $0x10] sm:$0xff] %vm2284_vm2, %v2959_v30  ;;  %2992 = vst.msk [vmem:[%s5865_s14 + $0x18] sm:$0xff] %vm2284_vm2, %v2960_v57 }
 0x9d5   :  { %2993 = vst.msk [vmem:[%s5865_s14 + $0x20] sm:$0xff] %vm2284_vm2, %v2961_v60  ;;  %2994 = vst.msk [vmem:[%s5865_s14 + $0x28] sm:$0xff] %vm2284_vm2, %v2962_v42  ;;  %v2971_v54 = vmax.f32 %v2939_v52, 0.0  ;;  %v2972_v33 = vmax.f32 %v2940_v45, 0.0  ;;  %v2973_v13 = vmax.f32 %v2941_v3, 0.0  ;;  %v2974_v38 = vmax.f32 %v2942_v46, 0.0 }
 0x9d6   :  { %2995 = vst.msk [vmem:[%s5865_s14 + $0x30] sm:$0xff] %vm2284_vm2, %v2963_v5  ;;  %2996 = vst.msk [vmem:[%s5865_s14 + $0x38] sm:$0xff] %vm2284_vm2, %v2964_v21  ;;  %v2975_v15 = vmax.f32 %v2943_v58, 0.0  ;;  %v2976_v10 = vmax.f32 %v2944_v23, 0.0  ;;  %v2977_v55 = vmax.f32 %v2945_v8, 0.0  ;;  %v2978_v17 = vmax.f32 %v2946_v48, 0.0 }
 0x9d7   :  { %2997 = vst.msk [vmem:[%s5865_s14 + $0x40] sm:$0xff] %vm2284_vm2, %v2965_v36  ;;  %2998 = vst.msk [vmem:[%s5865_s14 + $0x48] sm:$0xff] %vm2284_vm2, %v2966_v27  ;;  %v2979_v12 = vmax.f32 %v2947_v49, 0.0  ;;  %v2980_v4 = vmax.f32 %v2948_v63, 0.0  ;;  %v2981_v24 = vmax.f32 %v2949_v51, 0.0  ;;  %v2982_v59 = vmax.f32 %v2950_v62, 0.0 }
 0x9d8   :  { %2999 = vst.msk [vmem:[%s5865_s14 + $0x50] sm:$0xff] %vm2284_vm2, %v2967_v29  ;;  %3000 = vst.msk [vmem:[%s5865_s14 + $0x58] sm:$0xff] %vm2284_vm2, %v2968_v18  ;;  %v2952_v44 = vadd.f32 %v5669_v7, %v5672_v19  ;;  %v2951_v6 = vadd.f32 %v5669_v7, %v5675_v14  ;;  %v2954_v35 = vadd.f32 %v5669_v7, %v5678_v43 }
 0x9d9   :  { %3001 = vst.msk [vmem:[%s5865_s14 + $0x60] sm:$0xff] %vm2284_vm2, %v2969_v39  ;;  %3002 = vst.msk [vmem:[%s5865_s14 + $0x68] sm:$0xff] %vm2284_vm2, %v2970_v47  ;;  %v2953_v28 = vadd.f32 %v5669_v7, %v5681_v53  ;;  %v2918_v19 = vmul.f32 %v5605_v26, %v5612_v41  ;;  %v2917_v14 = vmul.f32 %v5605_v26, %v5615_v31 }
 0x9da   :  { %3003 = vst.msk [vmem:[%s5865_s14 + $0x70] sm:$0xff] %vm2284_vm2, %v2971_v54  ;;  %3004 = vst.msk [vmem:[%s5865_s14 + $0x78] sm:$0xff] %vm2284_vm2, %v2972_v33  ;;  %v2984_v43 = vmax.f32 %v2952_v44, 0.0  ;;  %v2983_v53 = vmax.f32 %v2951_v6, 0.0  ;;  %v2986_v25 = vmax.f32 %v2954_v35, 0.0 }
 0x9db   :  { %3005 = vst.msk [vmem:[%s5865_s14 + $0x80] sm:$0xff] %vm2284_vm2, %v2973_v13  ;;  %3006 = vst.msk [vmem:[%s5865_s14 + $0x88] sm:$0xff] %vm2284_vm2, %v2974_v38  ;;  %v2985_v16 = vmax.f32 %v2953_v28, 0.0  ;;  %v2956_v11 = vadd.f32 %v5669_v7, %v2918_v19  ;;  %v2955_v34 = vadd.f32 %v5669_v7, %v2917_v14 }
 0x9dc   :  { %3007 = vst.msk [vmem:[%s5865_s14 + $0x90] sm:$0xff] %vm2284_vm2, %v2975_v15  ;;  %3008 = vst.msk [vmem:[%s5865_s14 + $0x98] sm:$0xff] %vm2284_vm2, %v2976_v10 }
 0x9dd   :  { %3009 = vst.msk [vmem:[%s5865_s14 + $0xa0] sm:$0xff] %vm2284_vm2, %v2977_v55  ;;  %3010 = vst.msk [vmem:[%s5865_s14 + $0xa8] sm:$0xff] %vm2284_vm2, %v2978_v17  ;;  %v2988_v26 = vmax.f32 %v2956_v11, 0.0  ;;  %v2987_v41 = vmax.f32 %v2955_v34, 0.0 }
 0x9de   :  { %3011 = vst.msk [vmem:[%s5865_s14 + $0xb0] sm:$0xff] %vm2284_vm2, %v2979_v12  ;;  %3012 = vst.msk [vmem:[%s5865_s14 + $0xb8] sm:$0xff] %vm2284_vm2, %v2980_v4 }
 0x9df   :  { %3013 = vst.msk [vmem:[%s5865_s14 + $0xc0] sm:$0xff] %vm2284_vm2, %v2981_v24  ;;  %3014 = vst.msk [vmem:[%s5865_s14 + $0xc8] sm:$0xff] %vm2284_vm2, %v2982_v59 }
 0x9e0   :  { %3016 = vst.msk [vmem:[%s5865_s14 + $0xd8] sm:$0xff] %vm2284_vm2, %v2984_v43  ;;  %3015 = vst.msk [vmem:[%s5865_s14 + $0xd0] sm:$0xff] %vm2284_vm2, %v2983_v53 }
 0x9e1   :  { %3018 = vst.msk [vmem:[%s5865_s14 + $0xe8] sm:$0xff] %vm2284_vm2, %v2986_v25  ;;  %3017 = vst.msk [vmem:[%s5865_s14 + $0xe0] sm:$0xff] %vm2284_vm2, %v2985_v16 }
 0x9e2   :  { %3020 = vst.msk [vmem:[%s5865_s14 + $0xf8] sm:$0xff] %vm2284_vm2, %v2988_v26  ;;  %3019 = vst.msk [vmem:[%s5865_s14 + $0xf0] sm:$0xff] %vm2284_vm2, %v2987_v41 }

</bundles_post_ra>
